<compile_context>
chip_gen: v5e
topology: v5e:2x2
jax: 0.10.0
libtpu: 0.0.40
codegen_flags: <defaults>
</compile_context>

<pallas_src>
import jax
import jax.numpy as jnp
from jax.experimental import pallas as pl
from jax.experimental.pallas import tpu as pltpu

IN_FEATURES = 40483
OUT_FEATURES = 1
K_ALIGNED = (IN_FEATURES // 128) * 128   # 40448 — lane-aligned MXU body
K_TAIL = IN_FEATURES - K_ALIGNED         # 35    — short VPU tail


def _linreg_kernel(x_ref, w_ref, b_ref, o_ref):
    """One batch tile:  o = x @ w.T + b.

    x_ref: (bt, 40483) f32 VMEM tile (streamed from HBM exactly once)
    w_ref: (1, 40483)  f32 VMEM-resident weights (constant index_map)
    b_ref: (1,)        f32 bias scalar in SMEM (fused add, no extra dispatch)
    o_ref: (bt, 1)     f32 output tile
    """
    # MXU contraction over the 128-aligned part of K.  dimension_numbers
    # (((1,),(1,)),((),())) == x @ w.T, so no transposed copy of w is built.
    body = jax.lax.dot_general(
        x_ref[:, :K_ALIGNED], w_ref[:, :K_ALIGNED],
        dimension_numbers=(((1,), (1,)), ((), ())),
        preferred_element_type=jnp.float32,
    )  # (bt, 1)
    # 35-element unaligned tail: tiny masked VPU multiply + reduce.
    tail = jnp.sum(x_ref[:, K_ALIGNED:] * w_ref[:, K_ALIGNED:],
                   axis=-1, keepdims=True)  # (bt, 1)
    # Bias rides free in the VPU slot right before the store.
    o_ref[...] = (body + tail + b_ref[0]).astype(o_ref.dtype)


def _plan_tiles(batch):
    """Pick (batch_tile, padded_batch).

    * bt is a multiple of 8 (sublane tiling) or equals the full batch.
    * bt <= 64 rows: double-buffered x tile <= ~21 MiB (safe on v5e/v6e/v7x).
    * >= 2 grid steps whenever batch >= 16 so v7x's second TensorCore gets
      half of the HBM stream (below 16 rows a sub-8-row block would violate
      the (8,128) tiling rule; those sizes are launch-latency bound anyway).
    * large batches not divisible by 8 get zero-padded up to 8 in the wrapper
      (output sliced back) instead of a VMEM-busting (batch, K) block.
    """
    if batch % 8 != 0 and batch <= 64:
        return batch, batch                      # full-array block, no padding
    padded = -(-batch // 8) * 8                  # round up to a multiple of 8
    cap = min(64, padded)
    if padded >= 16:
        cap = min(cap, padded // 2)              # force >= 2 grid steps
    bt = 8
    for cand in range(8, cap + 1, 8):            # largest mult-of-8 divisor <= cap
        if padded % cand == 0:
            bt = cand
    return bt, padded


@jax.jit
def linear_regression_forward(x, w, b):
    """x: (B, 40483) f32, w: (1, 40483) f32, b: (1,) f32 -> (B, 1) f32."""
    batch, k = x.shape
    assert k == IN_FEATURES and w.shape == (OUT_FEATURES, IN_FEATURES)
    assert b.shape == (OUT_FEATURES,)

    bt, padded = _plan_tiles(batch)
    if padded != batch:   # only large, non-multiple-of-8 batches pay for a pad
        x = jnp.pad(x, ((0, padded - batch), (0, 0)))
    grid = (padded // bt,)

    y = pl.pallas_call(
        _linreg_kernel,
        out_shape=jax.ShapeDtypeStruct((padded, OUT_FEATURES), x.dtype),
        grid_spec=pltpu.PrefetchScalarGridSpec(
            num_scalar_prefetch=0,
            grid=grid,
            in_specs=[
                # Full-K batch tile: x streamed from HBM once, unpadded in K.
                pl.BlockSpec((bt, IN_FEATURES), lambda i: (i, 0)),
                # Constant index_map -> w stays resident in VMEM across steps.
                pl.BlockSpec((OUT_FEATURES, IN_FEATURES), lambda i: (0, 0)),
                # Bias as an SMEM scalar, added inside the kernel.
                pl.BlockSpec(memory_space=pltpu.MemorySpace.SMEM),
            ],
            out_specs=pl.BlockSpec((bt, OUT_FEATURES), lambda i: (i, 0)),
        ),
        compiler_params=pltpu.CompilerParams(
            # Independent batch tiles; with >= 2 grid steps (batch >= 16) the
            # two v7x TensorCores each take a share of the HBM stream.
            dimension_semantics=("parallel",),
            # ~21 MiB double-buffered x + ~2.6 MiB w buffers at bt=64; 40 MiB
            # overrides v5e's 16 MiB default scoped limit and stays within
            # v7x's 64 MiB physical VMEM.
            vmem_limit_bytes=40 * 1024 * 1024,
        ),
        cost_estimate=pl.CostEstimate(
            flops=2 * padded * IN_FEATURES,
            transcendentals=0,
            bytes_accessed=(padded * IN_FEATURES + IN_FEATURES + padded) * 4,
        ),
    )(x, w, b)

    return y[:batch] if padded != batch else y


if __name__ == "__main__":
    key = jax.random.PRNGKey(0)
    kx, kw, kb = jax.random.split(key, 3)

    batch = 2
    # Deterministic init matching torch.nn.Linear's default
    # U(-1/sqrt(in_features), 1/sqrt(in_features)).
    bound = 1.0 / jnp.sqrt(jnp.float32(IN_FEATURES))
    w = jax.random.uniform(
        kw, (OUT_FEATURES, IN_FEATURES), jnp.float32, -bound, bound
    )
    b = jax.random.uniform(kb, (OUT_FEATURES,), jnp.float32, -bound, bound)
    x = jax.random.normal(kx, (batch, IN_FEATURES), jnp.float32)

    y = jax.block_until_ready(linear_regression_forward(x, w, b))

    # Pure-JAX reference check.
    y_ref = x @ w.T + b
    assert y.shape == (batch, OUT_FEATURES)
    assert jnp.allclose(y, y_ref, atol=1e-3, rtol=1e-3), (y, y_ref)

    print("KERNEL_OK")
</pallas_src>

<mosaic_0001>
module attributes {stable_mosaic.version = 11 : i64} {
  func.func @_linreg_kernel(%arg0: i32, %arg1: memref<2x40483xf32, #tpu.memory_space<vmem>>, %arg2: memref<1x40483xf32, #tpu.memory_space<vmem>>, %arg3: memref<1xf32, #tpu.memory_space<smem>>, %arg4: memref<2x1xf32, #tpu.memory_space<vmem>>) attributes {dimension_semantics = [#tpu.dimension_semantics<parallel>], iteration_bounds = array<i64: 1>, scalar_prefetch = 0 : i64, scratch_operands = 0 : i64, tpu.core_type = #tpu.core_type<tc>, window_params = [{transform_indices = @transform_0, window_bounds = array<i64: 2, 40483>}, {pipeline_mode = #tpu.pipeline_mode<synchronous>, transform_indices = @transform_1, window_bounds = array<i64: 1, 40483>}, {transform_indices = @transform_2, window_bounds = array<i64: 1>}, {transform_indices = @transform_3, window_bounds = array<i64: 2, 1>}]} {
    %c0 = arith.constant 0 : index
    %c0_0 = arith.constant 0 : index
    %0 = vector.load %arg1[%c0, %c0_0] : memref<2x40483xf32, #tpu.memory_space<vmem>>, vector<2x40448xf32>
    %c0_1 = arith.constant 0 : index
    %c0_2 = arith.constant 0 : index
    %1 = vector.load %arg2[%c0_1, %c0_2] : memref<1x40483xf32, #tpu.memory_space<vmem>>, vector<1x40448xf32>
    %cst = arith.constant dense<0.000000e+00> : vector<2x1xf32>
    %2 = tpu.matmul %0, %1, %cst {dimension_numbers = #tpu.dot_dimension_numbers<[1], [1], [0], [0], [0, 0, 1, 0], [], []>} : vector<2x40448xf32>, vector<1x40448xf32>, vector<2x1xf32> -> vector<2x1xf32>
    %c0_3 = arith.constant 0 : index
    %c40448 = arith.constant 40448 : index
    %3 = vector.load %arg1[%c0_3, %c40448] : memref<2x40483xf32, #tpu.memory_space<vmem>>, vector<2x35xf32>
    %c0_4 = arith.constant 0 : index
    %c40448_5 = arith.constant 40448 : index
    %4 = vector.load %arg2[%c0_4, %c40448_5] : memref<1x40483xf32, #tpu.memory_space<vmem>>, vector<1x35xf32>
    %5 = vector.broadcast %4 : vector<1x35xf32> to vector<2x35xf32>
    %6 = arith.mulf %3, %5 : vector<2x35xf32>
    %cst_6 = arith.constant dense<0.000000e+00> : vector<2xf32>
    %7 = vector.multi_reduction <add>, %6, %cst_6 [1] : vector<2x35xf32> to vector<2xf32>
    %8 = vector.shape_cast %7 : vector<2xf32> to vector<2x1xf32>
    %9 = arith.addf %2, %8 : vector<2x1xf32>
    %c0_7 = arith.constant 0 : index
    %10 = memref.load %arg3[%c0_7] : memref<1xf32, #tpu.memory_space<smem>>
    %11 = vector.broadcast %10 : f32 to vector<2x1xf32>
    %12 = arith.addf %9, %11 : vector<2x1xf32>
    %c0_8 = arith.constant 0 : index
    %c0_9 = arith.constant 0 : index
    %13 = vector.load %arg4[%c0_8, %c0_9] : memref<2x1xf32, #tpu.memory_space<vmem>>, vector<2x1xf32>
    tpu.vector_store %arg4[%c0_8, %c0_9], %12 {strides = array<i32>} : memref<2x1xf32, #tpu.memory_space<vmem>>, vector<2x1xf32>,
    return
  }
  func.func @transform_0(%arg0: i32) -> (i32, i32) {
    %c0_i32 = arith.constant 0 : i32
    %c0_i32_0 = arith.constant 0 : i32
    return %arg0, %c0_i32 : i32, i32
  }
  func.func @transform_1(%arg0: i32) -> (i32, i32) {
    %c0_i32 = arith.constant 0 : i32
    %c0_i32_0 = arith.constant 0 : i32
    %c0_i32_1 = arith.constant 0 : i32
    return %c0_i32, %c0_i32_0 : i32, i32
  }
  func.func @transform_2(%arg0: i32) -> i32 {
    %c0_i32 = arith.constant 0 : i32
    %c0_i32_0 = arith.constant 0 : i32
    return %c0_i32 : i32
  }
  func.func @transform_3(%arg0: i32) -> (i32, i32) {
    %c0_i32 = arith.constant 0 : i32
    %c0_i32_0 = arith.constant 0 : i32
    return %arg0, %c0_i32 : i32, i32
  }
}

</mosaic_0001>

<bundles_post_ra>
// kernel: linear_regression_forward.1
= control target key start
LH: loop header
LB: loop body
LE: loop exit
PB: predicated region body
PF: predicated region fallthrough
CT: control target
= control target key end

     0   :  { %9 = vsyncpa [#allocation4], 0  ;;  %s5950_s0 = inlined_call_operand.hbm [shape: f32[2,40483], index: 0, kind: input, shape index: {}]   ;;  %s5951_s1 = inlined_call_operand.hbm [shape: f32[1,40483], index: 1, kind: input, shape index: {}]   ;;  %s5952_s2 = inlined_call_operand.<no memory space> [shape: f32[1], index: 2, kind: input, shape index: {}]   ;;  %s5953_s3 = inlined_call_operand.vmem [shape: f32[2,1], index: 3, kind: output, shape index: {}]  }
   0x1   :  { %s16_s14 = sshll.u32 %s5950_s0, 4  ;;  %s17_s14 = int_to_ptr.hbm [resolvable:$true] %s16_s14 }
   0x2   :  { %10 = vsyncpa [#allocation6], 0  ;;  %s2654_s15 = smov [#allocation3]   ;;  %s27_s19 = sshll.u32 %s5951_s1, 4  ;;  %s28_s19 = int_to_ptr.hbm [resolvable:$true] %s27_s19 }
   0x3   :  { %s18_s16 = sshll.u32 %s2654_s15, 4  ;;  %s2655_s20 = smov [#allocation5]   ;;  %s19_s16 = int_to_ptr.vmem [resolvable:$true] %s18_s16 }
   0x4   :  { %21 = dma.hbm_to_vmem [thread:$0]  %s17_s14, 10144, %s19_s16, [#allocation4]  }
   0x5   :  { %s29_s21 = sshll.u32 %s2655_s20, 4  ;;  %s30_s21 = int_to_ptr.vmem [resolvable:$true] %s29_s21 }
   0x6   :  { %32 = dma.hbm_to_vmem [thread:$0]  %s28_s19, 5072, %s30_s21, [#allocation6]  }
   0x7   :  { %2650 = dma.done.wait [#allocation4], 10144  }
   0x8   :  { %2651 = vsyncadd [#allocation4], 4294957152 }
   0x9   :  { %2652 = dma.done.wait [#allocation6], 5072  }
   0xa   :  { %2653 = vsyncadd [#allocation6], 4294962224  ;;  %v162_v0 = vld [vmem:[#allocation3 + $0x278] sm:$0x3]  ;;  %v2601_v1 = vld [vmem:[#allocation5 + $0x13c] ss:$0 sm:$0xff] }
   0xb   :  { %vm168_vm0 = vcmask 279552   ;;  %v167_v2 = vmul.f32 %v2601_v1, %v162_v0  ;;  %v2682_v4 = vld [vmem:[#allocation5] sm:$0xff]  ;;  %v2684_v5 = vld [vmem:[#allocation5 + $0x8] sm:$0xff]  ;;  %v2691_v11 = vld [vmem:[#allocation5 + $0x30] sm:$0xff]  ;;  %vm765_vm1 = vcmask 1041408   ;;  %vm767_vm2 = vcmask 1045508  }
   0xc   :  { %5956 = vst [vmem:[#allocation9_spill] sm:$0xff] %v2684_v5  ;;  %v213_v7 = vperm.slane %v2682_v4, 1  ;;  %v214_v8 = vperm.slane %v2682_v4, 2  ;;  %v215_v9 = vperm.slane %v2682_v4, 3  ;;  %v217_v12 = vperm.slane %v2682_v4, 5  ;;  %v2701_v20 = vld [vmem:[#allocation5 + $0x38] sm:$0xff] }
   0xd   :  { %v169_v3 = vsel %vm168_vm0, %v167_v2, 0.0  ;;  %v218_v13 = vperm.slane %v2682_v4, 6  ;;  %v219_v14 = vperm.slane %v2682_v4, 7  ;;  %v221_v16 = vperm.slane %v2684_v5, 1  ;;  %v2711_v29 = vld [vmem:[#allocation5 + $0x40] sm:$0xff]  ;;  %v2721_v38 = vld [vmem:[#allocation5 + $0x48] sm:$0xff] }
   0xe   :  { %170 = vadd.xlane.f32.xlu0 %v169_v3  ;;  %v222_v17 = vperm.slane %v2684_v5, 2  ;;  %v223_v18 = vperm.slane %v2684_v5, 3  ;;  %v225_v21 = vperm.slane %v2684_v5, 5  ;;  %v226_v22 = vperm.slane %v2684_v5, 6  ;;  %v2731_v47 = vld [vmem:[#allocation5 + $0x50] sm:$0xff]  ;;  %v2741_v56 = vld [vmem:[#allocation5 + $0x58] sm:$0xff] }
   0xf   :  { %v227_v23 = vperm.slane %v2684_v5, 7  ;;  %v261_v25 = vperm.slane %v2691_v11, 1  ;;  %v262_v26 = vperm.slane %v2691_v11, 2  ;;  %v263_v27 = vperm.slane %v2691_v11, 3  ;;  %v2751_v1 = vld [vmem:[#allocation5 + $0x60] sm:$0xff]  ;;  %v2761_v42 = vld [vmem:[#allocation5 + $0x68] sm:$0xff] }
  0x10   :  { %v265_v30 = vperm.slane %v2691_v11, 5  ;;  %v266_v31 = vperm.slane %v2691_v11, 6  ;;  %v267_v32 = vperm.slane %v2691_v11, 7  ;;  %v2771_v51 = vld [vmem:[#allocation5 + $0x70] sm:$0xff]  ;;  %v2781_v55 = vld [vmem:[#allocation5 + $0x78] sm:$0xff]  ;;  %v2791_v60 = vld [vmem:[#allocation5 + $0x80] sm:$0xff] }
  0x11   :  { %v2801_v19 = vld [vmem:[#allocation5 + $0x88] sm:$0xff]  ;;  %v2811_v3 = vld [vmem:[#allocation5 + $0x90] sm:$0xff]  ;;  %v2821_v2 = vld [vmem:[#allocation5 + $0x98] sm:$0xff]  ;;  %v3040_v10 = vrot.slane %v213_v7, 6  ;;  %v3044_v46 = vrot.slane %v214_v8, 4  ;;  %v3048_v34 = vrot.slane %v215_v9, 2 }
  0x12   :  { %v2831_v63 = vld [vmem:[#allocation5 + $0xa0] sm:$0xff]  ;;  %v2841_v62 = vld [vmem:[#allocation5 + $0xa8] sm:$0xff]  ;;  %v2851_v61 = vld [vmem:[#allocation5 + $0xb0] sm:$0xff]  ;;  %v3052_v33 = vrot.slane %v217_v12, 6  ;;  %v3056_v15 = vrot.slane %v218_v13, 4  ;;  %v3060_v7 = vrot.slane %v219_v14, 2 }
  0x13   :  { %v2861_v59 = vld [vmem:[#allocation5 + $0xb8] sm:$0xff]  ;;  %v2871_v58 = vld [vmem:[#allocation5 + $0xc0] sm:$0xff]  ;;  %v2881_v57 = vld [vmem:[#allocation5 + $0xc8] sm:$0xff]  ;;  %v3064_v8 = vrot.slane %v221_v16, 6  ;;  %v3068_v9 = vrot.slane %v222_v17, 4  ;;  %v3072_v12 = vrot.slane %v223_v18, 2 }
  0x14   :  { %v2891_v54 = vld [vmem:[#allocation5 + $0xd0] sm:$0xff]  ;;  %v2901_v53 = vld [vmem:[#allocation5 + $0xd8] sm:$0xff]  ;;  %v2911_v52 = vld [vmem:[#allocation5 + $0xe0] sm:$0xff]  ;;  %v3076_v13 = vrot.slane %v225_v21, 6  ;;  %v3080_v14 = vrot.slane %v226_v22, 4  ;;  %v3084_v16 = vrot.slane %v227_v23, 2 }
  0x15   :  { %v2921_v50 = vld [vmem:[#allocation5 + $0xe8] sm:$0xff]  ;;  %v2931_v49 = vld [vmem:[#allocation5 + $0xf0] sm:$0xff]  ;;  %v2941_v48 = vld [vmem:[#allocation5 + $0xf8] sm:$0xff]  ;;  %5957 = vst [vmem:[#allocation10_spill] sm:$0xff] %v3064_v8  ;;  %v3088_v17 = vrot.slane %v261_v25, 6  ;;  %v3092_v18 = vrot.slane %v262_v26, 4 }
  0x16   :  { %v2951_v45 = vld [vmem:[#allocation5 + $0x100] sm:$0xff]  ;;  %v2961_v44 = vld [vmem:[#allocation5 + $0x108] sm:$0xff]  ;;  %v2971_v43 = vld [vmem:[#allocation5 + $0x110] sm:$0xff]  ;;  %5958 = vst [vmem:[#allocation11_spill] sm:$0xff] %v3068_v9  ;;  %v3096_v21 = vrot.slane %v263_v27, 2  ;;  %v3100_v22 = vrot.slane %v265_v30, 6 }
  0x17   :  { %v2981_v41 = vld [vmem:[#allocation5 + $0x118] sm:$0xff]  ;;  %v2991_v40 = vld [vmem:[#allocation5 + $0x120] sm:$0xff]  ;;  %v3001_v39 = vld [vmem:[#allocation5 + $0x128] sm:$0xff]  ;;  %5959 = vst [vmem:[#allocation12_spill] sm:$0xff] %v3072_v12  ;;  %v3104_v23 = vrot.slane %v266_v31, 4  ;;  %v3108_v25 = vrot.slane %v267_v32, 2 }
  0x18   :  { %v3011_v36 = vld [vmem:[#allocation5 + $0x130] sm:$0xff]  ;;  %v3021_v35 = vld [vmem:[#allocation5 + $0x138] sm:$0xf]  ;;  %5960 = vst [vmem:[#allocation13_spill] sm:$0xff] %v3076_v13  ;;  %v5963_v24 = vperm.slane %v2701_v20, 1  ;;  %v5964_v28 = vperm.slane %v2701_v20, 2 }
  0x19   :  { %5961 = vst [vmem:[#allocation14_spill] sm:$0xff] %v3080_v14  ;;  %v5965_v37 = vperm.slane %v2701_v20, 3  ;;  %v5966_v0 = vperm.slane %v2701_v20, 5  ;;  %v5967_v6 = vperm.slane %v2701_v20, 6  ;;  %v5968_v14 = vperm.slane %v2701_v20, 7 }
  0x1a   :  { %5962 = vst [vmem:[#allocation15_spill] sm:$0xff] %v3084_v16  ;;  %v3112_v26 = vrot.slane %v5963_v24, 6  ;;  %v3116_v27 = vrot.slane %v5964_v28, 4  ;;  %v5969_v16 = vperm.slane %v2711_v29, 1  ;;  %v5971_v13 = vperm.slane %v2711_v29, 2 }
  0x1b   :  { %v3120_v30 = vrot.slane %v5965_v37, 2  ;;  %v3124_v31 = vrot.slane %v5966_v0, 6  ;;  %v3128_v32 = vrot.slane %v5967_v6, 4  ;;  %v3132_v24 = vrot.slane %v5968_v14, 2 }
  0x1c   :  { %v3136_v28 = vrot.slane %v5969_v16, 6  ;;  %v3140_v37 = vrot.slane %v5971_v13, 4  ;;  %v5973_v9 = vperm.slane %v2711_v29, 3  ;;  %v5975_v12 = vperm.slane %v2711_v29, 5 }
  0x1d   :  { %v5977_v5 = vperm.slane %v2711_v29, 6  ;;  %v5979_v8 = vperm.slane %v2711_v29, 7  ;;  %vm769_vm3 = vcmask 1043456   ;;  %vm2591_vm4 = vcmask 1024  }
  0x1e   :  { %5970 = vst [vmem:[#allocation16_spill] sm:$0xff] %v3136_v28  ;;  %v3144_v0 = vrot.slane %v5973_v9, 2  ;;  %v3148_v6 = vrot.slane %v5975_v12, 6  ;;  %v5981_v28 = vperm.slane %v2721_v38, 1 }
  0x1f   :  { %5972 = vst [vmem:[#allocation17_spill] sm:$0xff] %v3140_v37  ;;  %v3152_v14 = vrot.slane %v5977_v5, 4  ;;  %v3156_v16 = vrot.slane %v5979_v8, 2  ;;  %v5983_v37 = vperm.slane %v2721_v38, 2 }
  0x20   :  { %5974 = vst [vmem:[#allocation18_spill] sm:$0xff] %v3144_v0  ;;  %v3160_v13 = vrot.slane %v5981_v28, 6  ;;  %v5985_v0 = vperm.slane %v2721_v38, 3 }
  0x21   :  { %5976 = vst [vmem:[#allocation19_spill] sm:$0xff] %v3148_v6  ;;  %v3164_v9 = vrot.slane %v5983_v37, 4  ;;  %v5987_v6 = vperm.slane %v2721_v38, 5 }
  0x22   :  { %5978 = vst [vmem:[#allocation20_spill] sm:$0xff] %v3152_v14  ;;  %v3168_v12 = vrot.slane %v5985_v0, 2  ;;  %v5989_v14 = vperm.slane %v2721_v38, 6 }
  0x23   :  { %5980 = vst [vmem:[#allocation21_spill] sm:$0xff] %v3156_v16  ;;  %v3172_v5 = vrot.slane %v5987_v6, 6  ;;  %v5991_v16 = vperm.slane %v2721_v38, 7 }
  0x24   :  { %5982 = vst [vmem:[#allocation22_spill] sm:$0xff] %v3160_v13  ;;  %v3176_v8 = vrot.slane %v5989_v14, 4  ;;  %v5993_v13 = vperm.slane %v2731_v47, 1 }
  0x25   :  { %5984 = vst [vmem:[#allocation23_spill] sm:$0xff] %v3164_v9  ;;  %v3180_v28 = vrot.slane %v5991_v16, 2  ;;  %v5995_v9 = vperm.slane %v2731_v47, 2 }
  0x26   :  { %5986 = vst [vmem:[#allocation24_spill] sm:$0xff] %v3168_v12  ;;  %v3184_v37 = vrot.slane %v5993_v13, 6  ;;  %v5997_v12 = vperm.slane %v2731_v47, 3 }
  0x27   :  { %5988 = vst [vmem:[#allocation25_spill] sm:$0xff] %v3172_v5  ;;  %v3188_v0 = vrot.slane %v5995_v9, 4  ;;  %v5999_v5 = vperm.slane %v2731_v47, 5 }
  0x28   :  { %5990 = vst [vmem:[#allocation26_spill] sm:$0xff] %v3176_v8  ;;  %v3192_v6 = vrot.slane %v5997_v12, 2  ;;  %v6001_v8 = vperm.slane %v2731_v47, 6 }
  0x29   :  { %5992 = vst [vmem:[#allocation27_spill] sm:$0xff] %v3180_v28  ;;  %v3196_v14 = vrot.slane %v5999_v5, 6  ;;  %v6003_v28 = vperm.slane %v2731_v47, 7 }
  0x2a   :  { %5994 = vst [vmem:[#allocation28_spill] sm:$0xff] %v3184_v37  ;;  %v3200_v16 = vrot.slane %v6001_v8, 4  ;;  %v6005_v37 = vperm.slane %v2741_v56, 1 }
  0x2b   :  { %5996 = vst [vmem:[#allocation29_spill] sm:$0xff] %v3188_v0  ;;  %v3204_v13 = vrot.slane %v6003_v28, 2  ;;  %v6007_v0 = vperm.slane %v2741_v56, 2 }
  0x2c   :  { %5998 = vst [vmem:[#allocation30_spill] sm:$0xff] %v3192_v6  ;;  %v3208_v9 = vrot.slane %v6005_v37, 6  ;;  %v6009_v6 = vperm.slane %v2741_v56, 3 }
  0x2d   :  { %6000 = vst [vmem:[#allocation31_spill] sm:$0xff] %v3196_v14  ;;  %v3212_v12 = vrot.slane %v6007_v0, 4  ;;  %v6011_v14 = vperm.slane %v2741_v56, 5 }
  0x2e   :  { %6002 = vst [vmem:[#allocation32_spill] sm:$0xff] %v3200_v16  ;;  %v3216_v5 = vrot.slane %v6009_v6, 2  ;;  %v6013_v16 = vperm.slane %v2741_v56, 6 }
  0x2f   :  { %6004 = vst [vmem:[#allocation33_spill] sm:$0xff] %v3204_v13  ;;  %v3220_v8 = vrot.slane %v6011_v14, 6  ;;  %v6015_v13 = vperm.slane %v2741_v56, 7 }
  0x30   :  { %6006 = vst [vmem:[#allocation34_spill] sm:$0xff] %v3208_v9  ;;  %v3224_v28 = vrot.slane %v6013_v16, 4  ;;  %v6017_v9 = vperm.slane %v2751_v1, 1 }
  0x31   :  { %6008 = vst [vmem:[#allocation35_spill] sm:$0xff] %v3212_v12  ;;  %v3228_v37 = vrot.slane %v6015_v13, 2  ;;  %v6019_v12 = vperm.slane %v2751_v1, 2 }
  0x32   :  { %6010 = vst [vmem:[#allocation36_spill] sm:$0xff] %v3216_v5  ;;  %v3232_v0 = vrot.slane %v6017_v9, 6  ;;  %v6021_v5 = vperm.slane %v2751_v1, 3 }
  0x33   :  { %6012 = vst [vmem:[#allocation37_spill] sm:$0xff] %v3220_v8  ;;  %v3236_v6 = vrot.slane %v6019_v12, 4  ;;  %v6023_v8 = vperm.slane %v2751_v1, 5 }
  0x34   :  { %6014 = vst [vmem:[#allocation38_spill] sm:$0xff] %v3224_v28  ;;  %v3240_v14 = vrot.slane %v6021_v5, 2  ;;  %v6025_v28 = vperm.slane %v2751_v1, 6 }
  0x35   :  { %6016 = vst [vmem:[#allocation39_spill] sm:$0xff] %v3228_v37  ;;  %v3244_v16 = vrot.slane %v6023_v8, 6  ;;  %v6027_v37 = vperm.slane %v2751_v1, 7 }
  0x36   :  { %6018 = vst [vmem:[#allocation40_spill] sm:$0xff] %v3232_v0  ;;  %v3248_v13 = vrot.slane %v6025_v28, 4  ;;  %v6029_v0 = vperm.slane %v2761_v42, 1 }
  0x37   :  { %6020 = vst [vmem:[#allocation41_spill] sm:$0xff] %v3236_v6  ;;  %v3252_v9 = vrot.slane %v6027_v37, 2  ;;  %v6031_v6 = vperm.slane %v2761_v42, 2 }
  0x38   :  { %6022 = vst [vmem:[#allocation42_spill] sm:$0xff] %v3240_v14  ;;  %v3256_v12 = vrot.slane %v6029_v0, 6  ;;  %v6033_v14 = vperm.slane %v2761_v42, 3 }
  0x39   :  { %6024 = vst [vmem:[#allocation43_spill] sm:$0xff] %v3244_v16  ;;  %v3260_v5 = vrot.slane %v6031_v6, 4  ;;  %v6035_v16 = vperm.slane %v2761_v42, 5 }
  0x3a   :  { %6026 = vst [vmem:[#allocation44_spill] sm:$0xff] %v3248_v13  ;;  %v3264_v8 = vrot.slane %v6033_v14, 2  ;;  %v6037_v13 = vperm.slane %v2761_v42, 6 }
  0x3b   :  { %6028 = vst [vmem:[#allocation45_spill] sm:$0xff] %v3252_v9  ;;  %v3268_v28 = vrot.slane %v6035_v16, 6  ;;  %v6039_v9 = vperm.slane %v2761_v42, 7 }
  0x3c   :  { %6030 = vst [vmem:[#allocation46_spill] sm:$0xff] %v3256_v12  ;;  %v3272_v37 = vrot.slane %v6037_v13, 4  ;;  %v6041_v12 = vperm.slane %v2771_v51, 1 }
  0x3d   :  { %6032 = vst [vmem:[#allocation47_spill] sm:$0xff] %v3260_v5  ;;  %v3276_v0 = vrot.slane %v6039_v9, 2  ;;  %v6043_v5 = vperm.slane %v2771_v51, 2 }
  0x3e   :  { %6034 = vst [vmem:[#allocation48_spill] sm:$0xff] %v3264_v8  ;;  %v3280_v6 = vrot.slane %v6041_v12, 6  ;;  %v6045_v8 = vperm.slane %v2771_v51, 3 }
  0x3f   :  { %6036 = vst [vmem:[#allocation49_spill] sm:$0xff] %v3268_v28  ;;  %v3284_v14 = vrot.slane %v6043_v5, 4  ;;  %v6047_v28 = vperm.slane %v2771_v51, 5 }
  0x40   :  { %6038 = vst [vmem:[#allocation50_spill] sm:$0xff] %v3272_v37  ;;  %v3288_v16 = vrot.slane %v6045_v8, 2  ;;  %v6049_v37 = vperm.slane %v2771_v51, 6 }
  0x41   :  { %6040 = vst [vmem:[#allocation51_spill] sm:$0xff] %v3276_v0  ;;  %v3292_v13 = vrot.slane %v6047_v28, 6  ;;  %v6051_v0 = vperm.slane %v2771_v51, 7 }
  0x42   :  { %6042 = vst [vmem:[#allocation52_spill] sm:$0xff] %v3280_v6  ;;  %v3296_v9 = vrot.slane %v6049_v37, 4  ;;  %v6053_v6 = vperm.slane %v2781_v55, 1 }
  0x43   :  { %6044 = vst [vmem:[#allocation53_spill] sm:$0xff] %v3284_v14  ;;  %v3300_v12 = vrot.slane %v6051_v0, 2  ;;  %v6055_v14 = vperm.slane %v2781_v55, 2 }
  0x44   :  { %6046 = vst [vmem:[#allocation54_spill] sm:$0xff] %v3288_v16  ;;  %v3304_v5 = vrot.slane %v6053_v6, 6  ;;  %v6057_v16 = vperm.slane %v2781_v55, 3 }
  0x45   :  { %6048 = vst [vmem:[#allocation55_spill] sm:$0xff] %v3292_v13  ;;  %v3308_v8 = vrot.slane %v6055_v14, 4  ;;  %v6059_v13 = vperm.slane %v2781_v55, 5 }
  0x46   :  { %6050 = vst [vmem:[#allocation56_spill] sm:$0xff] %v3296_v9  ;;  %v3312_v28 = vrot.slane %v6057_v16, 2  ;;  %v6061_v9 = vperm.slane %v2781_v55, 6 }
  0x47   :  { %6052 = vst [vmem:[#allocation57_spill] sm:$0xff] %v3300_v12  ;;  %v3316_v37 = vrot.slane %v6059_v13, 6  ;;  %v6063_v12 = vperm.slane %v2781_v55, 7 }
  0x48   :  { %6054 = vst [vmem:[#allocation58_spill] sm:$0xff] %v3304_v5  ;;  %v3320_v0 = vrot.slane %v6061_v9, 4  ;;  %v6065_v5 = vperm.slane %v2791_v60, 1 }
  0x49   :  { %6056 = vst [vmem:[#allocation59_spill] sm:$0xff] %v3308_v8  ;;  %v3324_v6 = vrot.slane %v6063_v12, 2  ;;  %v6067_v8 = vperm.slane %v2791_v60, 2 }
  0x4a   :  { %6058 = vst [vmem:[#allocation60_spill] sm:$0xff] %v3312_v28  ;;  %v3328_v14 = vrot.slane %v6065_v5, 6  ;;  %v6069_v28 = vperm.slane %v2791_v60, 3 }
  0x4b   :  { %6060 = vst [vmem:[#allocation61_spill] sm:$0xff] %v3316_v37  ;;  %v3332_v16 = vrot.slane %v6067_v8, 4  ;;  %v6071_v37 = vperm.slane %v2791_v60, 5 }
  0x4c   :  { %6062 = vst [vmem:[#allocation62_spill] sm:$0xff] %v3320_v0  ;;  %v3336_v13 = vrot.slane %v6069_v28, 2  ;;  %v6073_v0 = vperm.slane %v2791_v60, 6 }
  0x4d   :  { %6064 = vst [vmem:[#allocation63_spill] sm:$0xff] %v3324_v6  ;;  %v3340_v9 = vrot.slane %v6071_v37, 6  ;;  %v6075_v6 = vperm.slane %v2791_v60, 7 }
  0x4e   :  { %6066 = vst [vmem:[#allocation64_spill] sm:$0xff] %v3328_v14  ;;  %v3344_v12 = vrot.slane %v6073_v0, 4  ;;  %v6077_v14 = vperm.slane %v2801_v19, 1 }
  0x4f   :  { %6068 = vst [vmem:[#allocation65_spill] sm:$0xff] %v3332_v16  ;;  %v3348_v5 = vrot.slane %v6075_v6, 2  ;;  %v6079_v16 = vperm.slane %v2801_v19, 2 }
  0x50   :  { %6070 = vst [vmem:[#allocation66_spill] sm:$0xff] %v3336_v13  ;;  %v3352_v8 = vrot.slane %v6077_v14, 6  ;;  %v6081_v13 = vperm.slane %v2801_v19, 3 }
  0x51   :  { %6072 = vst [vmem:[#allocation67_spill] sm:$0xff] %v3340_v9  ;;  %v3356_v28 = vrot.slane %v6079_v16, 4  ;;  %v6083_v9 = vperm.slane %v2801_v19, 5 }
  0x52   :  { %6074 = vst [vmem:[#allocation68_spill] sm:$0xff] %v3344_v12  ;;  %v3360_v37 = vrot.slane %v6081_v13, 2  ;;  %v6085_v12 = vperm.slane %v2801_v19, 6 }
  0x53   :  { %6076 = vst [vmem:[#allocation69_spill] sm:$0xff] %v3348_v5  ;;  %v3364_v0 = vrot.slane %v6083_v9, 6  ;;  %v6087_v5 = vperm.slane %v2801_v19, 7 }
  0x54   :  { %6078 = vst [vmem:[#allocation70_spill] sm:$0xff] %v3352_v8  ;;  %v3368_v6 = vrot.slane %v6085_v12, 4  ;;  %v6089_v8 = vperm.slane %v2811_v3, 1 }
  0x55   :  { %6080 = vst [vmem:[#allocation71_spill] sm:$0xff] %v3356_v28  ;;  %v3372_v14 = vrot.slane %v6087_v5, 2  ;;  %v6091_v28 = vperm.slane %v2811_v3, 2 }
  0x56   :  { %6082 = vst [vmem:[#allocation72_spill] sm:$0xff] %v3360_v37  ;;  %v3376_v16 = vrot.slane %v6089_v8, 6  ;;  %v6093_v37 = vperm.slane %v2811_v3, 3 }
  0x57   :  { %6084 = vst [vmem:[#allocation73_spill] sm:$0xff] %v3364_v0  ;;  %v3380_v13 = vrot.slane %v6091_v28, 4  ;;  %v6095_v0 = vperm.slane %v2811_v3, 5 }
  0x58   :  { %6086 = vst [vmem:[#allocation74_spill] sm:$0xff] %v3368_v6  ;;  %v3384_v9 = vrot.slane %v6093_v37, 2  ;;  %v6097_v6 = vperm.slane %v2811_v3, 6 }
  0x59   :  { %6088 = vst [vmem:[#allocation75_spill] sm:$0xff] %v3372_v14  ;;  %v3388_v12 = vrot.slane %v6095_v0, 6  ;;  %v6099_v14 = vperm.slane %v2811_v3, 7 }
  0x5a   :  { %6090 = vst [vmem:[#allocation76_spill] sm:$0xff] %v3376_v16  ;;  %v3392_v5 = vrot.slane %v6097_v6, 4  ;;  %v6101_v16 = vperm.slane %v2821_v2, 1 }
  0x5b   :  { %6092 = vst [vmem:[#allocation77_spill] sm:$0xff] %v3380_v13  ;;  %v3396_v8 = vrot.slane %v6099_v14, 2  ;;  %v6103_v13 = vperm.slane %v2821_v2, 2 }
  0x5c   :  { %6094 = vst [vmem:[#allocation78_spill] sm:$0xff] %v3384_v9  ;;  %v3400_v28 = vrot.slane %v6101_v16, 6  ;;  %v6105_v9 = vperm.slane %v2821_v2, 3 }
  0x5d   :  { %6096 = vst [vmem:[#allocation79_spill] sm:$0xff] %v3388_v12  ;;  %v3404_v37 = vrot.slane %v6103_v13, 4  ;;  %v6107_v12 = vperm.slane %v2821_v2, 5 }
  0x5e   :  { %6098 = vst [vmem:[#allocation80_spill] sm:$0xff] %v3392_v5  ;;  %v3408_v0 = vrot.slane %v6105_v9, 2  ;;  %v6109_v5 = vperm.slane %v2821_v2, 6 }
  0x5f   :  { %6100 = vst [vmem:[#allocation81_spill] sm:$0xff] %v3396_v8  ;;  %v3412_v6 = vrot.slane %v6107_v12, 6  ;;  %v6111_v8 = vperm.slane %v2821_v2, 7 }
  0x60   :  { %6102 = vst [vmem:[#allocation82_spill] sm:$0xff] %v3400_v28  ;;  %v3416_v14 = vrot.slane %v6109_v5, 4  ;;  %v6113_v28 = vperm.slane %v2831_v63, 1 }
  0x61   :  { %6104 = vst [vmem:[#allocation83_spill] sm:$0xff] %v3404_v37  ;;  %v3420_v16 = vrot.slane %v6111_v8, 2  ;;  %v6115_v37 = vperm.slane %v2831_v63, 2 }
  0x62   :  { %6106 = vst [vmem:[#allocation84_spill] sm:$0xff] %v3408_v0  ;;  %v3424_v13 = vrot.slane %v6113_v28, 6  ;;  %v6117_v0 = vperm.slane %v2831_v63, 3 }
  0x63   :  { %6108 = vst [vmem:[#allocation85_spill] sm:$0xff] %v3412_v6  ;;  %v3428_v9 = vrot.slane %v6115_v37, 4  ;;  %v6119_v6 = vperm.slane %v2831_v63, 5 }
  0x64   :  { %6110 = vst [vmem:[#allocation86_spill] sm:$0xff] %v3416_v14  ;;  %v3432_v12 = vrot.slane %v6117_v0, 2  ;;  %v6121_v14 = vperm.slane %v2831_v63, 6 }
  0x65   :  { %6112 = vst [vmem:[#allocation87_spill] sm:$0xff] %v3420_v16  ;;  %v3436_v5 = vrot.slane %v6119_v6, 6  ;;  %v6123_v16 = vperm.slane %v2831_v63, 7 }
  0x66   :  { %6114 = vst [vmem:[#allocation88_spill] sm:$0xff] %v3424_v13  ;;  %v3440_v8 = vrot.slane %v6121_v14, 4  ;;  %v6125_v13 = vperm.slane %v2841_v62, 1 }
  0x67   :  { %6116 = vst [vmem:[#allocation89_spill] sm:$0xff] %v3428_v9  ;;  %v3444_v28 = vrot.slane %v6123_v16, 2  ;;  %v6127_v9 = vperm.slane %v2841_v62, 2 }
  0x68   :  { %6118 = vst [vmem:[#allocation90_spill] sm:$0xff] %v3432_v12  ;;  %v3448_v37 = vrot.slane %v6125_v13, 6  ;;  %v6129_v12 = vperm.slane %v2841_v62, 3 }
  0x69   :  { %6120 = vst [vmem:[#allocation91_spill] sm:$0xff] %v3436_v5  ;;  %v3452_v0 = vrot.slane %v6127_v9, 4  ;;  %v6131_v5 = vperm.slane %v2841_v62, 5 }
  0x6a   :  { %6122 = vst [vmem:[#allocation92_spill] sm:$0xff] %v3440_v8  ;;  %v3456_v6 = vrot.slane %v6129_v12, 2  ;;  %v6133_v8 = vperm.slane %v2841_v62, 6 }
  0x6b   :  { %6124 = vst [vmem:[#allocation93_spill] sm:$0xff] %v3444_v28  ;;  %v3460_v14 = vrot.slane %v6131_v5, 6  ;;  %v6135_v28 = vperm.slane %v2841_v62, 7 }
  0x6c   :  { %6126 = vst [vmem:[#allocation94_spill] sm:$0xff] %v3448_v37  ;;  %v3464_v16 = vrot.slane %v6133_v8, 4  ;;  %v6137_v37 = vperm.slane %v2851_v61, 1 }
  0x6d   :  { %6128 = vst [vmem:[#allocation95_spill] sm:$0xff] %v3452_v0  ;;  %v3468_v13 = vrot.slane %v6135_v28, 2  ;;  %v6139_v0 = vperm.slane %v2851_v61, 2 }
  0x6e   :  { %6130 = vst [vmem:[#allocation96_spill] sm:$0xff] %v3456_v6  ;;  %v3472_v9 = vrot.slane %v6137_v37, 6  ;;  %v6141_v6 = vperm.slane %v2851_v61, 3 }
  0x6f   :  { %6132 = vst [vmem:[#allocation97_spill] sm:$0xff] %v3460_v14  ;;  %v3476_v12 = vrot.slane %v6139_v0, 4  ;;  %v6143_v14 = vperm.slane %v2851_v61, 5 }
  0x70   :  { %6134 = vst [vmem:[#allocation98_spill] sm:$0xff] %v3464_v16  ;;  %v3480_v5 = vrot.slane %v6141_v6, 2  ;;  %v6145_v16 = vperm.slane %v2851_v61, 6 }
  0x71   :  { %6136 = vst [vmem:[#allocation99_spill] sm:$0xff] %v3468_v13  ;;  %v3484_v8 = vrot.slane %v6143_v14, 6  ;;  %v6147_v13 = vperm.slane %v2851_v61, 7 }
  0x72   :  { %6138 = vst [vmem:[#allocation100_spill] sm:$0xff] %v3472_v9  ;;  %v3488_v28 = vrot.slane %v6145_v16, 4  ;;  %v6149_v9 = vperm.slane %v2861_v59, 1 }
  0x73   :  { %6140 = vst [vmem:[#allocation101_spill] sm:$0xff] %v3476_v12  ;;  %v3492_v37 = vrot.slane %v6147_v13, 2  ;;  %v6151_v12 = vperm.slane %v2861_v59, 2 }
  0x74   :  { %6142 = vst [vmem:[#allocation102_spill] sm:$0xff] %v3480_v5  ;;  %v3496_v0 = vrot.slane %v6149_v9, 6  ;;  %v6153_v5 = vperm.slane %v2861_v59, 3 }
  0x75   :  { %6144 = vst [vmem:[#allocation103_spill] sm:$0xff] %v3484_v8  ;;  %v3500_v6 = vrot.slane %v6151_v12, 4  ;;  %v6155_v8 = vperm.slane %v2861_v59, 5 }
  0x76   :  { %6146 = vst [vmem:[#allocation104_spill] sm:$0xff] %v3488_v28  ;;  %v3504_v14 = vrot.slane %v6153_v5, 2  ;;  %v6157_v28 = vperm.slane %v2861_v59, 6 }
  0x77   :  { %6148 = vst [vmem:[#allocation105_spill] sm:$0xff] %v3492_v37  ;;  %v3508_v16 = vrot.slane %v6155_v8, 6  ;;  %v6159_v37 = vperm.slane %v2861_v59, 7 }
  0x78   :  { %6150 = vst [vmem:[#allocation106_spill] sm:$0xff] %v3496_v0  ;;  %v3512_v13 = vrot.slane %v6157_v28, 4  ;;  %v6161_v0 = vperm.slane %v2871_v58, 1 }
  0x79   :  { %6152 = vst [vmem:[#allocation107_spill] sm:$0xff] %v3500_v6  ;;  %v3516_v9 = vrot.slane %v6159_v37, 2  ;;  %v6163_v6 = vperm.slane %v2871_v58, 2 }
  0x7a   :  { %6154 = vst [vmem:[#allocation108_spill] sm:$0xff] %v3504_v14  ;;  %v3520_v12 = vrot.slane %v6161_v0, 6  ;;  %v6165_v14 = vperm.slane %v2871_v58, 3 }
  0x7b   :  { %6156 = vst [vmem:[#allocation109_spill] sm:$0xff] %v3508_v16  ;;  %v3524_v5 = vrot.slane %v6163_v6, 4  ;;  %v6167_v16 = vperm.slane %v2871_v58, 5 }
  0x7c   :  { %6158 = vst [vmem:[#allocation110_spill] sm:$0xff] %v3512_v13  ;;  %v3528_v8 = vrot.slane %v6165_v14, 2  ;;  %v6169_v13 = vperm.slane %v2871_v58, 6 }
  0x7d   :  { %6160 = vst [vmem:[#allocation111_spill] sm:$0xff] %v3516_v9  ;;  %v3532_v28 = vrot.slane %v6167_v16, 6  ;;  %v6171_v9 = vperm.slane %v2871_v58, 7 }
  0x7e   :  { %6162 = vst [vmem:[#allocation112_spill] sm:$0xff] %v3520_v12  ;;  %v3536_v37 = vrot.slane %v6169_v13, 4  ;;  %v6173_v12 = vperm.slane %v2881_v57, 1 }
  0x7f   :  { %6164 = vst [vmem:[#allocation113_spill] sm:$0xff] %v3524_v5  ;;  %v3540_v0 = vrot.slane %v6171_v9, 2  ;;  %v6175_v5 = vperm.slane %v2881_v57, 2 }
  0x80   :  { %6166 = vst [vmem:[#allocation114_spill] sm:$0xff] %v3528_v8  ;;  %v3544_v6 = vrot.slane %v6173_v12, 6  ;;  %v6177_v8 = vperm.slane %v2881_v57, 3 }
  0x81   :  { %6168 = vst [vmem:[#allocation115_spill] sm:$0xff] %v3532_v28  ;;  %v3548_v14 = vrot.slane %v6175_v5, 4  ;;  %v6179_v28 = vperm.slane %v2881_v57, 5 }
  0x82   :  { %6170 = vst [vmem:[#allocation116_spill] sm:$0xff] %v3536_v37  ;;  %v3552_v16 = vrot.slane %v6177_v8, 2  ;;  %v6181_v37 = vperm.slane %v2881_v57, 6 }
  0x83   :  { %6172 = vst [vmem:[#allocation117_spill] sm:$0xff] %v3540_v0  ;;  %v3556_v13 = vrot.slane %v6179_v28, 6  ;;  %v6183_v0 = vperm.slane %v2881_v57, 7 }
  0x84   :  { %6174 = vst [vmem:[#allocation118_spill] sm:$0xff] %v3544_v6  ;;  %v3560_v9 = vrot.slane %v6181_v37, 4  ;;  %v6185_v6 = vperm.slane %v2891_v54, 1 }
  0x85   :  { %6176 = vst [vmem:[#allocation119_spill] sm:$0xff] %v3548_v14  ;;  %v3564_v12 = vrot.slane %v6183_v0, 2  ;;  %v6187_v14 = vperm.slane %v2891_v54, 2 }
  0x86   :  { %6178 = vst [vmem:[#allocation120_spill] sm:$0xff] %v3552_v16  ;;  %v3568_v5 = vrot.slane %v6185_v6, 6  ;;  %v6189_v16 = vperm.slane %v2891_v54, 3 }
  0x87   :  { %6180 = vst [vmem:[#allocation121_spill] sm:$0xff] %v3556_v13  ;;  %v3572_v8 = vrot.slane %v6187_v14, 4  ;;  %v6191_v13 = vperm.slane %v2891_v54, 5 }
  0x88   :  { %6182 = vst [vmem:[#allocation122_spill] sm:$0xff] %v3560_v9  ;;  %v3576_v28 = vrot.slane %v6189_v16, 2  ;;  %v6193_v9 = vperm.slane %v2891_v54, 6 }
  0x89   :  { %6184 = vst [vmem:[#allocation123_spill] sm:$0xff] %v3564_v12  ;;  %v3580_v37 = vrot.slane %v6191_v13, 6  ;;  %v6195_v12 = vperm.slane %v2891_v54, 7 }
  0x8a   :  { %6186 = vst [vmem:[#allocation124_spill] sm:$0xff] %v3568_v5  ;;  %v3584_v0 = vrot.slane %v6193_v9, 4  ;;  %v6197_v5 = vperm.slane %v2901_v53, 1 }
  0x8b   :  { %6188 = vst [vmem:[#allocation125_spill] sm:$0xff] %v3572_v8  ;;  %v3588_v6 = vrot.slane %v6195_v12, 2  ;;  %v6199_v8 = vperm.slane %v2901_v53, 2 }
  0x8c   :  { %6190 = vst [vmem:[#allocation126_spill] sm:$0xff] %v3576_v28  ;;  %v3592_v14 = vrot.slane %v6197_v5, 6  ;;  %v6201_v28 = vperm.slane %v2901_v53, 3 }
  0x8d   :  { %6192 = vst [vmem:[#allocation127_spill] sm:$0xff] %v3580_v37  ;;  %v3596_v16 = vrot.slane %v6199_v8, 4  ;;  %v6203_v37 = vperm.slane %v2901_v53, 5 }
  0x8e   :  { %6194 = vst [vmem:[#allocation128_spill] sm:$0xff] %v3584_v0  ;;  %v3600_v13 = vrot.slane %v6201_v28, 2  ;;  %v6205_v0 = vperm.slane %v2901_v53, 6 }
  0x8f   :  { %6196 = vst [vmem:[#allocation129_spill] sm:$0xff] %v3588_v6  ;;  %v3604_v9 = vrot.slane %v6203_v37, 6  ;;  %v6207_v6 = vperm.slane %v2901_v53, 7 }
  0x90   :  { %6198 = vst [vmem:[#allocation130_spill] sm:$0xff] %v3592_v14  ;;  %v3608_v12 = vrot.slane %v6205_v0, 4  ;;  %v6209_v14 = vperm.slane %v2911_v52, 1 }
  0x91   :  { %6200 = vst [vmem:[#allocation131_spill] sm:$0xff] %v3596_v16  ;;  %v3612_v5 = vrot.slane %v6207_v6, 2  ;;  %v6211_v16 = vperm.slane %v2911_v52, 2 }
  0x92   :  { %6202 = vst [vmem:[#allocation132_spill] sm:$0xff] %v3600_v13  ;;  %v3616_v8 = vrot.slane %v6209_v14, 6  ;;  %v6213_v13 = vperm.slane %v2911_v52, 3 }
  0x93   :  { %6204 = vst [vmem:[#allocation133_spill] sm:$0xff] %v3604_v9  ;;  %v3620_v28 = vrot.slane %v6211_v16, 4  ;;  %v6215_v9 = vperm.slane %v2911_v52, 5 }
  0x94   :  { %6206 = vst [vmem:[#allocation134_spill] sm:$0xff] %v3608_v12  ;;  %v3624_v37 = vrot.slane %v6213_v13, 2  ;;  %v6217_v12 = vperm.slane %v2911_v52, 6 }
  0x95   :  { %6208 = vst [vmem:[#allocation135_spill] sm:$0xff] %v3612_v5  ;;  %v3628_v0 = vrot.slane %v6215_v9, 6  ;;  %v6219_v5 = vperm.slane %v2911_v52, 7 }
  0x96   :  { %6210 = vst [vmem:[#allocation136_spill] sm:$0xff] %v3616_v8  ;;  %v3632_v6 = vrot.slane %v6217_v12, 4  ;;  %v6221_v8 = vperm.slane %v2921_v50, 1 }
  0x97   :  { %6212 = vst [vmem:[#allocation137_spill] sm:$0xff] %v3620_v28  ;;  %v3636_v14 = vrot.slane %v6219_v5, 2  ;;  %v6223_v28 = vperm.slane %v2921_v50, 2 }
  0x98   :  { %6214 = vst [vmem:[#allocation138_spill] sm:$0xff] %v3624_v37  ;;  %v3640_v16 = vrot.slane %v6221_v8, 6  ;;  %v6225_v37 = vperm.slane %v2921_v50, 3 }
  0x99   :  { %6216 = vst [vmem:[#allocation139_spill] sm:$0xff] %v3628_v0  ;;  %v3644_v13 = vrot.slane %v6223_v28, 4  ;;  %v6227_v0 = vperm.slane %v2921_v50, 5 }
  0x9a   :  { %6218 = vst [vmem:[#allocation140_spill] sm:$0xff] %v3632_v6  ;;  %v3648_v9 = vrot.slane %v6225_v37, 2  ;;  %v6229_v6 = vperm.slane %v2921_v50, 6 }
  0x9b   :  { %6220 = vst [vmem:[#allocation141_spill] sm:$0xff] %v3636_v14  ;;  %v3652_v12 = vrot.slane %v6227_v0, 6  ;;  %v6231_v14 = vperm.slane %v2921_v50, 7 }
  0x9c   :  { %6222 = vst [vmem:[#allocation142_spill] sm:$0xff] %v3640_v16  ;;  %v3656_v5 = vrot.slane %v6229_v6, 4  ;;  %v6233_v16 = vperm.slane %v2931_v49, 1 }
  0x9d   :  { %6224 = vst [vmem:[#allocation143_spill] sm:$0xff] %v3644_v13  ;;  %v3660_v8 = vrot.slane %v6231_v14, 2  ;;  %v6235_v13 = vperm.slane %v2931_v49, 2 }
  0x9e   :  { %6226 = vst [vmem:[#allocation144_spill] sm:$0xff] %v3648_v9  ;;  %v3664_v28 = vrot.slane %v6233_v16, 6  ;;  %v6237_v9 = vperm.slane %v2931_v49, 3 }
  0x9f   :  { %6228 = vst [vmem:[#allocation145_spill] sm:$0xff] %v3652_v12  ;;  %v3668_v37 = vrot.slane %v6235_v13, 4  ;;  %v6239_v12 = vperm.slane %v2931_v49, 5 }
  0xa0   :  { %6230 = vst [vmem:[#allocation146_spill] sm:$0xff] %v3656_v5  ;;  %v3672_v0 = vrot.slane %v6237_v9, 2  ;;  %v6241_v5 = vperm.slane %v2931_v49, 6 }
  0xa1   :  { %6232 = vst [vmem:[#allocation147_spill] sm:$0xff] %v3660_v8  ;;  %v3676_v6 = vrot.slane %v6239_v12, 6  ;;  %v6243_v8 = vperm.slane %v2931_v49, 7 }
  0xa2   :  { %6234 = vst [vmem:[#allocation148_spill] sm:$0xff] %v3664_v28  ;;  %v3680_v14 = vrot.slane %v6241_v5, 4  ;;  %v6245_v28 = vperm.slane %v2941_v48, 1 }
  0xa3   :  { %6236 = vst [vmem:[#allocation149_spill] sm:$0xff] %v3668_v37  ;;  %v3684_v16 = vrot.slane %v6243_v8, 2  ;;  %v6247_v37 = vperm.slane %v2941_v48, 2 }
  0xa4   :  { %6238 = vst [vmem:[#allocation150_spill] sm:$0xff] %v3672_v0  ;;  %v3688_v13 = vrot.slane %v6245_v28, 6  ;;  %v6249_v0 = vperm.slane %v2941_v48, 3 }
  0xa5   :  { %6240 = vst [vmem:[#allocation151_spill] sm:$0xff] %v3676_v6  ;;  %v3692_v9 = vrot.slane %v6247_v37, 4  ;;  %v6251_v6 = vperm.slane %v2941_v48, 5 }
  0xa6   :  { %6242 = vst [vmem:[#allocation152_spill] sm:$0xff] %v3680_v14  ;;  %v3696_v12 = vrot.slane %v6249_v0, 2  ;;  %v6253_v14 = vperm.slane %v2941_v48, 6 }
  0xa7   :  { %6244 = vst [vmem:[#allocation153_spill] sm:$0xff] %v3684_v16  ;;  %v3700_v5 = vrot.slane %v6251_v6, 6  ;;  %v6255_v16 = vperm.slane %v2941_v48, 7 }
  0xa8   :  { %6246 = vst [vmem:[#allocation154_spill] sm:$0xff] %v3688_v13  ;;  %v3704_v8 = vrot.slane %v6253_v14, 4  ;;  %v6257_v13 = vperm.slane %v2951_v45, 1 }
  0xa9   :  { %6248 = vst [vmem:[#allocation155_spill] sm:$0xff] %v3692_v9  ;;  %v3708_v28 = vrot.slane %v6255_v16, 2  ;;  %v6259_v9 = vperm.slane %v2951_v45, 2 }
  0xaa   :  { %6250 = vst [vmem:[#allocation156_spill] sm:$0xff] %v3696_v12  ;;  %v3712_v37 = vrot.slane %v6257_v13, 6  ;;  %v6261_v12 = vperm.slane %v2951_v45, 3 }
  0xab   :  { %6252 = vst [vmem:[#allocation157_spill] sm:$0xff] %v3700_v5  ;;  %v3716_v0 = vrot.slane %v6259_v9, 4  ;;  %v6263_v5 = vperm.slane %v2951_v45, 5 }
  0xac   :  { %6254 = vst [vmem:[#allocation158_spill] sm:$0xff] %v3704_v8  ;;  %v3720_v6 = vrot.slane %v6261_v12, 2  ;;  %v6265_v8 = vperm.slane %v2951_v45, 6 }
  0xad   :  { %6256 = vst [vmem:[#allocation159_spill] sm:$0xff] %v3708_v28  ;;  %v3724_v14 = vrot.slane %v6263_v5, 6  ;;  %v6267_v28 = vperm.slane %v2951_v45, 7 }
  0xae   :  { %6258 = vst [vmem:[#allocation160_spill] sm:$0xff] %v3712_v37  ;;  %v3728_v16 = vrot.slane %v6265_v8, 4  ;;  %v6269_v37 = vperm.slane %v2961_v44, 1 }
  0xaf   :  { %6260 = vst [vmem:[#allocation161_spill] sm:$0xff] %v3716_v0  ;;  %v3732_v13 = vrot.slane %v6267_v28, 2  ;;  %v6271_v0 = vperm.slane %v2961_v44, 2 }
  0xb0   :  { %6262 = vst [vmem:[#allocation162_spill] sm:$0xff] %v3720_v6  ;;  %v3736_v9 = vrot.slane %v6269_v37, 6  ;;  %v6273_v6 = vperm.slane %v2961_v44, 3 }
  0xb1   :  { %6264 = vst [vmem:[#allocation163_spill] sm:$0xff] %v3724_v14  ;;  %v3740_v12 = vrot.slane %v6271_v0, 4  ;;  %v6275_v14 = vperm.slane %v2961_v44, 5 }
  0xb2   :  { %6266 = vst [vmem:[#allocation164_spill] sm:$0xff] %v3728_v16  ;;  %v3744_v5 = vrot.slane %v6273_v6, 2  ;;  %v6277_v16 = vperm.slane %v2961_v44, 6 }
  0xb3   :  { %6268 = vst [vmem:[#allocation165_spill] sm:$0xff] %v3732_v13  ;;  %v3748_v8 = vrot.slane %v6275_v14, 6  ;;  %v6279_v13 = vperm.slane %v2961_v44, 7 }
  0xb4   :  { %6270 = vst [vmem:[#allocation166_spill] sm:$0xff] %v3736_v9  ;;  %v3752_v28 = vrot.slane %v6277_v16, 4  ;;  %v6281_v9 = vperm.slane %v2971_v43, 1 }
  0xb5   :  { %6272 = vst [vmem:[#allocation167_spill] sm:$0xff] %v3740_v12  ;;  %v3756_v37 = vrot.slane %v6279_v13, 2  ;;  %v6283_v12 = vperm.slane %v2971_v43, 2 }
  0xb6   :  { %6274 = vst [vmem:[#allocation168_spill] sm:$0xff] %v3744_v5  ;;  %v3760_v0 = vrot.slane %v6281_v9, 6  ;;  %v6285_v5 = vperm.slane %v2971_v43, 3 }
  0xb7   :  { %6276 = vst [vmem:[#allocation169_spill] sm:$0xff] %v3748_v8  ;;  %v3764_v6 = vrot.slane %v6283_v12, 4  ;;  %v6287_v8 = vperm.slane %v2971_v43, 5 }
  0xb8   :  { %6278 = vst [vmem:[#allocation170_spill] sm:$0xff] %v3752_v28  ;;  %v3768_v14 = vrot.slane %v6285_v5, 2  ;;  %v6289_v28 = vperm.slane %v2971_v43, 6 }
  0xb9   :  { %6280 = vst [vmem:[#allocation171_spill] sm:$0xff] %v3756_v37  ;;  %v3772_v16 = vrot.slane %v6287_v8, 6  ;;  %v6291_v37 = vperm.slane %v2971_v43, 7 }
  0xba   :  { %6282 = vst [vmem:[#allocation172_spill] sm:$0xff] %v3760_v0  ;;  %v3776_v13 = vrot.slane %v6289_v28, 4  ;;  %v6293_v0 = vperm.slane %v2981_v41, 1 }
  0xbb   :  { %6284 = vst [vmem:[#allocation173_spill] sm:$0xff] %v3764_v6  ;;  %v3780_v9 = vrot.slane %v6291_v37, 2  ;;  %v6295_v6 = vperm.slane %v2981_v41, 2 }
  0xbc   :  { %6286 = vst [vmem:[#allocation174_spill] sm:$0xff] %v3768_v14  ;;  %v3784_v12 = vrot.slane %v6293_v0, 6  ;;  %v6297_v14 = vperm.slane %v2981_v41, 3 }
  0xbd   :  { %6288 = vst [vmem:[#allocation175_spill] sm:$0xff] %v3772_v16  ;;  %v3788_v5 = vrot.slane %v6295_v6, 4  ;;  %v6299_v16 = vperm.slane %v2981_v41, 5 }
  0xbe   :  { %6290 = vst [vmem:[#allocation176_spill] sm:$0xff] %v3776_v13  ;;  %v3792_v8 = vrot.slane %v6297_v14, 2  ;;  %v6301_v13 = vperm.slane %v2981_v41, 6 }
  0xbf   :  { %6292 = vst [vmem:[#allocation177_spill] sm:$0xff] %v3780_v9  ;;  %v3796_v28 = vrot.slane %v6299_v16, 6  ;;  %v6303_v9 = vperm.slane %v2981_v41, 7 }
  0xc0   :  { %6294 = vst [vmem:[#allocation178_spill] sm:$0xff] %v3784_v12  ;;  %v3800_v37 = vrot.slane %v6301_v13, 4  ;;  %v6305_v12 = vperm.slane %v2991_v40, 1  ;;  %v6311_v13 = vperm.slane %v2991_v40, 5 }
  0xc1   :  { %6296 = vst [vmem:[#allocation179_spill] sm:$0xff] %v3788_v5  ;;  %v3804_v0 = vrot.slane %v6303_v9, 2  ;;  %v6307_v5 = vperm.slane %v2991_v40, 2  ;;  %v6313_v9 = vperm.slane %v2991_v40, 6 }
  0xc2   :  { %6298 = vst [vmem:[#allocation180_spill] sm:$0xff] %v3792_v8  ;;  %v3808_v6 = vrot.slane %v6305_v12, 6  ;;  %v6309_v8 = vperm.slane %v2991_v40, 3  ;;  %v6315_v12 = vperm.slane %v2991_v40, 7 }
  0xc3   :  { %6300 = vst [vmem:[#allocation181_spill] sm:$0xff] %v3796_v28  ;;  %v3812_v14 = vrot.slane %v6307_v5, 4  ;;  %v6317_v5 = vperm.slane %v3001_v39, 1  ;;  %v6320_v28 = vperm.slane %v3001_v39, 3 }
  0xc4   :  { %6302 = vst [vmem:[#allocation182_spill] sm:$0xff] %v3800_v37  ;;  %v3816_v16 = vrot.slane %v6309_v8, 2  ;;  %v3820_v37 = vrot.slane %v6311_v13, 6  ;;  %v6318_v8 = vperm.slane %v3001_v39, 2 }
  0xc5   :  { %6304 = vst [vmem:[#allocation183_spill] sm:$0xff] %v3804_v0  ;;  %v3824_v0 = vrot.slane %v6313_v9, 4  ;;  %v3840_v13 = vrot.slane %v6320_v28, 2  ;;  %v768_v28 = vsel %vm767_vm2, %v3044_v46, %v3048_v34  ;;  %v6333_v34 = vperm.slane %v3011_v36, 3 }
  0xc6   :  { %6306 = vst [vmem:[#allocation184_spill] sm:$0xff] %v3808_v6  ;;  %v3828_v6 = vrot.slane %v6315_v12, 2 }
  0xc7   :  { %6308 = vst [vmem:[#allocation185_spill] sm:$0xff] %v3812_v14  ;;  %v3832_v14 = vrot.slane %v6317_v5, 6  ;;  %v3878_v46 = vrot.slane %v6333_v34, 2  ;;  %v6341_v34 = vperm.slane %v3021_v35, 3 }
  0xc8   :  { %6310 = vst [vmem:[#allocation186_spill] sm:$0xff] %v3816_v16  ;;  %v3836_v16 = vrot.slane %v6318_v8, 4  ;;  %v6327_v8 = vperm.slane %v2682_v4, 0 }
  0xc9   :  { %6312 = vst [vmem:[#allocation187_spill] sm:$0xff] %v3820_v37  ;;  %v6321_v37 = vperm.slane %v3001_v39, 5 }
  0xca   :  { %6314 = vst [vmem:[#allocation188_spill] sm:$0xff] %v3824_v0  ;;  %v6323_v0 = vperm.slane %v3001_v39, 6 }
  0xcb   :  { %6316 = vst [vmem:[#allocation189_spill] sm:$0xff] %v3828_v6  ;;  %v3844_v9 = vrot.slane %v6321_v37, 6  ;;  %v6325_v6 = vperm.slane %v3001_v39, 7  ;;  %v6328_v37 = vperm.slane %v3011_v36, 1 }
  0xcc   :  { %6319 = vst [vmem:[#allocation190_spill] sm:$0xff] %v3836_v16  ;;  %v3848_v12 = vrot.slane %v6323_v0, 4  ;;  %v766_v16 = vsel %vm765_vm1, %v6327_v8, %v3040_v10  ;;  %v6330_v0 = vperm.slane %v3011_v36, 2  ;;  %v772_v10 = vsel %vm767_vm2, %v3056_v15, %v3060_v7 }
  0xcd   :  { %6322 = vst [vmem:[#allocation191_spill] sm:$0xff] %v3844_v9  ;;  %v3852_v5 = vrot.slane %v6325_v6, 2  ;;  %v3863_v9 = vrot.slane %v6328_v37, 6  ;;  %v6332_v6 = vperm.slane %v2682_v4, 4  ;;  %v6334_v8 = vperm.slane %v3011_v36, 5 }
  0xce   :  { %6324 = vst [vmem:[#allocation192_spill] sm:$0xff] %v3848_v12  ;;  %v3867_v12 = vrot.slane %v6330_v0, 4  ;;  %v6336_v0 = vperm.slane %v3011_v36, 6  ;;  %v6337_v4 = vperm.slane %v3011_v36, 7  ;;  %v6339_v15 = vperm.slane %v3021_v35, 2 }
  0xcf   :  { %6326 = vst [vmem:[#allocation193_spill] sm:$0xff] %v3852_v5  ;;  %v771_v5 = vsel %vm765_vm1, %v6332_v6, %v3052_v33  ;;  %v3882_v37 = vrot.slane %v6334_v8, 6  ;;  %v6338_v33 = vperm.slane %v3021_v35, 1  ;;  %v3902_v8 = vrot.slane %v6341_v34, 2 }
  0xd0   :  { %6329 = vst [vmem:[#allocation194_spill] sm:$0xff] %v3863_v9  ;;  %v3890_v9 = vrot.slane %v6337_v4, 2  ;;  %v3898_v7 = vrot.slane %v6339_v15, 4  ;;  %v6342_v4 = vperm.slane %v2691_v11, 0  ;;  %v805_v15 = vsel %vm767_vm2, %v3092_v18, %v3096_v21 }
  0xd1   :  { %6331 = vst [vmem:[#allocation195_spill] sm:$0xff] %v3867_v12  ;;  %v3886_v12 = vrot.slane %v6336_v0, 4  ;;  %v3894_v6 = vrot.slane %v6338_v33, 6  ;;  %v3908_v0 = vsel %vm769_vm3, %v771_v5, %v772_v10  ;;  %v808_v5 = vsel %vm767_vm2, %v3104_v23, %v3108_v25  ;;  %v6346_v10 = vld [vmem:[#allocation16_spill] sm:$0xff] }
  0xd2   :  { %6335 = vst [vmem:[#allocation196_spill] sm:$0xff] %v3882_v37  ;;  %v3905_v37 = vsel %vm769_vm3, %v766_v16, %v768_v28  ;;  %v804_v33 = vsel %vm765_vm1, %v6342_v4, %v3088_v17  ;;  %v6344_v28 = vperm.slane %v2701_v20, 0  ;;  %v811_v18 = vsel %vm767_vm2, %v3116_v27, %v3120_v30  ;;  %v6349_v4 = vld [vmem:[#allocation17_spill] sm:$0xff] }
  0xd3   :  { %6340 = vst [vmem:[#allocation197_spill] sm:$0xff] %v3898_v7  ;;  %v6343_v7 = vperm.slane %v2691_v11, 4  ;;  %v3922_v16 = vsel %vm769_vm3, %v804_v33, %v805_v15  ;;  %v814_v25 = vsel %vm767_vm2, %v3128_v32, %v3132_v24  ;;  %v6347_v27 = vperm.slane %v2711_v29, 0  ;;  %v6350_v15 = vld [vmem:[#allocation19_spill] sm:$0xff]  ;;  %v6352_v32 = vld [vmem:[#allocation21_spill] sm:$0xff]  ;;  %v6353_v24 = vld [vmem:[#allocation20_spill] sm:$0xff] }
  0xd4   :  { %v810_v17 = vsel %vm765_vm1, %v6344_v28, %v3112_v26  ;;  %v6354_v28 = vld [vmem:[#allocation22_spill] sm:$0xff] }
  0xd5   :  { %v807_v34 = vsel %vm765_vm1, %v6343_v7, %v3100_v22  ;;  %v3938_v21 = vsel %vm769_vm3, %v810_v17, %v811_v18  ;;  %v6345_v22 = vperm.slane %v2701_v20, 4  ;;  %v816_v30 = vsel %vm765_vm1, %v6347_v27, %v6346_v10  ;;  %v6348_v7 = vld [vmem:[#allocation18_spill] sm:$0xff]  ;;  %v6358_v27 = vld [vmem:[#allocation25_spill] sm:$0xff] }
  0xd6   :  { %v3935_v11 = vsel %vm769_vm3, %v807_v34, %v808_v5  ;;  %v817_v33 = vsel %vm767_vm2, %v6349_v4, %v6348_v7  ;;  %v6351_v20 = vperm.slane %v2711_v29, 4  ;;  %v820_v5 = vsel %vm767_vm2, %v6353_v24, %v6352_v32  ;;  %v6360_v4 = vld [vmem:[#allocation27_spill] sm:$0xff]  ;;  %v6362_v32 = vld [vmem:[#allocation28_spill] sm:$0xff] }
  0xd7   :  { %v813_v23 = vsel %vm765_vm1, %v6345_v22, %v3124_v31  ;;  %v3962_v34 = vsel %vm769_vm3, %v816_v30, %v817_v33  ;;  %v6355_v17 = vperm.slane %v2721_v38, 0  ;;  %v6356_v22 = vld [vmem:[#allocation24_spill] sm:$0xff]  ;;  %v6359_v30 = vperm.slane %v2721_v38, 4  ;;  %v6361_v33 = vld [vmem:[#allocation26_spill] sm:$0xff] }
  0xd8   :  { %v3948_v26 = vsel %vm769_vm3, %v813_v23, %v814_v25  ;;  %v819_v31 = vsel %vm765_vm1, %v6351_v20, %v6350_v15  ;;  %v6357_v23 = vld [vmem:[#allocation23_spill] sm:$0xff]  ;;  %v826_v15 = vsel %vm767_vm2, %v6361_v33, %v6360_v4  ;;  %v6363_v24 = vperm.slane %v2731_v47, 0 }
  0xd9   :  { %v822_v18 = vsel %vm765_vm1, %v6355_v17, %v6354_v28  ;;  %v823_v25 = vsel %vm767_vm2, %v6357_v23, %v6356_v22  ;;  %v3975_v29 = vsel %vm769_vm3, %v819_v31, %v820_v5  ;;  %v825_v7 = vsel %vm765_vm1, %v6359_v30, %v6358_v27  ;;  %v6364_v5 = vld [vmem:[#allocation30_spill] sm:$0xff]  ;;  %v6365_v28 = vld [vmem:[#allocation29_spill] sm:$0xff]  ;;  %v6369_v27 = vld [vmem:[#allocation32_spill] sm:$0xff] }
  0xda   :  { %v3978_v10 = vsel %vm769_vm3, %v822_v18, %v823_v25  ;;  %v3988_v20 = vsel %vm769_vm3, %v825_v7, %v826_v15  ;;  %v828_v31 = vsel %vm765_vm1, %v6363_v24, %v6362_v32  ;;  %v829_v17 = vsel %vm767_vm2, %v6365_v28, %v6364_v5  ;;  %v6366_v18 = vld [vmem:[#allocation31_spill] sm:$0xff]  ;;  %v6368_v25 = vld [vmem:[#allocation33_spill] sm:$0xff]  ;;  %v6370_v7 = vld [vmem:[#allocation34_spill] sm:$0xff] }
  0xdb   :  { %v6367_v38 = vperm.slane %v2731_v47, 4  ;;  %v4002_v23 = vsel %vm769_vm3, %v828_v31, %v829_v17  ;;  %v832_v30 = vsel %vm767_vm2, %v6369_v27, %v6368_v25  ;;  %v6371_v4 = vperm.slane %v2741_v56, 0  ;;  %v6372_v15 = vld [vmem:[#allocation36_spill] sm:$0xff]  ;;  %v6373_v32 = vld [vmem:[#allocation35_spill] sm:$0xff]  ;;  %v6374_v31 = vld [vmem:[#allocation37_spill] sm:$0xff] }
  0xdc   :  { %v835_v24 = vsel %vm767_vm2, %v6373_v32, %v6372_v15  ;;  %v6375_v28 = vperm.slane %v2741_v56, 4  ;;  %v6383_v32 = vld [vmem:[#allocation43_spill] sm:$0xff]  ;;  %v6384_v56 = vperm.slane %v2751_v1, 4 }
  0xdd   :  { %v831_v22 = vsel %vm765_vm1, %v6367_v38, %v6366_v18  ;;  %v834_v33 = vsel %vm765_vm1, %v6371_v4, %v6370_v7  ;;  %v6376_v18 = vld [vmem:[#allocation39_spill] sm:$0xff]  ;;  %v6377_v38 = vld [vmem:[#allocation38_spill] sm:$0xff]  ;;  %v6379_v7 = vld [vmem:[#allocation40_spill] sm:$0xff]  ;;  %v6380_v4 = vperm.slane %v2751_v1, 0 }
  0xde   :  { %v4015_v47 = vsel %vm769_vm3, %v831_v22, %v832_v30  ;;  %v4018_v5 = vsel %vm769_vm3, %v834_v33, %v835_v24  ;;  %v837_v17 = vsel %vm765_vm1, %v6375_v28, %v6374_v31  ;;  %v838_v25 = vsel %vm767_vm2, %v6377_v38, %v6376_v18  ;;  %v6381_v30 = vld [vmem:[#allocation42_spill] sm:$0xff]  ;;  %v6382_v33 = vld [vmem:[#allocation41_spill] sm:$0xff] }
  0xdf   :  { %v4028_v27 = vsel %vm769_vm3, %v837_v17, %v838_v25  ;;  %v840_v22 = vsel %vm765_vm1, %v6380_v4, %v6379_v7  ;;  %v841_v15 = vsel %vm767_vm2, %v6382_v33, %v6381_v30  ;;  %v843_v24 = vsel %vm765_vm1, %v6384_v56, %v6383_v32  ;;  %v6385_v28 = vld [vmem:[#allocation45_spill] sm:$0xff]  ;;  %v6386_v17 = vld [vmem:[#allocation44_spill] sm:$0xff]  ;;  %v6387_v38 = vld [vmem:[#allocation46_spill] sm:$0xff] }
  0xe0   :  { %6378 = vst [vmem:[#allocation16_spill] sm:$0xff] %v4028_v27  ;;  %v4042_v31 = vsel %vm769_vm3, %v840_v22, %v841_v15  ;;  %v844_v18 = vsel %vm767_vm2, %v6386_v17, %v6385_v28  ;;  %v6388_v25 = vperm.slane %v2761_v42, 0  ;;  %v6389_v4 = vld [vmem:[#allocation48_spill] sm:$0xff]  ;;  %v6390_v27 = vld [vmem:[#allocation47_spill] sm:$0xff]  ;;  %v6392_v22 = vld [vmem:[#allocation49_spill] sm:$0xff]  ;;  %v6393_v15 = vperm.slane %v2761_v42, 4 }
  0xe1   :  { %v847_v30 = vsel %vm767_vm2, %v6390_v27, %v6389_v4  ;;  %v4055_v1 = vsel %vm769_vm3, %v843_v24, %v844_v18  ;;  %v6394_v56 = vld [vmem:[#allocation51_spill] sm:$0xff]  ;;  %v6395_v28 = vld [vmem:[#allocation50_spill] sm:$0xff]  ;;  %v6398_v27 = vperm.slane %v2771_v51, 0  ;;  %v6402_v42 = vperm.slane %v2771_v51, 4 }
  0xe2   :  { %v846_v7 = vsel %vm765_vm1, %v6388_v25, %v6387_v38  ;;  %v849_v32 = vsel %vm765_vm1, %v6393_v15, %v6392_v22  ;;  %v850_v17 = vsel %vm767_vm2, %v6395_v28, %v6394_v56  ;;  %v6397_v25 = vld [vmem:[#allocation52_spill] sm:$0xff]  ;;  %v6399_v18 = vld [vmem:[#allocation54_spill] sm:$0xff]  ;;  %v6403_v56 = vld [vmem:[#allocation57_spill] sm:$0xff] }
  0xe3   :  { %v4058_v33 = vsel %vm769_vm3, %v846_v7, %v847_v30  ;;  %v4068_v38 = vsel %vm769_vm3, %v849_v32, %v850_v17  ;;  %v852_v24 = vsel %vm765_vm1, %v6398_v27, %v6397_v25  ;;  %v6400_v7 = vld [vmem:[#allocation53_spill] sm:$0xff]  ;;  %v6401_v30 = vld [vmem:[#allocation55_spill] sm:$0xff]  ;;  %v6404_v32 = vld [vmem:[#allocation56_spill] sm:$0xff] }
  0xe4   :  { %6391 = vst [vmem:[#allocation18_spill] sm:$0xff] %v4058_v33  ;;  %v853_v4 = vsel %vm767_vm2, %v6400_v7, %v6399_v18  ;;  %v855_v22 = vsel %vm765_vm1, %v6402_v42, %v6401_v30  ;;  %v856_v28 = vsel %vm767_vm2, %v6404_v32, %v6403_v56  ;;  %v6405_v17 = vld [vmem:[#allocation58_spill] sm:$0xff]  ;;  %v6407_v27 = vld [vmem:[#allocation60_spill] sm:$0xff]  ;;  %v6408_v33 = vld [vmem:[#allocation59_spill] sm:$0xff] }
  0xe5   :  { %6396 = vst [vmem:[#allocation17_spill] sm:$0xff] %v4068_v38  ;;  %v4082_v15 = vsel %vm769_vm3, %v852_v24, %v853_v4  ;;  %v6406_v38 = vperm.slane %v2781_v55, 0  ;;  %v859_v18 = vsel %vm767_vm2, %v6408_v33, %v6407_v27  ;;  %v4095_v51 = vsel %vm769_vm3, %v855_v22, %v856_v28  ;;  %v6410_v24 = vld [vmem:[#allocation61_spill] sm:$0xff]  ;;  %v6412_v42 = vld [vmem:[#allocation63_spill] sm:$0xff]  ;;  %v6413_v56 = vld [vmem:[#allocation62_spill] sm:$0xff] }
  0xe6   :  { %v6411_v4 = vperm.slane %v2781_v55, 4  ;;  %v862_v32 = vsel %vm767_vm2, %v6413_v56, %v6412_v42  ;;  %v6416_v33 = vperm.slane %v2791_v60, 0  ;;  %v6417_v28 = vld [vmem:[#allocation66_spill] sm:$0xff]  ;;  %v6420_v55 = vperm.slane %v2791_v60, 4  ;;  %v6421_v42 = vld [vmem:[#allocation69_spill] sm:$0xff] }
  0xe7   :  { %v858_v25 = vsel %vm765_vm1, %v6406_v38, %v6405_v17  ;;  %v6415_v17 = vld [vmem:[#allocation64_spill] sm:$0xff] }
  0xe8   :  { %v4098_v7 = vsel %vm769_vm3, %v858_v25, %v859_v18  ;;  %v861_v30 = vsel %vm765_vm1, %v6411_v4, %v6410_v24  ;;  %v864_v22 = vsel %vm765_vm1, %v6416_v33, %v6415_v17  ;;  %v6418_v25 = vld [vmem:[#allocation65_spill] sm:$0xff]  ;;  %v6419_v18 = vld [vmem:[#allocation67_spill] sm:$0xff]  ;;  %v6425_v33 = vld [vmem:[#allocation72_spill] sm:$0xff] }
  0xe9   :  { %6409 = vst [vmem:[#allocation19_spill] sm:$0xff] %v4098_v7  ;;  %v4108_v38 = vsel %vm769_vm3, %v861_v30, %v862_v32  ;;  %v865_v27 = vsel %vm767_vm2, %v6418_v25, %v6417_v28  ;;  %v867_v24 = vsel %vm765_vm1, %v6420_v55, %v6419_v18  ;;  %v6422_v30 = vld [vmem:[#allocation68_spill] sm:$0xff]  ;;  %v6423_v32 = vld [vmem:[#allocation70_spill] sm:$0xff]  ;;  %v6426_v7 = vld [vmem:[#allocation71_spill] sm:$0xff] }
  0xea   :  { %6414 = vst [vmem:[#allocation21_spill] sm:$0xff] %v4108_v38  ;;  %v4122_v4 = vsel %vm769_vm3, %v864_v22, %v865_v27  ;;  %v868_v56 = vsel %vm767_vm2, %v6422_v30, %v6421_v42  ;;  %v6424_v38 = vperm.slane %v2801_v19, 0  ;;  %v871_v28 = vsel %vm767_vm2, %v6426_v7, %v6425_v33  ;;  %v6428_v22 = vld [vmem:[#allocation73_spill] sm:$0xff]  ;;  %v6430_v55 = vld [vmem:[#allocation75_spill] sm:$0xff]  ;;  %v6431_v42 = vld [vmem:[#allocation74_spill] sm:$0xff] }
  0xeb   :  { %v4135_v60 = vsel %vm769_vm3, %v867_v24, %v868_v56  ;;  %v6429_v27 = vperm.slane %v2801_v19, 4  ;;  %v874_v30 = vsel %vm767_vm2, %v6431_v42, %v6430_v55  ;;  %v6434_v7 = vperm.slane %v2811_v3, 0  ;;  %v6435_v56 = vld [vmem:[#allocation78_spill] sm:$0xff]  ;;  %v6439_v55 = vld [vmem:[#allocation81_spill] sm:$0xff] }
  0xec   :  { %v870_v17 = vsel %vm765_vm1, %v6424_v38, %v6423_v32  ;;  %v6433_v32 = vld [vmem:[#allocation76_spill] sm:$0xff]  ;;  %v6438_v19 = vperm.slane %v2811_v3, 4 }
  0xed   :  { %v4138_v25 = vsel %vm769_vm3, %v870_v17, %v871_v28  ;;  %v873_v18 = vsel %vm765_vm1, %v6429_v27, %v6428_v22  ;;  %v876_v24 = vsel %vm765_vm1, %v6434_v7, %v6433_v32  ;;  %v6436_v17 = vld [vmem:[#allocation77_spill] sm:$0xff]  ;;  %v6437_v28 = vld [vmem:[#allocation79_spill] sm:$0xff]  ;;  %v6443_v7 = vld [vmem:[#allocation84_spill] sm:$0xff] }
  0xee   :  { %6427 = vst [vmem:[#allocation20_spill] sm:$0xff] %v4138_v25  ;;  %v4148_v38 = vsel %vm769_vm3, %v873_v18, %v874_v30  ;;  %v877_v33 = vsel %vm767_vm2, %v6436_v17, %v6435_v56  ;;  %v879_v22 = vsel %vm765_vm1, %v6438_v19, %v6437_v28  ;;  %v6440_v18 = vld [vmem:[#allocation80_spill] sm:$0xff]  ;;  %v6441_v30 = vld [vmem:[#allocation82_spill] sm:$0xff]  ;;  %v6444_v25 = vld [vmem:[#allocation83_spill] sm:$0xff] }
  0xef   :  { %6432 = vst [vmem:[#allocation22_spill] sm:$0xff] %v4148_v38  ;;  %v4162_v27 = vsel %vm769_vm3, %v876_v24, %v877_v33  ;;  %v880_v42 = vsel %vm767_vm2, %v6440_v18, %v6439_v55  ;;  %v6442_v38 = vperm.slane %v2821_v2, 0  ;;  %v883_v56 = vsel %vm767_vm2, %v6444_v25, %v6443_v7  ;;  %v6446_v24 = vld [vmem:[#allocation85_spill] sm:$0xff]  ;;  %v6448_v19 = vld [vmem:[#allocation87_spill] sm:$0xff]  ;;  %v6449_v55 = vld [vmem:[#allocation86_spill] sm:$0xff] }
  0xf0   :  { %v4175_v3 = vsel %vm769_vm3, %v879_v22, %v880_v42  ;;  %v6447_v33 = vperm.slane %v2821_v2, 4  ;;  %v886_v18 = vsel %vm767_vm2, %v6449_v55, %v6448_v19  ;;  %v6452_v25 = vperm.slane %v2831_v63, 0  ;;  %v6453_v42 = vld [vmem:[#allocation90_spill] sm:$0xff]  ;;  %v6457_v19 = vld [vmem:[#allocation93_spill] sm:$0xff] }
  0xf1   :  { %v882_v32 = vsel %vm765_vm1, %v6442_v38, %v6441_v30  ;;  %v6451_v30 = vld [vmem:[#allocation88_spill] sm:$0xff]  ;;  %v6456_v2 = vperm.slane %v2831_v63, 4 }
  0xf2   :  { %v4178_v17 = vsel %vm769_vm3, %v882_v32, %v883_v56  ;;  %v885_v28 = vsel %vm765_vm1, %v6447_v33, %v6446_v24  ;;  %v888_v22 = vsel %vm765_vm1, %v6452_v25, %v6451_v30  ;;  %v6454_v32 = vld [vmem:[#allocation89_spill] sm:$0xff]  ;;  %v6455_v56 = vld [vmem:[#allocation91_spill] sm:$0xff]  ;;  %v6461_v25 = vld [vmem:[#allocation96_spill] sm:$0xff] }
  0xf3   :  { %6445 = vst [vmem:[#allocation24_spill] sm:$0xff] %v4178_v17  ;;  %v4188_v38 = vsel %vm769_vm3, %v885_v28, %v886_v18  ;;  %v889_v7 = vsel %vm767_vm2, %v6454_v32, %v6453_v42  ;;  %v891_v24 = vsel %vm765_vm1, %v6456_v2, %v6455_v56  ;;  %v6458_v28 = vld [vmem:[#allocation92_spill] sm:$0xff]  ;;  %v6459_v18 = vld [vmem:[#allocation94_spill] sm:$0xff]  ;;  %v6462_v17 = vld [vmem:[#allocation95_spill] sm:$0xff] }
  0xf4   :  { %6450 = vst [vmem:[#allocation23_spill] sm:$0xff] %v4188_v38  ;;  %v4202_v33 = vsel %vm769_vm3, %v888_v22, %v889_v7  ;;  %v892_v55 = vsel %vm767_vm2, %v6458_v28, %v6457_v19  ;;  %v6460_v38 = vperm.slane %v2841_v62, 0  ;;  %v895_v42 = vsel %vm767_vm2, %v6462_v17, %v6461_v25  ;;  %v6465_v22 = vld [vmem:[#allocation97_spill] sm:$0xff]  ;;  %v6467_v2 = vld [vmem:[#allocation99_spill] sm:$0xff]  ;;  %v6468_v19 = vld [vmem:[#allocation98_spill] sm:$0xff] }
  0xf5   :  { %v4215_v63 = vsel %vm769_vm3, %v891_v24, %v892_v55  ;;  %v6466_v7 = vperm.slane %v2841_v62, 4  ;;  %v898_v28 = vsel %vm767_vm2, %v6468_v19, %v6467_v2  ;;  %v6471_v17 = vperm.slane %v2851_v61, 0  ;;  %v6472_v55 = vld [vmem:[#allocation102_spill] sm:$0xff]  ;;  %v6477_v2 = vld [vmem:[#allocation105_spill] sm:$0xff] }
  0xf6   :  { %v894_v30 = vsel %vm765_vm1, %v6460_v38, %v6459_v18  ;;  %6463 = vst [vmem:[#allocation25_spill] sm:$0xff] %v4215_v63  ;;  %v6470_v18 = vld [vmem:[#allocation100_spill] sm:$0xff]  ;;  %v6475_v62 = vperm.slane %v2851_v61, 4 }
  0xf7   :  { %v4218_v32 = vsel %vm769_vm3, %v894_v30, %v895_v42  ;;  %v897_v56 = vsel %vm765_vm1, %v6466_v7, %v6465_v22  ;;  %v900_v24 = vsel %vm765_vm1, %v6471_v17, %v6470_v18  ;;  %v6473_v30 = vld [vmem:[#allocation101_spill] sm:$0xff]  ;;  %v6474_v42 = vld [vmem:[#allocation103_spill] sm:$0xff]  ;;  %v6481_v17 = vld [vmem:[#allocation108_spill] sm:$0xff] }
  0xf8   :  { %6464 = vst [vmem:[#allocation27_spill] sm:$0xff] %v4218_v32  ;;  %v4228_v38 = vsel %vm769_vm3, %v897_v56, %v898_v28  ;;  %v901_v25 = vsel %vm767_vm2, %v6473_v30, %v6472_v55  ;;  %v903_v22 = vsel %vm765_vm1, %v6475_v62, %v6474_v42  ;;  %v6478_v56 = vld [vmem:[#allocation104_spill] sm:$0xff]  ;;  %v6479_v28 = vld [vmem:[#allocation106_spill] sm:$0xff]  ;;  %v6482_v32 = vld [vmem:[#allocation107_spill] sm:$0xff] }
  0xf9   :  { %6469 = vst [vmem:[#allocation26_spill] sm:$0xff] %v4228_v38  ;;  %v4242_v7 = vsel %vm769_vm3, %v900_v24, %v901_v25  ;;  %v904_v19 = vsel %vm767_vm2, %v6478_v56, %v6477_v2  ;;  %v6480_v38 = vperm.slane %v2861_v59, 0  ;;  %v907_v55 = vsel %vm767_vm2, %v6482_v32, %v6481_v17  ;;  %v6485_v24 = vld [vmem:[#allocation109_spill] sm:$0xff]  ;;  %v6487_v62 = vld [vmem:[#allocation111_spill] sm:$0xff]  ;;  %v6488_v2 = vld [vmem:[#allocation110_spill] sm:$0xff] }
  0xfa   :  { %6476 = vst [vmem:[#allocation28_spill] sm:$0xff] %v4242_v7  ;;  %v4255_v61 = vsel %vm769_vm3, %v903_v22, %v904_v19  ;;  %v6486_v25 = vperm.slane %v2861_v59, 4  ;;  %v910_v56 = vsel %vm767_vm2, %v6488_v2, %v6487_v62  ;;  %v6491_v32 = vperm.slane %v2871_v58, 0  ;;  %v6492_v19 = vld [vmem:[#allocation114_spill] sm:$0xff]  ;;  %v6497_v62 = vld [vmem:[#allocation117_spill] sm:$0xff] }
  0xfb   :  { %v906_v18 = vsel %vm765_vm1, %v6480_v38, %v6479_v28  ;;  %6483 = vst [vmem:[#allocation30_spill] sm:$0xff] %v4255_v61  ;;  %v6490_v28 = vld [vmem:[#allocation112_spill] sm:$0xff]  ;;  %v6495_v59 = vperm.slane %v2871_v58, 4 }
  0xfc   :  { %v4258_v30 = vsel %vm769_vm3, %v906_v18, %v907_v55  ;;  %v909_v42 = vsel %vm765_vm1, %v6486_v25, %v6485_v24  ;;  %v912_v22 = vsel %vm765_vm1, %v6491_v32, %v6490_v28  ;;  %v6493_v18 = vld [vmem:[#allocation113_spill] sm:$0xff]  ;;  %v6494_v55 = vld [vmem:[#allocation115_spill] sm:$0xff]  ;;  %v6501_v32 = vld [vmem:[#allocation120_spill] sm:$0xff] }
  0xfd   :  { %6484 = vst [vmem:[#allocation29_spill] sm:$0xff] %v4258_v30  ;;  %v4268_v38 = vsel %vm769_vm3, %v909_v42, %v910_v56  ;;  %v913_v17 = vsel %vm767_vm2, %v6493_v18, %v6492_v19  ;;  %v915_v24 = vsel %vm765_vm1, %v6495_v59, %v6494_v55  ;;  %v6498_v42 = vld [vmem:[#allocation116_spill] sm:$0xff]  ;;  %v6499_v56 = vld [vmem:[#allocation118_spill] sm:$0xff]  ;;  %v6502_v30 = vld [vmem:[#allocation119_spill] sm:$0xff] }
  0xfe   :  { %6489 = vst [vmem:[#allocation31_spill] sm:$0xff] %v4268_v38  ;;  %v4282_v25 = vsel %vm769_vm3, %v912_v22, %v913_v17  ;;  %v916_v2 = vsel %vm767_vm2, %v6498_v42, %v6497_v62  ;;  %v6500_v38 = vperm.slane %v2881_v57, 0  ;;  %v919_v19 = vsel %vm767_vm2, %v6502_v30, %v6501_v32  ;;  %v6505_v22 = vld [vmem:[#allocation121_spill] sm:$0xff]  ;;  %v6507_v59 = vld [vmem:[#allocation123_spill] sm:$0xff]  ;;  %v6508_v62 = vld [vmem:[#allocation122_spill] sm:$0xff] }
  0xff   :  { %6496 = vst [vmem:[#allocation33_spill] sm:$0xff] %v4282_v25  ;;  %v4295_v58 = vsel %vm769_vm3, %v915_v24, %v916_v2  ;;  %v6506_v17 = vperm.slane %v2881_v57, 4  ;;  %v922_v42 = vsel %vm767_vm2, %v6508_v62, %v6507_v59  ;;  %v6511_v30 = vperm.slane %v2891_v54, 0  ;;  %v6512_v2 = vld [vmem:[#allocation126_spill] sm:$0xff]  ;;  %v6517_v59 = vld [vmem:[#allocation129_spill] sm:$0xff] }
 0x100   :  { %v918_v28 = vsel %vm765_vm1, %v6500_v38, %v6499_v56  ;;  %6503 = vst [vmem:[#allocation32_spill] sm:$0xff] %v4295_v58  ;;  %v6510_v56 = vld [vmem:[#allocation124_spill] sm:$0xff]  ;;  %v6515_v57 = vperm.slane %v2891_v54, 4 }
 0x101   :  { %v4298_v18 = vsel %vm769_vm3, %v918_v28, %v919_v19  ;;  %v921_v55 = vsel %vm765_vm1, %v6506_v17, %v6505_v22  ;;  %v924_v24 = vsel %vm765_vm1, %v6511_v30, %v6510_v56  ;;  %v6513_v28 = vld [vmem:[#allocation125_spill] sm:$0xff]  ;;  %v6514_v19 = vld [vmem:[#allocation127_spill] sm:$0xff]  ;;  %v6521_v30 = vld [vmem:[#allocation132_spill] sm:$0xff] }
 0x102   :  { %6504 = vst [vmem:[#allocation34_spill] sm:$0xff] %v4298_v18  ;;  %v4308_v38 = vsel %vm769_vm3, %v921_v55, %v922_v42  ;;  %v925_v32 = vsel %vm767_vm2, %v6513_v28, %v6512_v2  ;;  %v927_v22 = vsel %vm765_vm1, %v6515_v57, %v6514_v19  ;;  %v6518_v55 = vld [vmem:[#allocation128_spill] sm:$0xff]  ;;  %v6519_v42 = vld [vmem:[#allocation130_spill] sm:$0xff]  ;;  %v6522_v18 = vld [vmem:[#allocation131_spill] sm:$0xff] }
 0x103   :  { %6509 = vst [vmem:[#allocation36_spill] sm:$0xff] %v4308_v38  ;;  %v4322_v17 = vsel %vm769_vm3, %v924_v24, %v925_v32  ;;  %v928_v62 = vsel %vm767_vm2, %v6518_v55, %v6517_v59  ;;  %v6520_v38 = vperm.slane %v2901_v53, 0  ;;  %v931_v2 = vsel %vm767_vm2, %v6522_v18, %v6521_v30  ;;  %v6525_v24 = vld [vmem:[#allocation133_spill] sm:$0xff]  ;;  %v6527_v57 = vld [vmem:[#allocation135_spill] sm:$0xff]  ;;  %v6528_v59 = vld [vmem:[#allocation134_spill] sm:$0xff] }
 0x104   :  { %6516 = vst [vmem:[#allocation35_spill] sm:$0xff] %v4322_v17  ;;  %v4335_v54 = vsel %vm769_vm3, %v927_v22, %v928_v62  ;;  %v6526_v32 = vperm.slane %v2901_v53, 4  ;;  %v934_v55 = vsel %vm767_vm2, %v6528_v59, %v6527_v57  ;;  %v6531_v18 = vperm.slane %v2911_v52, 0  ;;  %v6532_v62 = vld [vmem:[#allocation138_spill] sm:$0xff]  ;;  %v6537_v57 = vld [vmem:[#allocation141_spill] sm:$0xff] }
 0x105   :  { %v930_v56 = vsel %vm765_vm1, %v6520_v38, %v6519_v42  ;;  %6523 = vst [vmem:[#allocation37_spill] sm:$0xff] %v4335_v54  ;;  %v6530_v42 = vld [vmem:[#allocation136_spill] sm:$0xff]  ;;  %v6535_v53 = vperm.slane %v2911_v52, 4  ;;  %v4633_v17 = vld [vmem:[#allocation5 + $0x28] sm:$0xff] }
 0x106   :  { %v4338_v28 = vsel %vm769_vm3, %v930_v56, %v931_v2  ;;  %v933_v19 = vsel %vm765_vm1, %v6526_v32, %v6525_v24  ;;  %v936_v22 = vsel %vm765_vm1, %v6531_v18, %v6530_v42  ;;  %v6533_v56 = vld [vmem:[#allocation137_spill] sm:$0xff]  ;;  %v6534_v2 = vld [vmem:[#allocation139_spill] sm:$0xff]  ;;  %v6541_v18 = vld [vmem:[#allocation144_spill] sm:$0xff]  ;;  %v253_v61 = vperm.slane %v4633_v17, 1 }
 0x107   :  { %6524 = vst [vmem:[#allocation39_spill] sm:$0xff] %v4338_v28  ;;  %v4348_v38 = vsel %vm769_vm3, %v933_v19, %v934_v55  ;;  %v937_v30 = vsel %vm767_vm2, %v6533_v56, %v6532_v62  ;;  %v939_v24 = vsel %vm765_vm1, %v6535_v53, %v6534_v2  ;;  %v6538_v19 = vld [vmem:[#allocation140_spill] sm:$0xff]  ;;  %v6539_v55 = vld [vmem:[#allocation142_spill] sm:$0xff]  ;;  %v6542_v28 = vld [vmem:[#allocation143_spill] sm:$0xff] }
 0x108   :  { %6529 = vst [vmem:[#allocation38_spill] sm:$0xff] %v4348_v38  ;;  %v4362_v32 = vsel %vm769_vm3, %v936_v22, %v937_v30  ;;  %v940_v59 = vsel %vm767_vm2, %v6538_v19, %v6537_v57  ;;  %v6540_v38 = vperm.slane %v2921_v50, 0  ;;  %v943_v62 = vsel %vm767_vm2, %v6542_v28, %v6541_v18  ;;  %v6545_v22 = vld [vmem:[#allocation145_spill] sm:$0xff]  ;;  %v6547_v53 = vld [vmem:[#allocation147_spill] sm:$0xff]  ;;  %v6548_v57 = vld [vmem:[#allocation146_spill] sm:$0xff] }
 0x109   :  { %6536 = vst [vmem:[#allocation40_spill] sm:$0xff] %v4362_v32  ;;  %v4375_v52 = vsel %vm769_vm3, %v939_v24, %v940_v59  ;;  %v6546_v30 = vperm.slane %v2921_v50, 4  ;;  %v946_v19 = vsel %vm767_vm2, %v6548_v57, %v6547_v53  ;;  %v6551_v28 = vperm.slane %v2931_v49, 0  ;;  %v6552_v59 = vld [vmem:[#allocation150_spill] sm:$0xff]  ;;  %v6557_v53 = vld [vmem:[#allocation153_spill] sm:$0xff] }
 0x10a   :  { %v942_v42 = vsel %vm765_vm1, %v6540_v38, %v6539_v55  ;;  %6543 = vst [vmem:[#allocation42_spill] sm:$0xff] %v4375_v52  ;;  %v6550_v55 = vld [vmem:[#allocation148_spill] sm:$0xff]  ;;  %v6555_v50 = vperm.slane %v2931_v49, 4 }
 0x10b   :  { %v4378_v56 = vsel %vm769_vm3, %v942_v42, %v943_v62  ;;  %v945_v2 = vsel %vm765_vm1, %v6546_v30, %v6545_v22  ;;  %v948_v24 = vsel %vm765_vm1, %v6551_v28, %v6550_v55  ;;  %v6553_v42 = vld [vmem:[#allocation149_spill] sm:$0xff]  ;;  %v6554_v62 = vld [vmem:[#allocation151_spill] sm:$0xff]  ;;  %v6561_v28 = vld [vmem:[#allocation156_spill] sm:$0xff] }
 0x10c   :  { %6544 = vst [vmem:[#allocation41_spill] sm:$0xff] %v4378_v56  ;;  %v4388_v38 = vsel %vm769_vm3, %v945_v2, %v946_v19  ;;  %v949_v18 = vsel %vm767_vm2, %v6553_v42, %v6552_v59  ;;  %v951_v22 = vsel %vm765_vm1, %v6555_v50, %v6554_v62  ;;  %v6558_v2 = vld [vmem:[#allocation152_spill] sm:$0xff]  ;;  %v6559_v19 = vld [vmem:[#allocation154_spill] sm:$0xff]  ;;  %v6562_v56 = vld [vmem:[#allocation155_spill] sm:$0xff] }
 0x10d   :  { %6549 = vst [vmem:[#allocation43_spill] sm:$0xff] %v4388_v38  ;;  %v4402_v30 = vsel %vm769_vm3, %v948_v24, %v949_v18  ;;  %v952_v57 = vsel %vm767_vm2, %v6558_v2, %v6557_v53  ;;  %v6560_v38 = vperm.slane %v2941_v48, 0  ;;  %v955_v59 = vsel %vm767_vm2, %v6562_v56, %v6561_v28  ;;  %v6565_v24 = vld [vmem:[#allocation157_spill] sm:$0xff]  ;;  %v6567_v50 = vld [vmem:[#allocation159_spill] sm:$0xff]  ;;  %v6568_v53 = vld [vmem:[#allocation158_spill] sm:$0xff] }
 0x10e   :  { %6556 = vst [vmem:[#allocation45_spill] sm:$0xff] %v4402_v30  ;;  %v4415_v49 = vsel %vm769_vm3, %v951_v22, %v952_v57  ;;  %v6566_v18 = vperm.slane %v2941_v48, 4  ;;  %v958_v2 = vsel %vm767_vm2, %v6568_v53, %v6567_v50  ;;  %v6571_v56 = vperm.slane %v2951_v45, 0  ;;  %v6572_v57 = vld [vmem:[#allocation162_spill] sm:$0xff]  ;;  %v6577_v50 = vld [vmem:[#allocation165_spill] sm:$0xff] }
 0x10f   :  { %v954_v55 = vsel %vm765_vm1, %v6560_v38, %v6559_v19  ;;  %6563 = vst [vmem:[#allocation44_spill] sm:$0xff] %v4415_v49  ;;  %v6570_v19 = vld [vmem:[#allocation160_spill] sm:$0xff]  ;;  %v6575_v48 = vperm.slane %v2951_v45, 4 }
 0x110   :  { %v4418_v42 = vsel %vm769_vm3, %v954_v55, %v955_v59  ;;  %v957_v62 = vsel %vm765_vm1, %v6566_v18, %v6565_v24  ;;  %v960_v22 = vsel %vm765_vm1, %v6571_v56, %v6570_v19  ;;  %v6573_v55 = vld [vmem:[#allocation161_spill] sm:$0xff]  ;;  %v6574_v59 = vld [vmem:[#allocation163_spill] sm:$0xff]  ;;  %v6581_v56 = vld [vmem:[#allocation168_spill] sm:$0xff] }
 0x111   :  { %6564 = vst [vmem:[#allocation46_spill] sm:$0xff] %v4418_v42  ;;  %v4428_v38 = vsel %vm769_vm3, %v957_v62, %v958_v2  ;;  %v961_v28 = vsel %vm767_vm2, %v6573_v55, %v6572_v57  ;;  %v963_v24 = vsel %vm765_vm1, %v6575_v48, %v6574_v59  ;;  %v6578_v62 = vld [vmem:[#allocation164_spill] sm:$0xff]  ;;  %v6579_v2 = vld [vmem:[#allocation166_spill] sm:$0xff]  ;;  %v6582_v42 = vld [vmem:[#allocation167_spill] sm:$0xff] }
 0x112   :  { %6569 = vst [vmem:[#allocation48_spill] sm:$0xff] %v4428_v38  ;;  %v4442_v18 = vsel %vm769_vm3, %v960_v22, %v961_v28  ;;  %v964_v53 = vsel %vm767_vm2, %v6578_v62, %v6577_v50  ;;  %v6580_v38 = vperm.slane %v2961_v44, 0  ;;  %v967_v57 = vsel %vm767_vm2, %v6582_v42, %v6581_v56  ;;  %v6585_v22 = vld [vmem:[#allocation169_spill] sm:$0xff]  ;;  %v6587_v48 = vld [vmem:[#allocation171_spill] sm:$0xff]  ;;  %v6588_v50 = vld [vmem:[#allocation170_spill] sm:$0xff] }
 0x113   :  { %6576 = vst [vmem:[#allocation47_spill] sm:$0xff] %v4442_v18  ;;  %v4455_v45 = vsel %vm769_vm3, %v963_v24, %v964_v53  ;;  %v6586_v28 = vperm.slane %v2961_v44, 4  ;;  %v970_v62 = vsel %vm767_vm2, %v6588_v50, %v6587_v48  ;;  %v6591_v42 = vperm.slane %v2971_v43, 0  ;;  %v6592_v53 = vld [vmem:[#allocation174_spill] sm:$0xff]  ;;  %v6597_v48 = vld [vmem:[#allocation177_spill] sm:$0xff] }
 0x114   :  { %v966_v19 = vsel %vm765_vm1, %v6580_v38, %v6579_v2  ;;  %6583 = vst [vmem:[#allocation49_spill] sm:$0xff] %v4455_v45  ;;  %v6590_v2 = vld [vmem:[#allocation172_spill] sm:$0xff]  ;;  %v6595_v44 = vperm.slane %v2971_v43, 4 }
 0x115   :  { %v4458_v55 = vsel %vm769_vm3, %v966_v19, %v967_v57  ;;  %v969_v59 = vsel %vm765_vm1, %v6586_v28, %v6585_v22  ;;  %v972_v24 = vsel %vm765_vm1, %v6591_v42, %v6590_v2  ;;  %v6593_v19 = vld [vmem:[#allocation173_spill] sm:$0xff]  ;;  %v6594_v57 = vld [vmem:[#allocation175_spill] sm:$0xff]  ;;  %v6601_v42 = vld [vmem:[#allocation180_spill] sm:$0xff] }
 0x116   :  { %6584 = vst [vmem:[#allocation51_spill] sm:$0xff] %v4458_v55  ;;  %v4468_v38 = vsel %vm769_vm3, %v969_v59, %v970_v62  ;;  %v973_v56 = vsel %vm767_vm2, %v6593_v19, %v6592_v53  ;;  %v975_v22 = vsel %vm765_vm1, %v6595_v44, %v6594_v57  ;;  %v6598_v59 = vld [vmem:[#allocation176_spill] sm:$0xff]  ;;  %v6599_v62 = vld [vmem:[#allocation178_spill] sm:$0xff]  ;;  %v6602_v55 = vld [vmem:[#allocation179_spill] sm:$0xff] }
 0x117   :  { %6589 = vst [vmem:[#allocation50_spill] sm:$0xff] %v4468_v38  ;;  %v4482_v28 = vsel %vm769_vm3, %v972_v24, %v973_v56  ;;  %v976_v50 = vsel %vm767_vm2, %v6598_v59, %v6597_v48  ;;  %v6600_v38 = vperm.slane %v2981_v41, 0  ;;  %v979_v53 = vsel %vm767_vm2, %v6602_v55, %v6601_v42  ;;  %v6605_v24 = vld [vmem:[#allocation181_spill] sm:$0xff]  ;;  %v6607_v44 = vld [vmem:[#allocation183_spill] sm:$0xff]  ;;  %v6608_v48 = vld [vmem:[#allocation182_spill] sm:$0xff] }
 0x118   :  { %6596 = vst [vmem:[#allocation52_spill] sm:$0xff] %v4482_v28  ;;  %v4495_v43 = vsel %vm769_vm3, %v975_v22, %v976_v50  ;;  %v6606_v56 = vperm.slane %v2981_v41, 4  ;;  %v982_v59 = vsel %vm767_vm2, %v6608_v48, %v6607_v44  ;;  %v6611_v55 = vperm.slane %v2991_v40, 0  ;;  %v6612_v50 = vld [vmem:[#allocation186_spill] sm:$0xff]  ;;  %v6617_v44 = vld [vmem:[#allocation189_spill] sm:$0xff] }
 0x119   :  { %v978_v2 = vsel %vm765_vm1, %v6600_v38, %v6599_v62  ;;  %6603 = vst [vmem:[#allocation54_spill] sm:$0xff] %v4495_v43  ;;  %v6610_v62 = vld [vmem:[#allocation184_spill] sm:$0xff]  ;;  %v6615_v41 = vperm.slane %v2991_v40, 4  ;;  %v44_v40 = vld [vmem:[#allocation3 + $0x8] sm:$0xff] }
 0x11a   :  { %v4498_v19 = vsel %vm769_vm3, %v978_v2, %v979_v53  ;;  %v981_v57 = vsel %vm765_vm1, %v6606_v56, %v6605_v24  ;;  %v984_v22 = vsel %vm765_vm1, %v6611_v55, %v6610_v62  ;;  %v6613_v2 = vld [vmem:[#allocation185_spill] sm:$0xff]  ;;  %v6614_v53 = vld [vmem:[#allocation187_spill] sm:$0xff]  ;;  %v6620_v55 = vld [vmem:[#allocation190_spill] sm:$0xff] }
 0x11b   :  { %6604 = vst [vmem:[#allocation53_spill] sm:$0xff] %v4498_v19  ;;  %v4508_v38 = vsel %vm769_vm3, %v981_v57, %v982_v59  ;;  %v985_v42 = vsel %vm767_vm2, %v6613_v2, %v6612_v50  ;;  %v987_v24 = vsel %vm765_vm1, %v6615_v41, %v6614_v53  ;;  %v6618_v57 = vld [vmem:[#allocation188_spill] sm:$0xff]  ;;  %v6619_v59 = vperm.slane %v3001_v39, 0  ;;  %v43_v2 = vld [vmem:[#allocation3] sm:$0xff] }
 0x11c   :  { %6609 = vst [vmem:[#allocation55_spill] sm:$0xff] %v4508_v38  ;;  %v4522_v56 = vsel %vm769_vm3, %v984_v22, %v985_v42  ;;  %v988_v48 = vsel %vm767_vm2, %v6618_v57, %v6617_v44  ;;  %v991_v50 = vsel %vm767_vm2, %v6620_v55, %v3840_v13  ;;  %v6623_v42 = vld [vmem:[#allocation191_spill] sm:$0xff]  ;;  %v6624_v41 = vperm.slane %v3001_v39, 4  ;;  %v6625_v57 = vld [vmem:[#allocation193_spill] sm:$0xff]  ;;  %v6628_v13 = vld [vmem:[#allocation194_spill] sm:$0xff] }
 0x11d   :  { %6616 = vst [vmem:[#allocation57_spill] sm:$0xff] %v4522_v56  ;;  %v990_v62 = vsel %vm765_vm1, %v6619_v59, %v3832_v14  ;;  %v4535_v53 = vsel %vm769_vm3, %v987_v24, %v988_v48  ;;  %v6626_v56 = vld [vmem:[#allocation192_spill] sm:$0xff]  ;;  %v6629_v55 = vperm.slane %v3011_v36, 0  ;;  %v6630_v48 = vld [vmem:[#allocation195_spill] sm:$0xff]  ;;  %v6632_v39 = vperm.slane %v3011_v36, 4 }
 0x11e   :  { %6621 = vst [vmem:[#allocation56_spill] sm:$0xff] %v4535_v53  ;;  %v4538_v22 = vsel %vm769_vm3, %v990_v62, %v991_v50  ;;  %v993_v44 = vsel %vm765_vm1, %v6624_v41, %v6623_v42  ;;  %v994_v14 = vsel %vm767_vm2, %v6626_v56, %v6625_v57  ;;  %v997_v62 = vsel %vm767_vm2, %v6630_v48, %v3878_v46  ;;  %v6631_v50 = vld [vmem:[#allocation196_spill] sm:$0xff]  ;;  %v6639_v48 = vld [vmem:[#allocation9_spill] sm:$0xff] }
 0x11f   :  { %6622 = vst [vmem:[#allocation58_spill] sm:$0xff] %v4538_v22  ;;  %v4548_v59 = vsel %vm769_vm3, %v993_v44, %v994_v14  ;;  %v996_v24 = vsel %vm765_vm1, %v6629_v55, %v6628_v13  ;;  %v999_v42 = vsel %vm765_vm1, %v6632_v39, %v6631_v50  ;;  %v1000_v56 = vsel %vm767_vm2, %v3886_v12, %v3890_v9  ;;  %v6635_v14 = vld [vmem:[#allocation197_spill] sm:$0xff]  ;;  %v124_v13 = vld [vmem:[#allocation5 + $0x10] sm:$0xff] }
 0x120   :  { %6627 = vst [vmem:[#allocation60_spill] sm:$0xff] %v4548_v59  ;;  %v4562_v41 = vsel %vm769_vm3, %v996_v24, %v997_v62  ;;  %v6634_v44 = vperm.slane %v3021_v35, 0  ;;  %v1003_v46 = vsel %vm767_vm2, %v6635_v14, %v3902_v8  ;;  %v4575_v36 = vsel %vm769_vm3, %v999_v42, %v1000_v56  ;;  %v6638_v35 = vld [vmem:[#allocation10_spill] sm:$0xff]  ;;  %v6641_v50 = vld [vmem:[#allocation12_spill] sm:$0xff]  ;;  %v6642_v8 = vld [vmem:[#allocation11_spill] sm:$0xff] }
 0x121   :  { %6633 = vst [vmem:[#allocation59_spill] sm:$0xff] %v4562_v41  ;;  %v1084_v24 = vmul.f32 %v3905_v37, %v43_v2  ;;  %v1085_v9 = vmul.f32 %v3908_v0, %v44_v40  ;;  %v229_v12 = vperm.slane %v124_v13, 1  ;;  %v775_v39 = vsel %vm767_vm2, %v6642_v8, %v6641_v50  ;;  %v6645_v0 = vld [vmem:[#allocation15_spill] sm:$0xff]  ;;  %v6646_v2 = vld [vmem:[#allocation14_spill] sm:$0xff]  ;;  %v4598_v59 = vld [vmem:[#allocation5 + $0x18] sm:$0xff] }
 0x122   :  { %v1002_v57 = vsel %vm765_vm1, %v6634_v44, %v3894_v6  ;;  %6636 = vst [vmem:[#allocation61_spill] sm:$0xff] %v4575_v36  ;;  %v6640_v6 = vperm.slane %v6639_v48, 0  ;;  %v230_v42 = vperm.slane %v124_v13, 2  ;;  %v231_v56 = vperm.slane %v124_v13, 3  ;;  %v6643_v44 = vld [vmem:[#allocation13_spill] sm:$0xff] }
 0x123   :  { %v4578_v55 = vsel %vm769_vm3, %v1002_v57, %v1003_v46  ;;  %1242 = vst [vmem:[#allocation1] ss:$4 sm:$0xff] %v1084_v24  ;;  %v6644_v57 = vperm.slane %v6639_v48, 4  ;;  %v778_v40 = vsel %vm767_vm2, %v6646_v2, %v6645_v0  ;;  %v233_v14 = vperm.slane %v124_v13, 5 }
 0x124   :  { %6637 = vst [vmem:[#allocation63_spill] sm:$0xff] %v4578_v55  ;;  %v774_v62 = vsel %vm765_vm1, %v6640_v6, %v6638_v35  ;;  %v234_v46 = vperm.slane %v124_v13, 6  ;;  %v235_v24 = vperm.slane %v124_v13, 7  ;;  %v45_v35 = vld [vmem:[#allocation3 + $0x10] sm:$0xff]  ;;  %v46_v55 = vld [vmem:[#allocation3 + $0x18] sm:$0xff]  ;;  %v228_v50 = vperm.slane %v124_v13, 0 }
 0x125   :  { %1244 = vst [vmem:[#allocation1 + $0x20] ss:$4 sm:$0xff] %v1085_v9  ;;  %v777_v37 = vsel %vm765_vm1, %v6644_v57, %v6643_v44  ;;  %v776_v6 = vsel %vm769_vm3, %v774_v62, %v775_v39  ;;  %v232_v8 = vperm.slane %v124_v13, 4  ;;  %v540_v36 = vrot.slane %v229_v12, 6 }
 0x126   :  { %v779_v9 = vsel %vm769_vm3, %v777_v37, %v778_v40  ;;  %v541_v41 = vrot.slane %v230_v42, 4  ;;  %v542_v48 = vrot.slane %v231_v56, 2  ;;  %v543_v44 = vrot.slane %v233_v14, 6 }
 0x127   :  { %v544_v57 = vrot.slane %v234_v46, 4  ;;  %v545_v22 = vrot.slane %v235_v24, 2  ;;  %v1086_v0 = vmul.f32 %v776_v6, %v45_v35  ;;  %v1087_v2 = vmul.f32 %v779_v9, %v46_v55  ;;  %v4611_v55 = vld [vmem:[#allocation5 + $0x20] sm:$0xff] }
 0x128   :  { %v237_v12 = vperm.slane %v4598_v59, 1  ;;  %v780_v42 = vsel %vm765_vm1, %v228_v50, %v540_v36  ;;  %v781_v56 = vsel %vm767_vm2, %v541_v41, %v542_v48  ;;  %v238_v40 = vperm.slane %v4598_v59, 2  ;;  %v47_v36 = vld [vmem:[#allocation3 + $0x20] sm:$0xff]  ;;  %v48_v48 = vld [vmem:[#allocation3 + $0x28] sm:$0xff] }
 0x129   :  { %v239_v14 = vperm.slane %v4598_v59, 3  ;;  %v783_v46 = vsel %vm765_vm1, %v232_v8, %v543_v44  ;;  %v784_v24 = vsel %vm767_vm2, %v544_v57, %v545_v22  ;;  %v241_v35 = vperm.slane %v4598_v59, 5 }
 0x12a   :  { %v1245_v53 = vld.sshfl [vmem:[#allocation1] sm:$0xff pattern:$0x73625140]  ;;  %v1246_v38 = vld.sshfl [vmem:[#allocation1 + $0x8] sm:$0xff pattern:$0x73625140]  ;;  %v782_v50 = vsel %vm769_vm3, %v780_v42, %v781_v56  ;;  %v785_v22 = vsel %vm769_vm3, %v783_v46, %v784_v24 }
 0x12b   :  { %v1247_v19 = vld.sshfl [vmem:[#allocation1 + $0x10] sm:$0xff pattern:$0x73625140]  ;;  %v1248_v43 = vld.sshfl [vmem:[#allocation1 + $0x18] sm:$0xff pattern:$0x73625140]  ;;  %v1088_v52 = vmul.f32 %v782_v50, %v47_v36  ;;  %v1089_v32 = vmul.f32 %v785_v22, %v48_v48 }
 0x12c   :  { %v4600_v62 = vld.sshfl [vmem:[#allocation1 + $0x20] sm:$0xff pattern:$0x73625140]  ;;  %v4602_v39 = vld.sshfl [vmem:[#allocation1 + $0x28] sm:$0xff pattern:$0x73625140] }
 0x12d   :  { %v4604_v37 = vld.sshfl [vmem:[#allocation1 + $0x30] sm:$0xff pattern:$0x73625140]  ;;  %v4606_v13 = vld.sshfl [vmem:[#allocation1 + $0x38] sm:$0xff pattern:$0x73625140] }
 0x12e   :  { %1253 = vst [vmem:[#allocation1] ss:$4 sm:$0xff] %v1086_v0  ;;  %v242_v6 = vperm.slane %v4598_v59, 6  ;;  %v243_v9 = vperm.slane %v4598_v59, 7  ;;  %v236_v41 = vperm.slane %v4598_v59, 0  ;;  %v240_v0 = vperm.slane %v4598_v59, 4 }
 0x12f   :  { %1254 = vst [vmem:[#allocation1 + $0x20] ss:$4 sm:$0xff] %v1087_v2  ;;  %v245_v2 = vperm.slane %v4611_v55, 1  ;;  %v246_v8 = vperm.slane %v4611_v55, 2  ;;  %v247_v44 = vperm.slane %v4611_v55, 3  ;;  %v546_v57 = vrot.slane %v237_v12, 6 }
 0x130   :  { %v547_v28 = vrot.slane %v238_v40, 4  ;;  %v548_v45 = vrot.slane %v239_v14, 2  ;;  %v549_v18 = vrot.slane %v241_v35, 6  ;;  %v550_v49 = vrot.slane %v242_v6, 4 }
 0x131   :  { %v551_v30 = vrot.slane %v243_v9, 2  ;;  %v249_v14 = vperm.slane %v4611_v55, 5  ;;  %v1954_v35 = vsel %vm765_vm1, %v1245_v53, 0.0  ;;  %v1955_v6 = vsel %vm765_vm1, %v1246_v38, 0.0 }
 0x132   :  { %v1957_v9 = vsel %vm765_vm1, %v1247_v19, 0.0  ;;  %v250_v36 = vperm.slane %v4611_v55, 6  ;;  %v786_v50 = vsel %vm765_vm1, %v236_v41, %v546_v57  ;;  %v787_v48 = vsel %vm767_vm2, %v547_v28, %v548_v45  ;;  %v49_v41 = vld [vmem:[#allocation3 + $0x30] sm:$0xff] }
 0x133   :  { %v1956_v22 = vadd.f32 %v1955_v6, %v1954_v35  ;;  %v251_v58 = vperm.slane %v4611_v55, 7  ;;  %v789_v25 = vsel %vm765_vm1, %v240_v0, %v549_v18  ;;  %v1959_v53 = vsel %vm765_vm1, %v1248_v43, 0.0  ;;  %v50_v0 = vld [vmem:[#allocation3 + $0x38] sm:$0xff] }
 0x134   :  { %v244_v38 = vperm.slane %v4611_v55, 0  ;;  %v248_v19 = vperm.slane %v4611_v55, 4  ;;  %v254_v45 = vperm.slane %v4633_v17, 2  ;;  %v788_v28 = vsel %vm769_vm3, %v786_v50, %v787_v48 }
 0x135   :  { %v1255_v42 = vld.sshfl [vmem:[#allocation1] sm:$0xff pattern:$0x73625140]  ;;  %v4627_v56 = vld.sshfl [vmem:[#allocation1 + $0x8] sm:$0xff pattern:$0x73625140]  ;;  %v1958_v7 = vadd.f32 %v1957_v9, %v1956_v22  ;;  %v1090_v22 = vmul.f32 %v788_v28, %v49_v41 }
 0x136   :  { %v4629_v59 = vld.sshfl [vmem:[#allocation1 + $0x10] sm:$0xff pattern:$0x73625140]  ;;  %v4631_v54 = vld.sshfl [vmem:[#allocation1 + $0x18] sm:$0xff pattern:$0x73625140] }
 0x137   :  { %v4635_v46 = vld.sshfl [vmem:[#allocation1 + $0x20] sm:$0xff pattern:$0x73625140]  ;;  %v4637_v24 = vld.sshfl [vmem:[#allocation1 + $0x28] sm:$0xff pattern:$0x73625140]  ;;  %v1960_v57 = vadd.f32 %v1959_v53, %v1958_v7 }
 0x138   :  { %v4639_v12 = vld.sshfl [vmem:[#allocation1 + $0x30] sm:$0xff pattern:$0x73625140]  ;;  %v4641_v40 = vld.sshfl [vmem:[#allocation1 + $0x38] sm:$0xff pattern:$0x73625140] }
 0x139   :  { %1263 = vst [vmem:[#allocation1] ss:$4 sm:$0xff] %v1088_v52  ;;  %v790_v52 = vsel %vm767_vm2, %v550_v49, %v551_v30  ;;  %v1961_v18 = vsel %vm765_vm1, %v4600_v62, 0.0  ;;  %v553_v30 = vrot.slane %v246_v8, 4  ;;  %v554_v49 = vrot.slane %v247_v44, 2 }
 0x13a   :  { %1264 = vst [vmem:[#allocation1 + $0x20] ss:$4 sm:$0xff] %v1089_v32  ;;  %v552_v32 = vrot.slane %v245_v2, 6  ;;  %v791_v43 = vsel %vm769_vm3, %v789_v25, %v790_v52  ;;  %v555_v35 = vrot.slane %v249_v14, 6  ;;  %v556_v55 = vrot.slane %v250_v36, 4 }
 0x13b   :  { %v557_v6 = vrot.slane %v251_v58, 2  ;;  %v1963_v9 = vsel %vm765_vm1, %v4602_v39, 0.0  ;;  %v1962_v63 = vadd.f32 %v1961_v18, %v1960_v57  ;;  %v1965_v2 = vsel %vm765_vm1, %v4604_v37, 0.0 }
 0x13c   :  { %v1967_v62 = vsel %vm765_vm1, %v4606_v13, 0.0  ;;  %v1091_v50 = vmul.f32 %v791_v43, %v50_v0  ;;  %v255_v37 = vperm.slane %v4633_v17, 3  ;;  %v257_v52 = vperm.slane %v4633_v17, 5 }
 0x13d   :  { %v1964_v39 = vadd.f32 %v1963_v9, %v1962_v63  ;;  %v792_v53 = vsel %vm765_vm1, %v244_v38, %v552_v32  ;;  %v793_v41 = vsel %vm767_vm2, %v553_v30, %v554_v49  ;;  %v1969_v28 = vsel %vm765_vm1, %v1255_v42, 0.0  ;;  %v52_v49 = vld [vmem:[#allocation3 + $0x48] sm:$0xff] }
 0x13e   :  { %v258_v63 = vperm.slane %v4633_v17, 6  ;;  %v795_v18 = vsel %vm765_vm1, %v248_v19, %v555_v35  ;;  %v796_v0 = vsel %vm767_vm2, %v556_v55, %v557_v6  ;;  %v259_v57 = vperm.slane %v4633_v17, 7 }
 0x13f   :  { %v1966_v13 = vadd.f32 %v1965_v2, %v1964_v39  ;;  %v1971_v9 = vsel %vm765_vm1, %v4627_v56, 0.0  ;;  %v252_v38 = vperm.slane %v4633_v17, 0  ;;  %v256_v32 = vperm.slane %v4633_v17, 4 }
 0x140   :  { %v4668_v8 = vld.sshfl [vmem:[#allocation1] sm:$0xff pattern:$0x73625140]  ;;  %v4670_v44 = vld.sshfl [vmem:[#allocation1 + $0x8] sm:$0xff pattern:$0x73625140]  ;;  %v794_v30 = vsel %vm769_vm3, %v792_v53, %v793_v41  ;;  %v797_v19 = vsel %vm769_vm3, %v795_v18, %v796_v0 }
 0x141   :  { %v4672_v7 = vld.sshfl [vmem:[#allocation1 + $0x10] sm:$0xff pattern:$0x73625140]  ;;  %v4674_v25 = vld.sshfl [vmem:[#allocation1 + $0x18] sm:$0xff pattern:$0x73625140]  ;;  %v1968_v43 = vadd.f32 %v1967_v62, %v1966_v13  ;;  %v1093_v41 = vmul.f32 %v797_v19, %v52_v49 }
 0x142   :  { %v4676_v58 = vld.sshfl [vmem:[#allocation1 + $0x20] sm:$0xff pattern:$0x73625140]  ;;  %v4678_v14 = vld.sshfl [vmem:[#allocation1 + $0x28] sm:$0xff pattern:$0x73625140] }
 0x143   :  { %v4680_v36 = vld.sshfl [vmem:[#allocation1 + $0x30] sm:$0xff pattern:$0x73625140]  ;;  %v4683_v48 = vld.sshfl [vmem:[#allocation1 + $0x38] sm:$0xff pattern:$0x73625140]  ;;  %v1970_v42 = vadd.f32 %v1969_v28, %v1968_v43 }
 0x144   :  { %1273 = vst [vmem:[#allocation1] ss:$4 sm:$0xff] %v1090_v22  ;;  %v51_v22 = vld [vmem:[#allocation3 + $0x40] sm:$0xff]  ;;  %v558_v2 = vrot.slane %v253_v61, 6  ;;  %v1973_v35 = vsel %vm765_vm1, %v4629_v59, 0.0  ;;  %v560_v55 = vrot.slane %v255_v37, 2 }
 0x145   :  { %1274 = vst [vmem:[#allocation1 + $0x20] ss:$4 sm:$0xff] %v1091_v50  ;;  %v559_v50 = vrot.slane %v254_v45, 4  ;;  %v561_v6 = vrot.slane %v257_v52, 6  ;;  %v562_v62 = vrot.slane %v258_v63, 4  ;;  %v1972_v56 = vadd.f32 %v1971_v9, %v1970_v42  ;;  %v53_v19 = vld [vmem:[#allocation3 + $0x50] sm:$0xff] }
 0x146   :  { %v563_v39 = vrot.slane %v259_v57, 2  ;;  %v1092_v13 = vmul.f32 %v794_v30, %v51_v22  ;;  %v1975_v17 = vsel %vm765_vm1, %v4631_v54, 0.0  ;;  %v1977_v53 = vsel %vm765_vm1, %v4635_v46, 0.0 }
 0x147   :  { %v1974_v59 = vadd.f32 %v1973_v35, %v1972_v56  ;;  %v1979_v46 = vsel %vm765_vm1, %v4637_v24, 0.0  ;;  %v798_v43 = vsel %vm765_vm1, %v252_v38, %v558_v2  ;;  %v799_v57 = vsel %vm767_vm2, %v559_v50, %v560_v55  ;;  %v54_v56 = vld [vmem:[#allocation3 + $0x58] sm:$0xff] }
 0x148   :  { %v801_v22 = vsel %vm765_vm1, %v256_v32, %v561_v6  ;;  %v802_v30 = vsel %vm767_vm2, %v562_v62, %v563_v39  ;;  %v1981_v42 = vsel %vm765_vm1, %v4639_v12, 0.0  ;;  %v800_v35 = vsel %vm769_vm3, %v798_v43, %v799_v57  ;;  %v55_v57 = vld [vmem:[#allocation3 + $0x60] sm:$0xff] }
 0x149   :  { %v1976_v54 = vadd.f32 %v1975_v17, %v1974_v59  ;;  %v1983_v24 = vsel %vm765_vm1, %v4641_v40, 0.0  ;;  %v803_v38 = vsel %vm769_vm3, %v801_v22, %v802_v30  ;;  %v1985_v50 = vsel %vm765_vm1, %v4668_v8, 0.0  ;;  %v56_v22 = vld [vmem:[#allocation3 + $0x68] sm:$0xff] }
 0x14a   :  { %v1094_v32 = vmul.f32 %v800_v35, %v53_v19  ;;  %v1987_v6 = vsel %vm765_vm1, %v4670_v44, 0.0  ;;  %v1989_v12 = vsel %vm765_vm1, %v4672_v7, 0.0  ;;  %v1095_v62 = vmul.f32 %v803_v38, %v54_v56 }
 0x14b   :  { %v4705_v61 = vld.sshfl [vmem:[#allocation1] sm:$0xff pattern:$0x73625140]  ;;  %v4707_v45 = vld.sshfl [vmem:[#allocation1 + $0x8] sm:$0xff pattern:$0x73625140]  ;;  %v1978_v9 = vadd.f32 %v1977_v53, %v1976_v54 }
 0x14c   :  { %v4709_v28 = vld.sshfl [vmem:[#allocation1 + $0x10] sm:$0xff pattern:$0x73625140]  ;;  %v4711_v37 = vld.sshfl [vmem:[#allocation1 + $0x18] sm:$0xff pattern:$0x73625140] }
 0x14d   :  { %v4713_v52 = vld.sshfl [vmem:[#allocation1 + $0x20] sm:$0xff pattern:$0x73625140]  ;;  %v4715_v63 = vld.sshfl [vmem:[#allocation1 + $0x28] sm:$0xff pattern:$0x73625140]  ;;  %v1980_v49 = vadd.f32 %v1979_v46, %v1978_v9 }
 0x14e   :  { %v4717_v18 = vld.sshfl [vmem:[#allocation1 + $0x30] sm:$0xff pattern:$0x73625140]  ;;  %v4719_v0 = vld.sshfl [vmem:[#allocation1 + $0x38] sm:$0xff pattern:$0x73625140] }
 0x14f   :  { %1283 = vst [vmem:[#allocation1] ss:$4 sm:$0xff] %v1092_v13  ;;  %v1982_v2 = vadd.f32 %v1981_v42, %v1980_v49  ;;  %v1991_v54 = vsel %vm765_vm1, %v4674_v25, 0.0  ;;  %v1993_v43 = vsel %vm765_vm1, %v4676_v58, 0.0  ;;  %v1995_v30 = vsel %vm765_vm1, %v4678_v14, 0.0 }
 0x150   :  { %1284 = vst [vmem:[#allocation1 + $0x20] ss:$4 sm:$0xff] %v1093_v41  ;;  %v1096_v49 = vmul.f32 %v3922_v16, %v55_v57  ;;  %v1997_v19 = vsel %vm765_vm1, %v4680_v36, 0.0  ;;  %v1999_v35 = vsel %vm765_vm1, %v4683_v48, 0.0  ;;  %v1097_v25 = vmul.f32 %v3935_v11, %v56_v22 }
 0x151   :  { %v1984_v55 = vadd.f32 %v1983_v24, %v1982_v2  ;;  %v2001_v11 = vsel %vm765_vm1, %v4705_v61, 0.0  ;;  %v2009_v61 = vsel %vm765_vm1, %v4713_v52, 0.0  ;;  %v2011_v57 = vsel %vm765_vm1, %v4715_v63, 0.0 }
 0x153   :  { %v1986_v8 = vadd.f32 %v1985_v50, %v1984_v55  ;;  %v2003_v55 = vsel %vm765_vm1, %v4707_v45, 0.0 }
 0x155   :  { %v1988_v7 = vadd.f32 %v1987_v6, %v1986_v8  ;;  %v58_v8 = vld [vmem:[#allocation3 + $0x78] sm:$0xff] }
 0x156   :  { %v4739_v39 = vld.sshfl [vmem:[#allocation1] sm:$0xff pattern:$0x73625140]  ;;  %v4741_v13 = vld.sshfl [vmem:[#allocation1 + $0x8] sm:$0xff pattern:$0x73625140]  ;;  %v1099_v45 = vmul.f32 %v3948_v26, %v58_v8 }
 0x157   :  { %v4743_v40 = vld.sshfl [vmem:[#allocation1 + $0x10] sm:$0xff pattern:$0x73625140]  ;;  %v4745_v17 = vld.sshfl [vmem:[#allocation1 + $0x18] sm:$0xff pattern:$0x73625140]  ;;  %v1990_v46 = vadd.f32 %v1989_v12, %v1988_v7 }
 0x158   :  { %v4747_v53 = vld.sshfl [vmem:[#allocation1 + $0x20] sm:$0xff pattern:$0x73625140]  ;;  %v4749_v41 = vld.sshfl [vmem:[#allocation1 + $0x28] sm:$0xff pattern:$0x73625140] }
 0x159   :  { %v4751_v59 = vld.sshfl [vmem:[#allocation1 + $0x30] sm:$0xff pattern:$0x73625140]  ;;  %v4753_v44 = vld.sshfl [vmem:[#allocation1 + $0x38] sm:$0xff pattern:$0x73625140]  ;;  %v1992_v9 = vadd.f32 %v1991_v54, %v1990_v46 }
 0x15a   :  { %1293 = vst [vmem:[#allocation1] ss:$4 sm:$0xff] %v1094_v32  ;;  %v57_v12 = vld [vmem:[#allocation3 + $0x70] sm:$0xff]  ;;  %v2007_v54 = vsel %vm765_vm1, %v4711_v37, 0.0  ;;  %v2013_v26 = vsel %vm765_vm1, %v4717_v18, 0.0 }
 0x15b   :  { %1294 = vst [vmem:[#allocation1 + $0x20] ss:$4 sm:$0xff] %v1095_v62  ;;  %v1994_v42 = vadd.f32 %v1993_v43, %v1992_v9  ;;  %v2005_v62 = vsel %vm765_vm1, %v4709_v28, 0.0  ;;  %v1098_v46 = vmul.f32 %v3938_v21, %v57_v12  ;;  %v2021_v12 = vsel %vm765_vm1, %v4743_v40, 0.0 }
 0x15d   :  { %v1996_v38 = vadd.f32 %v1995_v30, %v1994_v42 }
 0x15f   :  { %v1998_v36 = vadd.f32 %v1997_v19, %v1996_v38 }
 0x161   :  { %v4767_v24 = vld.sshfl [vmem:[#allocation1] sm:$0xff pattern:$0x73625140]  ;;  %v4769_v58 = vld.sshfl [vmem:[#allocation1 + $0x8] sm:$0xff pattern:$0x73625140]  ;;  %v2000_v48 = vadd.f32 %v1999_v35, %v1998_v36 }
 0x162   :  { %v4771_v56 = vld.sshfl [vmem:[#allocation1 + $0x10] sm:$0xff pattern:$0x73625140]  ;;  %v4773_v2 = vld.sshfl [vmem:[#allocation1 + $0x18] sm:$0xff pattern:$0x73625140] }
 0x163   :  { %v4775_v14 = vld.sshfl [vmem:[#allocation1 + $0x20] sm:$0xff pattern:$0x73625140]  ;;  %v4777_v16 = vld.sshfl [vmem:[#allocation1 + $0x28] sm:$0xff pattern:$0x73625140]  ;;  %v2002_v6 = vadd.f32 %v2001_v11, %v2000_v48 }
 0x164   :  { %v4779_v50 = vld.sshfl [vmem:[#allocation1 + $0x30] sm:$0xff pattern:$0x73625140]  ;;  %v4781_v32 = vld.sshfl [vmem:[#allocation1 + $0x38] sm:$0xff pattern:$0x73625140] }
 0x165   :  { %1303 = vst [vmem:[#allocation1] ss:$4 sm:$0xff] %v1096_v49  ;;  %v2004_v7 = vadd.f32 %v2003_v55, %v2002_v6  ;;  %v2015_v35 = vsel %vm765_vm1, %v4719_v0, 0.0  ;;  %v60_v36 = vld [vmem:[#allocation3 + $0x88] sm:$0xff]  ;;  %v2017_v11 = vsel %vm765_vm1, %v4739_v39, 0.0  ;;  %v2019_v6 = vsel %vm765_vm1, %v4741_v13, 0.0 }
 0x166   :  { %1304 = vst [vmem:[#allocation1 + $0x20] ss:$4 sm:$0xff] %v1097_v25  ;;  %v59_v25 = vld [vmem:[#allocation3 + $0x80] sm:$0xff]  ;;  %v1101_v18 = vmul.f32 %v3975_v29, %v60_v36  ;;  %v2023_v29 = vsel %vm765_vm1, %v4745_v17, 0.0  ;;  %v2031_v17 = vsel %vm765_vm1, %v4753_v44, 0.0 }
 0x167   :  { %v2006_v43 = vadd.f32 %v2005_v62, %v2004_v7  ;;  %v1100_v55 = vmul.f32 %v3962_v34, %v59_v25 }
 0x169   :  { %v2008_v21 = vadd.f32 %v2007_v54, %v2006_v43 }
 0x16b   :  { %v2010_v63 = vadd.f32 %v2009_v61, %v2008_v21  ;;  %v2025_v61 = vsel %vm765_vm1, %v4747_v53, 0.0  ;;  %v2027_v21 = vsel %vm765_vm1, %v4749_v41, 0.0 }
 0x16c   :  { %v4797_v9 = vld.sshfl [vmem:[#allocation1] sm:$0xff pattern:$0x73625140]  ;;  %v4799_v22 = vld.sshfl [vmem:[#allocation1 + $0x8] sm:$0xff pattern:$0x73625140] }
 0x16d   :  { %v4801_v28 = vld.sshfl [vmem:[#allocation1 + $0x10] sm:$0xff pattern:$0x73625140]  ;;  %v4803_v30 = vld.sshfl [vmem:[#allocation1 + $0x18] sm:$0xff pattern:$0x73625140]  ;;  %v2012_v19 = vadd.f32 %v2011_v57, %v2010_v63 }
 0x16e   :  { %v4805_v37 = vld.sshfl [vmem:[#allocation1 + $0x20] sm:$0xff pattern:$0x73625140]  ;;  %v4807_v42 = vld.sshfl [vmem:[#allocation1 + $0x28] sm:$0xff pattern:$0x73625140] }
 0x16f   :  { %v4809_v49 = vld.sshfl [vmem:[#allocation1 + $0x30] sm:$0xff pattern:$0x73625140]  ;;  %v4811_v52 = vld.sshfl [vmem:[#allocation1 + $0x38] sm:$0xff pattern:$0x73625140]  ;;  %v2014_v38 = vadd.f32 %v2013_v26, %v2012_v19 }
 0x170   :  { %1313 = vst [vmem:[#allocation1] ss:$4 sm:$0xff] %v1098_v46  ;;  %v62_v63 = vld [vmem:[#allocation3 + $0x98] sm:$0xff]  ;;  %v2029_v19 = vsel %vm765_vm1, %v4751_v59, 0.0 }
 0x171   :  { %1314 = vst [vmem:[#allocation1 + $0x20] ss:$4 sm:$0xff] %v1099_v45  ;;  %v2016_v48 = vadd.f32 %v2015_v35, %v2014_v38  ;;  %v61_v45 = vld [vmem:[#allocation3 + $0x90] sm:$0xff]  ;;  %v2033_v38 = vsel %vm765_vm1, %v4767_v24, 0.0  ;;  %v1103_v53 = vmul.f32 %v3988_v20, %v62_v63  ;;  %v2035_v20 = vsel %vm765_vm1, %v4769_v58, 0.0 }
 0x172   :  { %v1102_v35 = vmul.f32 %v3978_v10, %v61_v45  ;;  %v2041_v45 = vsel %vm765_vm1, %v4775_v14, 0.0 }
 0x173   :  { %v2018_v7 = vadd.f32 %v2017_v11, %v2016_v48 }
 0x175   :  { %v2020_v13 = vadd.f32 %v2019_v6, %v2018_v7  ;;  %v63_v7 = vld [vmem:[#allocation3 + $0xa0] sm:$0xff] }
 0x177   :  { %v4825_v62 = vld.sshfl [vmem:[#allocation1] sm:$0xff pattern:$0x73625140]  ;;  %v4827_v0 = vld.sshfl [vmem:[#allocation1 + $0x8] sm:$0xff pattern:$0x73625140]  ;;  %v2022_v40 = vadd.f32 %v2021_v12, %v2020_v13 }
 0x178   :  { %v4829_v8 = vld.sshfl [vmem:[#allocation1 + $0x10] sm:$0xff pattern:$0x73625140]  ;;  %v4831_v54 = vld.sshfl [vmem:[#allocation1 + $0x18] sm:$0xff pattern:$0x73625140] }
 0x179   :  { %v4833_v39 = vld.sshfl [vmem:[#allocation1 + $0x20] sm:$0xff pattern:$0x73625140]  ;;  %v4835_v34 = vld.sshfl [vmem:[#allocation1 + $0x28] sm:$0xff pattern:$0x73625140]  ;;  %v2024_v57 = vadd.f32 %v2023_v29, %v2022_v40 }
 0x17a   :  { %v4837_v46 = vld.sshfl [vmem:[#allocation1 + $0x30] sm:$0xff pattern:$0x73625140]  ;;  %v4839_v43 = vld.sshfl [vmem:[#allocation1 + $0x38] sm:$0xff pattern:$0x73625140] }
 0x17b   :  { %1323 = vst [vmem:[#allocation1] ss:$4 sm:$0xff] %v1100_v55  ;;  %v2026_v26 = vadd.f32 %v2025_v61, %v2024_v57  ;;  %v64_v29 = vld [vmem:[#allocation3 + $0xa8] sm:$0xff]  ;;  %v2039_v40 = vsel %vm765_vm1, %v4773_v2, 0.0  ;;  %v1104_v57 = vmul.f32 %v4002_v23, %v63_v7 }
 0x17c   :  { %1324 = vst [vmem:[#allocation1 + $0x20] ss:$4 sm:$0xff] %v1101_v18  ;;  %v2037_v18 = vsel %vm765_vm1, %v4771_v56, 0.0  ;;  %v1105_v58 = vmul.f32 %v4015_v47, %v64_v29  ;;  %v2045_v47 = vsel %vm765_vm1, %v4779_v50, 0.0  ;;  %v2053_v50 = vsel %vm765_vm1, %v4801_v28, 0.0 }
 0x17d   :  { %v2028_v25 = vadd.f32 %v2027_v21, %v2026_v26  ;;  %v2043_v21 = vsel %vm765_vm1, %v4777_v16, 0.0  ;;  %v2055_v29 = vsel %vm765_vm1, %v4803_v30, 0.0 }
 0x17f   :  { %v2030_v10 = vadd.f32 %v2029_v19, %v2028_v25 }
 0x181   :  { %v2032_v24 = vadd.f32 %v2031_v17, %v2030_v10  ;;  %v65_v10 = vld [vmem:[#allocation3 + $0xb0] sm:$0xff] }
 0x182   :  { %v4855_v36 = vld.sshfl [vmem:[#allocation1] sm:$0xff pattern:$0x73625140]  ;;  %v4857_v11 = vld.sshfl [vmem:[#allocation1 + $0x8] sm:$0xff pattern:$0x73625140]  ;;  %v1106_v7 = vmul.f32 %v4018_v5, %v65_v10 }
 0x183   :  { %v4859_v41 = vld.sshfl [vmem:[#allocation1 + $0x10] sm:$0xff pattern:$0x73625140]  ;;  %v4861_v48 = vld.sshfl [vmem:[#allocation1 + $0x18] sm:$0xff pattern:$0x73625140]  ;;  %v2034_v12 = vadd.f32 %v2033_v38, %v2032_v24 }
 0x184   :  { %v4863_v59 = vld.sshfl [vmem:[#allocation1 + $0x20] sm:$0xff pattern:$0x73625140]  ;;  %v4865_v55 = vld.sshfl [vmem:[#allocation1 + $0x28] sm:$0xff pattern:$0x73625140] }
 0x185   :  { %v4867_v6 = vld.sshfl [vmem:[#allocation1 + $0x30] sm:$0xff pattern:$0x73625140]  ;;  %v4869_v44 = vld.sshfl [vmem:[#allocation1 + $0x38] sm:$0xff pattern:$0x73625140]  ;;  %v2036_v13 = vadd.f32 %v2035_v20, %v2034_v12 }
 0x186   :  { %1333 = vst [vmem:[#allocation1] ss:$4 sm:$0xff] %v1102_v35  ;;  %v2047_v38 = vsel %vm765_vm1, %v4781_v32, 0.0  ;;  %v2049_v24 = vsel %vm765_vm1, %v4797_v9, 0.0  ;;  %v66_v20 = vld [vmem:[#allocation3 + $0xb8] sm:$0xff]  ;;  %v6647_v32 = vld [vmem:[#allocation16_spill] sm:$0xff] }
 0x187   :  { %1334 = vst [vmem:[#allocation1 + $0x20] ss:$4 sm:$0xff] %v1103_v53  ;;  %v2038_v61 = vadd.f32 %v2037_v18, %v2036_v13  ;;  %v2051_v18 = vsel %vm765_vm1, %v4799_v22, 0.0  ;;  %v2061_v10 = vsel %vm765_vm1, %v4809_v49, 0.0 }
 0x189   :  { %v2040_v19 = vadd.f32 %v2039_v40, %v2038_v61  ;;  %v1107_v40 = vmul.f32 %v6647_v32, %v66_v20 }
 0x18b   :  { %v2042_v14 = vadd.f32 %v2041_v45, %v2040_v19  ;;  %v2057_v19 = vsel %vm765_vm1, %v4805_v37, 0.0 }
 0x18d   :  { %v4883_v63 = vld.sshfl [vmem:[#allocation1] sm:$0xff pattern:$0x73625140]  ;;  %v4885_v56 = vld.sshfl [vmem:[#allocation1 + $0x8] sm:$0xff pattern:$0x73625140]  ;;  %v2044_v16 = vadd.f32 %v2043_v21, %v2042_v14 }
 0x18e   :  { %v4887_v26 = vld.sshfl [vmem:[#allocation1 + $0x10] sm:$0xff pattern:$0x73625140]  ;;  %v4889_v35 = vld.sshfl [vmem:[#allocation1 + $0x18] sm:$0xff pattern:$0x73625140] }
 0x18f   :  { %v4891_v2 = vld.sshfl [vmem:[#allocation1 + $0x20] sm:$0xff pattern:$0x73625140]  ;;  %v4893_v23 = vld.sshfl [vmem:[#allocation1 + $0x28] sm:$0xff pattern:$0x73625140]  ;;  %v2046_v53 = vadd.f32 %v2045_v47, %v2044_v16 }
 0x190   :  { %v4895_v25 = vld.sshfl [vmem:[#allocation1 + $0x30] sm:$0xff pattern:$0x73625140]  ;;  %v4897_v17 = vld.sshfl [vmem:[#allocation1 + $0x38] sm:$0xff pattern:$0x73625140] }
 0x191   :  { %1343 = vst [vmem:[#allocation1] ss:$4 sm:$0xff] %v1104_v57  ;;  %v2048_v12 = vadd.f32 %v2047_v38, %v2046_v53  ;;  %v2059_v47 = vsel %vm765_vm1, %v4807_v42, 0.0  ;;  %v67_v16 = vld [vmem:[#allocation3 + $0xc0] sm:$0xff]  ;;  %v68_v53 = vld [vmem:[#allocation3 + $0xc8] sm:$0xff] }
 0x192   :  { %1344 = vst [vmem:[#allocation1 + $0x20] ss:$4 sm:$0xff] %v1105_v58  ;;  %v1108_v20 = vmul.f32 %v4042_v31, %v67_v16  ;;  %v1109_v37 = vmul.f32 %v4055_v1, %v68_v53  ;;  %v2067_v1 = vsel %vm765_vm1, %v4827_v0, 0.0  ;;  %v6648_v53 = vld [vmem:[#allocation18_spill] sm:$0xff]  ;;  %v2075_v0 = vsel %vm765_vm1, %v4835_v34, 0.0 }
 0x193   :  { %v2050_v13 = vadd.f32 %v2049_v24, %v2048_v12  ;;  %v2063_v12 = vsel %vm765_vm1, %v4811_v52, 0.0 }
 0x195   :  { %v2052_v5 = vadd.f32 %v2051_v18, %v2050_v13  ;;  %v2065_v18 = vsel %vm765_vm1, %v4825_v62, 0.0 }
 0x197   :  { %v2054_v30 = vadd.f32 %v2053_v50, %v2052_v5  ;;  %v2069_v5 = vsel %vm765_vm1, %v4829_v8, 0.0  ;;  %v6649_v8 = vld [vmem:[#allocation17_spill] sm:$0xff] }
 0x198   :  { %v4913_v61 = vld.sshfl [vmem:[#allocation1] sm:$0xff pattern:$0x73625140]  ;;  %v4915_v57 = vld.sshfl [vmem:[#allocation1 + $0x8] sm:$0xff pattern:$0x73625140] }
 0x199   :  { %v4917_v9 = vld.sshfl [vmem:[#allocation1 + $0x10] sm:$0xff pattern:$0x73625140]  ;;  %v4919_v45 = vld.sshfl [vmem:[#allocation1 + $0x18] sm:$0xff pattern:$0x73625140]  ;;  %v2056_v14 = vadd.f32 %v2055_v29, %v2054_v30 }
 0x19a   :  { %v4921_v22 = vld.sshfl [vmem:[#allocation1 + $0x20] sm:$0xff pattern:$0x73625140]  ;;  %v4923_v21 = vld.sshfl [vmem:[#allocation1 + $0x28] sm:$0xff pattern:$0x73625140] }
 0x19b   :  { %v4925_v58 = vld.sshfl [vmem:[#allocation1 + $0x30] sm:$0xff pattern:$0x73625140]  ;;  %v4927_v28 = vld.sshfl [vmem:[#allocation1 + $0x38] sm:$0xff pattern:$0x73625140]  ;;  %v2058_v38 = vadd.f32 %v2057_v19, %v2056_v14 }
 0x19c   :  { %1353 = vst [vmem:[#allocation1] ss:$4 sm:$0xff] %v1106_v7  ;;  %v69_v19 = vld [vmem:[#allocation3 + $0xd0] sm:$0xff]  ;;  %v2071_v14 = vsel %vm765_vm1, %v4831_v54, 0.0 }
 0x19d   :  { %1354 = vst [vmem:[#allocation1 + $0x20] ss:$4 sm:$0xff] %v1107_v40  ;;  %v2060_v24 = vadd.f32 %v2059_v47, %v2058_v38  ;;  %v70_v47 = vld [vmem:[#allocation3 + $0xd8] sm:$0xff]  ;;  %v2073_v38 = vsel %vm765_vm1, %v4833_v39, 0.0 }
 0x19f   :  { %v2062_v50 = vadd.f32 %v2061_v10, %v2060_v24  ;;  %v1110_v10 = vmul.f32 %v6648_v53, %v69_v19  ;;  %v2081_v19 = vsel %vm765_vm1, %v4855_v36, 0.0 }
 0x1a1   :  { %v2064_v52 = vadd.f32 %v2063_v12, %v2062_v50  ;;  %v1111_v12 = vmul.f32 %v6649_v8, %v70_v47 }
 0x1a3   :  { %v4941_v7 = vld.sshfl [vmem:[#allocation1] sm:$0xff pattern:$0x73625140]  ;;  %v4943_v42 = vld.sshfl [vmem:[#allocation1 + $0x8] sm:$0xff pattern:$0x73625140]  ;;  %v2066_v62 = vadd.f32 %v2065_v18, %v2064_v52 }
 0x1a4   :  { %v4945_v13 = vld.sshfl [vmem:[#allocation1 + $0x10] sm:$0xff pattern:$0x73625140]  ;;  %v4947_v29 = vld.sshfl [vmem:[#allocation1 + $0x18] sm:$0xff pattern:$0x73625140] }
 0x1a5   :  { %v4949_v49 = vld.sshfl [vmem:[#allocation1 + $0x20] sm:$0xff pattern:$0x73625140]  ;;  %v4951_v31 = vld.sshfl [vmem:[#allocation1 + $0x28] sm:$0xff pattern:$0x73625140]  ;;  %v2068_v30 = vadd.f32 %v2067_v1, %v2066_v62 }
 0x1a6   :  { %v4953_v32 = vld.sshfl [vmem:[#allocation1 + $0x30] sm:$0xff pattern:$0x73625140]  ;;  %v4955_v40 = vld.sshfl [vmem:[#allocation1 + $0x38] sm:$0xff pattern:$0x73625140] }
 0x1a7   :  { %1363 = vst [vmem:[#allocation1] ss:$4 sm:$0xff] %v1108_v20  ;;  %v2070_v16 = vadd.f32 %v2069_v5, %v2068_v30  ;;  %v2077_v20 = vsel %vm765_vm1, %v4837_v46, 0.0  ;;  %v2079_v5 = vsel %vm765_vm1, %v4839_v43, 0.0 }
 0x1a8   :  { %1364 = vst [vmem:[#allocation1 + $0x20] ss:$4 sm:$0xff] %v1109_v37 }
 0x1a9   :  { %v2072_v24 = vadd.f32 %v2071_v14, %v2070_v16  ;;  %v71_v14 = vld [vmem:[#allocation3 + $0xe0] sm:$0xff]  ;;  %v72_v16 = vld [vmem:[#allocation3 + $0xe8] sm:$0xff] }
 0x1aa   :  { %v1113_v43 = vmul.f32 %v4095_v51, %v72_v16  ;;  %v2089_v51 = vsel %vm765_vm1, %v4863_v59, 0.0  ;;  %v74_v16 = vld [vmem:[#allocation3 + $0xf8] sm:$0xff]  ;;  %v2097_v59 = vsel %vm765_vm1, %v4883_v63, 0.0 }
 0x1ab   :  { %v2074_v52 = vadd.f32 %v2073_v38, %v2072_v24  ;;  %v2083_v38 = vsel %vm765_vm1, %v4857_v11, 0.0  ;;  %v1112_v24 = vmul.f32 %v4082_v15, %v71_v14  ;;  %v73_v14 = vld [vmem:[#allocation3 + $0xf0] sm:$0xff] }
 0x1ad   :  { %v2076_v46 = vadd.f32 %v2075_v0, %v2074_v52  ;;  %v2087_v0 = vsel %vm765_vm1, %v4861_v48, 0.0 }
 0x1ae   :  { %v4971_v18 = vld.sshfl [vmem:[#allocation1] sm:$0xff pattern:$0x73625140]  ;;  %v4973_v37 = vld.sshfl [vmem:[#allocation1 + $0x8] sm:$0xff pattern:$0x73625140] }
 0x1af   :  { %v4975_v54 = vld.sshfl [vmem:[#allocation1 + $0x10] sm:$0xff pattern:$0x73625140]  ;;  %v4977_v50 = vld.sshfl [vmem:[#allocation1 + $0x18] sm:$0xff pattern:$0x73625140]  ;;  %v2078_v30 = vadd.f32 %v2077_v20, %v2076_v46 }
 0x1b0   :  { %v4979_v39 = vld.sshfl [vmem:[#allocation1 + $0x20] sm:$0xff pattern:$0x73625140]  ;;  %v4981_v1 = vld.sshfl [vmem:[#allocation1 + $0x28] sm:$0xff pattern:$0x73625140] }
 0x1b1   :  { %v4983_v62 = vld.sshfl [vmem:[#allocation1 + $0x30] sm:$0xff pattern:$0x73625140]  ;;  %v4985_v34 = vld.sshfl [vmem:[#allocation1 + $0x38] sm:$0xff pattern:$0x73625140]  ;;  %v2080_v47 = vadd.f32 %v2079_v5, %v2078_v30 }
 0x1b2   :  { %1373 = vst [vmem:[#allocation1] ss:$4 sm:$0xff] %v1110_v10  ;;  %v2085_v10 = vsel %vm765_vm1, %v4859_v41, 0.0  ;;  %v2091_v30 = vsel %vm765_vm1, %v4865_v55, 0.0  ;;  %v6651_v55 = vld [vmem:[#allocation21_spill] sm:$0xff] }
 0x1b3   :  { %1374 = vst [vmem:[#allocation1 + $0x20] ss:$4 sm:$0xff] %v1111_v12  ;;  %v2082_v53 = vadd.f32 %v2081_v19, %v2080_v47  ;;  %v2093_v47 = vsel %vm765_vm1, %v4867_v6, 0.0 }
 0x1b5   :  { %v2084_v12 = vadd.f32 %v2083_v38, %v2082_v53  ;;  %v2095_v53 = vsel %vm765_vm1, %v4869_v44, 0.0 }
 0x1b7   :  { %v2086_v41 = vadd.f32 %v2085_v10, %v2084_v12  ;;  %v6650_v10 = vld [vmem:[#allocation19_spill] sm:$0xff] }
 0x1b9   :  { %v4999_v20 = vld.sshfl [vmem:[#allocation1] sm:$0xff pattern:$0x73625140]  ;;  %v5001_v36 = vld.sshfl [vmem:[#allocation1 + $0x8] sm:$0xff pattern:$0x73625140]  ;;  %v2088_v48 = vadd.f32 %v2087_v0, %v2086_v41 }
 0x1ba   :  { %v5003_v8 = vld.sshfl [vmem:[#allocation1 + $0x10] sm:$0xff pattern:$0x73625140]  ;;  %v5005_v52 = vld.sshfl [vmem:[#allocation1 + $0x18] sm:$0xff pattern:$0x73625140] }
 0x1bb   :  { %v5007_v11 = vld.sshfl [vmem:[#allocation1 + $0x20] sm:$0xff pattern:$0x73625140]  ;;  %v5009_v15 = vld.sshfl [vmem:[#allocation1 + $0x28] sm:$0xff pattern:$0x73625140]  ;;  %v2090_v19 = vadd.f32 %v2089_v51, %v2088_v48 }
 0x1bc   :  { %v5011_v46 = vld.sshfl [vmem:[#allocation1 + $0x30] sm:$0xff pattern:$0x73625140]  ;;  %v5013_v5 = vld.sshfl [vmem:[#allocation1 + $0x38] sm:$0xff pattern:$0x73625140] }
 0x1bd   :  { %1383 = vst [vmem:[#allocation1] ss:$4 sm:$0xff] %v1112_v24  ;;  %v2092_v38 = vadd.f32 %v2091_v30, %v2090_v19  ;;  %v1114_v24 = vmul.f32 %v6650_v10, %v73_v14  ;;  %v2099_v0 = vsel %vm765_vm1, %v4885_v56, 0.0  ;;  %v75_v10 = vld [vmem:[#allocation3 + $0x100] sm:$0xff] }
 0x1be   :  { %1384 = vst [vmem:[#allocation1 + $0x20] ss:$4 sm:$0xff] %v1113_v43  ;;  %v1115_v43 = vmul.f32 %v6651_v55, %v74_v16 }
 0x1bf   :  { %v2094_v12 = vadd.f32 %v2093_v47, %v2092_v38  ;;  %v2101_v47 = vsel %vm765_vm1, %v4887_v26, 0.0  ;;  %v2103_v38 = vsel %vm765_vm1, %v4889_v35, 0.0 }
 0x1c1   :  { %v2096_v30 = vadd.f32 %v2095_v53, %v2094_v12  ;;  %v2105_v53 = vsel %vm765_vm1, %v4891_v2, 0.0 }
 0x1c3   :  { %v2098_v56 = vadd.f32 %v2097_v59, %v2096_v30  ;;  %v2109_v59 = vsel %vm765_vm1, %v4895_v25, 0.0 }
 0x1c4   :  { %v5029_v41 = vld.sshfl [vmem:[#allocation1] sm:$0xff pattern:$0x73625140]  ;;  %v5031_v51 = vld.sshfl [vmem:[#allocation1 + $0x8] sm:$0xff pattern:$0x73625140] }
 0x1c5   :  { %v5033_v6 = vld.sshfl [vmem:[#allocation1 + $0x10] sm:$0xff pattern:$0x73625140]  ;;  %v5035_v48 = vld.sshfl [vmem:[#allocation1 + $0x18] sm:$0xff pattern:$0x73625140]  ;;  %v2100_v16 = vadd.f32 %v2099_v0, %v2098_v56 }
 0x1c6   :  { %v5037_v44 = vld.sshfl [vmem:[#allocation1 + $0x20] sm:$0xff pattern:$0x73625140]  ;;  %v5039_v19 = vld.sshfl [vmem:[#allocation1 + $0x28] sm:$0xff pattern:$0x73625140] }
 0x1c7   :  { %6652 = vst [vmem:[#allocation62_spill] sm:$0xff] %v5037_v44  ;;  %v5041_v14 = vld.sshfl [vmem:[#allocation1 + $0x30] sm:$0xff pattern:$0x73625140]  ;;  %v2102_v55 = vadd.f32 %v2101_v47, %v2100_v16 }
 0x1c8   :  { %6653 = vst [vmem:[#allocation64_spill] sm:$0xff] %v5041_v14  ;;  %v5043_v63 = vld.sshfl [vmem:[#allocation1 + $0x38] sm:$0xff pattern:$0x73625140]  ;;  %v76_v44 = vld [vmem:[#allocation3 + $0x108] sm:$0xff]  ;;  %v1116_v14 = vmul.f32 %v4122_v4, %v75_v10 }
 0x1c9   :  { %1393 = vst [vmem:[#allocation1] ss:$4 sm:$0xff] %v1114_v24  ;;  %v2104_v12 = vadd.f32 %v2103_v38, %v2102_v55  ;;  %v2107_v24 = vsel %vm765_vm1, %v4893_v23, 0.0  ;;  %v1117_v26 = vmul.f32 %v4135_v60, %v76_v44  ;;  %v2111_v60 = vsel %vm765_vm1, %v4897_v17, 0.0  ;;  %v77_v10 = vld [vmem:[#allocation3 + $0x110] sm:$0xff] }
 0x1ca   :  { %1394 = vst [vmem:[#allocation1 + $0x20] ss:$4 sm:$0xff] %v1115_v43  ;;  %v2113_v44 = vsel %vm765_vm1, %v4913_v61, 0.0  ;;  %v2115_v55 = vsel %vm765_vm1, %v4915_v57, 0.0  ;;  %v2119_v17 = vsel %vm765_vm1, %v4919_v45, 0.0  ;;  %v6656_v61 = vld [vmem:[#allocation22_spill] sm:$0xff] }
 0x1cb   :  { %v2106_v30 = vadd.f32 %v2105_v53, %v2104_v12  ;;  %v78_v53 = vld [vmem:[#allocation3 + $0x118] sm:$0xff] }
 0x1cd   :  { %v2108_v23 = vadd.f32 %v2107_v24, %v2106_v30  ;;  %v2117_v24 = vsel %vm765_vm1, %v4917_v9, 0.0  ;;  %v6655_v30 = vld [vmem:[#allocation20_spill] sm:$0xff] }
 0x1cf   :  { %v2110_v25 = vadd.f32 %v2109_v59, %v2108_v23  ;;  %v2121_v59 = vsel %vm765_vm1, %v4921_v22, 0.0 }
 0x1d0   :  { %v5057_v0 = vld.sshfl [vmem:[#allocation1] sm:$0xff pattern:$0x73625140]  ;;  %v5059_v35 = vld.sshfl [vmem:[#allocation1 + $0x8] sm:$0xff pattern:$0x73625140] }
 0x1d1   :  { %v5061_v43 = vld.sshfl [vmem:[#allocation1 + $0x10] sm:$0xff pattern:$0x73625140]  ;;  %v5063_v56 = vld.sshfl [vmem:[#allocation1 + $0x18] sm:$0xff pattern:$0x73625140]  ;;  %v2112_v38 = vadd.f32 %v2111_v60, %v2110_v25 }
 0x1d2   :  { %v5065_v2 = vld.sshfl [vmem:[#allocation1 + $0x20] sm:$0xff pattern:$0x73625140]  ;;  %v5067_v4 = vld.sshfl [vmem:[#allocation1 + $0x28] sm:$0xff pattern:$0x73625140] }
 0x1d3   :  { %v5069_v47 = vld.sshfl [vmem:[#allocation1 + $0x30] sm:$0xff pattern:$0x73625140]  ;;  %v5071_v16 = vld.sshfl [vmem:[#allocation1 + $0x38] sm:$0xff pattern:$0x73625140]  ;;  %v2114_v12 = vadd.f32 %v2113_v44, %v2112_v38 }
 0x1d4   :  { %6654 = vst [vmem:[#allocation66_spill] sm:$0xff] %v5071_v16 }
 0x1d5   :  { %1403 = vst [vmem:[#allocation1] ss:$4 sm:$0xff] %v1116_v14  ;;  %v1118_v14 = vmul.f32 %v6655_v30, %v77_v10  ;;  %v2116_v16 = vadd.f32 %v2115_v55, %v2114_v12  ;;  %v2123_v55 = vsel %vm765_vm1, %v4923_v21, 0.0  ;;  %v2125_v12 = vsel %vm765_vm1, %v4925_v58, 0.0  ;;  %v79_v30 = vld [vmem:[#allocation3 + $0x120] sm:$0xff] }
 0x1d6   :  { %1404 = vst [vmem:[#allocation1 + $0x20] ss:$4 sm:$0xff] %v1117_v26  ;;  %v1119_v26 = vmul.f32 %v6656_v61, %v78_v53 }
 0x1d7   :  { %v2118_v44 = vadd.f32 %v2117_v24, %v2116_v16  ;;  %v2127_v16 = vsel %vm765_vm1, %v4927_v28, 0.0 }
 0x1d9   :  { %v2120_v22 = vadd.f32 %v2119_v17, %v2118_v44  ;;  %v2131_v17 = vsel %vm765_vm1, %v4943_v42, 0.0 }
 0x1db   :  { %v2122_v53 = vadd.f32 %v2121_v59, %v2120_v22 }
 0x1dc   :  { %v5087_v23 = vld.sshfl [vmem:[#allocation1] sm:$0xff pattern:$0x73625140]  ;;  %v5089_v60 = vld.sshfl [vmem:[#allocation1 + $0x8] sm:$0xff pattern:$0x73625140] }
 0x1dd   :  { %v5091_v57 = vld.sshfl [vmem:[#allocation1 + $0x10] sm:$0xff pattern:$0x73625140]  ;;  %v5093_v25 = vld.sshfl [vmem:[#allocation1 + $0x18] sm:$0xff pattern:$0x73625140]  ;;  %v2124_v61 = vadd.f32 %v2123_v55, %v2122_v53 }
 0x1de   :  { %v5095_v9 = vld.sshfl [vmem:[#allocation1 + $0x20] sm:$0xff pattern:$0x73625140]  ;;  %v5097_v38 = vld.sshfl [vmem:[#allocation1 + $0x28] sm:$0xff pattern:$0x73625140] }
 0x1df   :  { %6657 = vst [vmem:[#allocation65_spill] sm:$0xff] %v5095_v9  ;;  %v5099_v10 = vld.sshfl [vmem:[#allocation1 + $0x30] sm:$0xff pattern:$0x73625140]  ;;  %v2126_v24 = vadd.f32 %v2125_v12, %v2124_v61  ;;  %v2137_v61 = vsel %vm765_vm1, %v4949_v49, 0.0 }
 0x1e0   :  { %6658 = vst [vmem:[#allocation67_spill] sm:$0xff] %v5099_v10  ;;  %v5101_v45 = vld.sshfl [vmem:[#allocation1 + $0x38] sm:$0xff pattern:$0x73625140]  ;;  %v80_v9 = vld [vmem:[#allocation3 + $0x128] sm:$0xff]  ;;  %v1120_v10 = vmul.f32 %v4162_v27, %v79_v30 }
 0x1e1   :  { %1413 = vst [vmem:[#allocation1] ss:$4 sm:$0xff] %v1118_v14  ;;  %v2129_v14 = vsel %vm765_vm1, %v4941_v7, 0.0  ;;  %v1121_v21 = vmul.f32 %v4175_v3, %v80_v9  ;;  %v2128_v44 = vadd.f32 %v2127_v16, %v2126_v24  ;;  %v2133_v3 = vsel %vm765_vm1, %v4945_v13, 0.0  ;;  %v81_v30 = vld [vmem:[#allocation3 + $0x130] sm:$0xff]  ;;  %v82_v16 = vld [vmem:[#allocation3 + $0x138] sm:$0xff] }
 0x1e2   :  { %1414 = vst [vmem:[#allocation1 + $0x20] ss:$4 sm:$0xff] %v1119_v26  ;;  %v2135_v9 = vsel %vm765_vm1, %v4947_v29, 0.0  ;;  %v2141_v13 = vsel %vm765_vm1, %v4953_v32, 0.0  ;;  %v6661_v29 = vld [vmem:[#allocation23_spill] sm:$0xff] }
 0x1e3   :  { %v2130_v7 = vadd.f32 %v2129_v14, %v2128_v44  ;;  %v2139_v14 = vsel %vm765_vm1, %v4951_v31, 0.0  ;;  %v6660_v44 = vld [vmem:[#allocation24_spill] sm:$0xff] }
 0x1e5   :  { %v2132_v42 = vadd.f32 %v2131_v17, %v2130_v7  ;;  %v2143_v17 = vsel %vm765_vm1, %v4955_v40, 0.0 }
 0x1e7   :  { %v2134_v12 = vadd.f32 %v2133_v3, %v2132_v42 }
 0x1e8   :  { %v5115_v59 = vld.sshfl [vmem:[#allocation1] sm:$0xff pattern:$0x73625140]  ;;  %v5117_v58 = vld.sshfl [vmem:[#allocation1 + $0x8] sm:$0xff pattern:$0x73625140] }
 0x1e9   :  { %v5119_v26 = vld.sshfl [vmem:[#allocation1 + $0x10] sm:$0xff pattern:$0x73625140]  ;;  %v5121_v22 = vld.sshfl [vmem:[#allocation1 + $0x18] sm:$0xff pattern:$0x73625140]  ;;  %v2136_v24 = vadd.f32 %v2135_v9, %v2134_v12 }
 0x1ea   :  { %v5123_v28 = vld.sshfl [vmem:[#allocation1 + $0x20] sm:$0xff pattern:$0x73625140]  ;;  %v5125_v27 = vld.sshfl [vmem:[#allocation1 + $0x28] sm:$0xff pattern:$0x73625140] }
 0x1eb   :  { %v5127_v55 = vld.sshfl [vmem:[#allocation1 + $0x30] sm:$0xff pattern:$0x73625140]  ;;  %v5129_v53 = vld.sshfl [vmem:[#allocation1 + $0x38] sm:$0xff pattern:$0x73625140] }
 0x1ec   :  { %6659 = vst [vmem:[#allocation69_spill] sm:$0xff] %v5129_v53  ;;  %v2138_v53 = vadd.f32 %v2137_v61, %v2136_v24  ;;  %v2145_v61 = vsel %vm765_vm1, %v4971_v18, 0.0  ;;  %v2147_v24 = vsel %vm765_vm1, %v4973_v37, 0.0  ;;  %v6664_v18 = vld [vmem:[#allocation25_spill] sm:$0xff] }
 0x1ed   :  { %1423 = vst [vmem:[#allocation1] ss:$4 sm:$0xff] %v1120_v10  ;;  %v1122_v10 = vmul.f32 %v6660_v44, %v81_v30  ;;  %v83_v44 = vld [vmem:[#allocation3 + $0x140] sm:$0xff] }
 0x1ee   :  { %1424 = vst [vmem:[#allocation1 + $0x20] ss:$4 sm:$0xff] %v1121_v21  ;;  %v1123_v21 = vmul.f32 %v6661_v29, %v82_v16  ;;  %v2140_v9 = vadd.f32 %v2139_v14, %v2138_v53  ;;  %v2149_v53 = vsel %vm765_vm1, %v4975_v54, 0.0 }
 0x1f0   :  { %v2142_v40 = vadd.f32 %v2141_v13, %v2140_v9  ;;  %v2153_v13 = vsel %vm765_vm1, %v4979_v39, 0.0  ;;  %v2155_v39 = vsel %vm765_vm1, %v4981_v1, 0.0  ;;  %v2163_v1 = vsel %vm765_vm1, %v5001_v36, 0.0 }
 0x1f2   :  { %v2144_v16 = vadd.f32 %v2143_v17, %v2142_v40 }
 0x1f4   :  { %v5145_v7 = vld.sshfl [vmem:[#allocation1] sm:$0xff pattern:$0x73625140]  ;;  %v5147_v3 = vld.sshfl [vmem:[#allocation1 + $0x8] sm:$0xff pattern:$0x73625140]  ;;  %v2146_v29 = vadd.f32 %v2145_v61, %v2144_v16 }
 0x1f5   :  { %v5149_v49 = vld.sshfl [vmem:[#allocation1 + $0x10] sm:$0xff pattern:$0x73625140]  ;;  %v5151_v42 = vld.sshfl [vmem:[#allocation1 + $0x18] sm:$0xff pattern:$0x73625140] }
 0x1f6   :  { %v5153_v31 = vld.sshfl [vmem:[#allocation1 + $0x20] sm:$0xff pattern:$0x73625140]  ;;  %v5155_v12 = vld.sshfl [vmem:[#allocation1 + $0x28] sm:$0xff pattern:$0x73625140]  ;;  %v2148_v14 = vadd.f32 %v2147_v24, %v2146_v29 }
 0x1f7   :  { %6662 = vst [vmem:[#allocation68_spill] sm:$0xff] %v5153_v31  ;;  %v5157_v30 = vld.sshfl [vmem:[#allocation1 + $0x30] sm:$0xff pattern:$0x73625140] }
 0x1f8   :  { %6663 = vst [vmem:[#allocation70_spill] sm:$0xff] %v5157_v30  ;;  %v5159_v32 = vld.sshfl [vmem:[#allocation1 + $0x38] sm:$0xff pattern:$0x73625140]  ;;  %v84_v31 = vld [vmem:[#allocation3 + $0x148] sm:$0xff]  ;;  %v1124_v30 = vmul.f32 %v4202_v33, %v83_v44  ;;  %v2150_v40 = vadd.f32 %v2149_v53, %v2148_v14  ;;  %v2157_v44 = vsel %vm765_vm1, %v4983_v62, 0.0 }
 0x1f9   :  { %1433 = vst [vmem:[#allocation1] ss:$4 sm:$0xff] %v1122_v10  ;;  %v2151_v10 = vsel %vm765_vm1, %v4977_v50, 0.0  ;;  %v1125_v17 = vmul.f32 %v6664_v18, %v84_v31  ;;  %v85_v53 = vld [vmem:[#allocation3 + $0x150] sm:$0xff]  ;;  %v2159_v14 = vsel %vm765_vm1, %v4985_v34, 0.0  ;;  %v86_v18 = vld [vmem:[#allocation3 + $0x158] sm:$0xff] }
 0x1fa   :  { %1434 = vst [vmem:[#allocation1 + $0x20] ss:$4 sm:$0xff] %v1123_v21  ;;  %v2152_v50 = vadd.f32 %v2151_v10, %v2150_v40  ;;  %v2161_v10 = vsel %vm765_vm1, %v4999_v20, 0.0  ;;  %v6667_v40 = vld [vmem:[#allocation27_spill] sm:$0xff]  ;;  %v6668_v62 = vld [vmem:[#allocation26_spill] sm:$0xff] }
 0x1fc   :  { %v2154_v31 = vadd.f32 %v2153_v13, %v2152_v50  ;;  %v2165_v13 = vsel %vm765_vm1, %v5003_v8, 0.0 }
 0x1fe   :  { %v2156_v29 = vadd.f32 %v2155_v39, %v2154_v31 }
 0x200   :  { %v5173_v21 = vld.sshfl [vmem:[#allocation1] sm:$0xff pattern:$0x73625140]  ;;  %v5175_v37 = vld.sshfl [vmem:[#allocation1 + $0x8] sm:$0xff pattern:$0x73625140] }
 0x201   :  { %v5177_v9 = vld.sshfl [vmem:[#allocation1 + $0x10] sm:$0xff pattern:$0x73625140]  ;;  %v5179_v61 = vld.sshfl [vmem:[#allocation1 + $0x18] sm:$0xff pattern:$0x73625140] }
 0x202   :  { %v5181_v54 = vld.sshfl [vmem:[#allocation1 + $0x20] sm:$0xff pattern:$0x73625140]  ;;  %v5183_v33 = vld.sshfl [vmem:[#allocation1 + $0x28] sm:$0xff pattern:$0x73625140] }
 0x203   :  { %6665 = vst [vmem:[#allocation72_spill] sm:$0xff] %v5183_v33  ;;  %v5185_v16 = vld.sshfl [vmem:[#allocation1 + $0x30] sm:$0xff pattern:$0x73625140]  ;;  %v2158_v33 = vadd.f32 %v2157_v44, %v2156_v29 }
 0x204   :  { %v5187_v24 = vld.sshfl [vmem:[#allocation1 + $0x38] sm:$0xff pattern:$0x73625140]  ;;  %1443 = vst [vmem:[#allocation1] ss:$4 sm:$0xff] %v1124_v30  ;;  %v1126_v30 = vmul.f32 %v6667_v40, %v85_v53  ;;  %v2167_v53 = vsel %vm765_vm1, %v5005_v52, 0.0 }
 0x205   :  { %6666 = vst [vmem:[#allocation71_spill] sm:$0xff] %v5187_v24  ;;  %v2160_v24 = vadd.f32 %v2159_v14, %v2158_v33  ;;  %v87_v40 = vld [vmem:[#allocation3 + $0x160] sm:$0xff] }
 0x206   :  { %1444 = vst [vmem:[#allocation1 + $0x20] ss:$4 sm:$0xff] %v1125_v17  ;;  %v1127_v17 = vmul.f32 %v6668_v62, %v86_v18  ;;  %v2169_v18 = vsel %vm765_vm1, %v5007_v11, 0.0  ;;  %v6673_v52 = vld [vmem:[#allocation30_spill] sm:$0xff] }
 0x207   :  { %v2162_v44 = vadd.f32 %v2161_v10, %v2160_v24  ;;  %v2171_v24 = vsel %vm765_vm1, %v5009_v15, 0.0 }
 0x209   :  { %v2164_v8 = vadd.f32 %v2163_v1, %v2162_v44  ;;  %v2175_v1 = vsel %vm765_vm1, %v5013_v5, 0.0  ;;  %v2177_v5 = vsel %vm765_vm1, %v5029_v41, 0.0 }
 0x20b   :  { %v5203_v50 = vld.sshfl [vmem:[#allocation1] sm:$0xff pattern:$0x73625140]  ;;  %v5205_v39 = vld.sshfl [vmem:[#allocation1 + $0x8] sm:$0xff pattern:$0x73625140]  ;;  %v2166_v14 = vadd.f32 %v2165_v13, %v2164_v8 }
 0x20c   :  { %v5207_v34 = vld.sshfl [vmem:[#allocation1 + $0x10] sm:$0xff pattern:$0x73625140]  ;;  %v5209_v31 = vld.sshfl [vmem:[#allocation1 + $0x18] sm:$0xff pattern:$0x73625140] }
 0x20d   :  { %v5211_v20 = vld.sshfl [vmem:[#allocation1 + $0x20] sm:$0xff pattern:$0x73625140]  ;;  %v5213_v33 = vld.sshfl [vmem:[#allocation1 + $0x28] sm:$0xff pattern:$0x73625140]  ;;  %v2168_v62 = vadd.f32 %v2167_v53, %v2166_v14 }
 0x20e   :  { %6669 = vst [vmem:[#allocation73_spill] sm:$0xff] %v5211_v20  ;;  %v5215_v29 = vld.sshfl [vmem:[#allocation1 + $0x30] sm:$0xff pattern:$0x73625140] }
 0x20f   :  { %6670 = vst [vmem:[#allocation75_spill] sm:$0xff] %v5213_v33  ;;  %v5217_v36 = vld.sshfl [vmem:[#allocation1 + $0x38] sm:$0xff pattern:$0x73625140]  ;;  %v88_v20 = vld [vmem:[#allocation3 + $0x168] sm:$0xff]  ;;  %v2170_v10 = vadd.f32 %v2169_v18, %v2168_v62 }
 0x210   :  { %6671 = vst [vmem:[#allocation74_spill] sm:$0xff] %v5215_v29  ;;  %v6672_v29 = vld [vmem:[#allocation28_spill] sm:$0xff]  ;;  %v1129_v13 = vmul.f32 %v6673_v52, %v88_v20  ;;  %v90_v52 = vld [vmem:[#allocation3 + $0x178] sm:$0xff] }
 0x211   :  { %1453 = vst [vmem:[#allocation1] ss:$4 sm:$0xff] %v1126_v30  ;;  %v1128_v33 = vmul.f32 %v6672_v29, %v87_v40  ;;  %v2173_v30 = vsel %vm765_vm1, %v5011_v46, 0.0  ;;  %v2172_v8 = vadd.f32 %v2171_v24, %v2170_v10  ;;  %v2179_v40 = vsel %vm765_vm1, %v5031_v51, 0.0  ;;  %v89_v24 = vld [vmem:[#allocation3 + $0x170] sm:$0xff]  ;;  %v6679_v51 = vld [vmem:[#allocation31_spill] sm:$0xff] }
 0x212   :  { %1454 = vst [vmem:[#allocation1 + $0x20] ss:$4 sm:$0xff] %v1127_v17  ;;  %v2181_v10 = vsel %vm765_vm1, %v5033_v6, 0.0 }
 0x213   :  { %v2174_v46 = vadd.f32 %v2173_v30, %v2172_v8  ;;  %v2183_v30 = vsel %vm765_vm1, %v5035_v48, 0.0  ;;  %v6677_v8 = vld [vmem:[#allocation29_spill] sm:$0xff] }
 0x215   :  { %v2176_v20 = vadd.f32 %v2175_v1, %v2174_v46  ;;  %v2187_v1 = vsel %vm765_vm1, %v5039_v19, 0.0 }
 0x217   :  { %v2178_v62 = vadd.f32 %v2177_v5, %v2176_v20 }
 0x218   :  { %v5231_v17 = vld.sshfl [vmem:[#allocation1] sm:$0xff pattern:$0x73625140]  ;;  %v5233_v11 = vld.sshfl [vmem:[#allocation1 + $0x8] sm:$0xff pattern:$0x73625140] }
 0x219   :  { %v5235_v44 = vld.sshfl [vmem:[#allocation1 + $0x10] sm:$0xff pattern:$0x73625140]  ;;  %v5237_v53 = vld.sshfl [vmem:[#allocation1 + $0x18] sm:$0xff pattern:$0x73625140] }
 0x21a   :  { %v5239_v15 = vld.sshfl [vmem:[#allocation1 + $0x20] sm:$0xff pattern:$0x73625140]  ;;  %v5241_v29 = vld.sshfl [vmem:[#allocation1 + $0x28] sm:$0xff pattern:$0x73625140] }
 0x21b   :  { %6674 = vst [vmem:[#allocation76_spill] sm:$0xff] %v5241_v29  ;;  %v5243_v14 = vld.sshfl [vmem:[#allocation1 + $0x30] sm:$0xff pattern:$0x73625140]  ;;  %v2180_v29 = vadd.f32 %v2179_v40, %v2178_v62 }
 0x21c   :  { %6675 = vst [vmem:[#allocation78_spill] sm:$0xff] %v5243_v14  ;;  %v5245_v18 = vld.sshfl [vmem:[#allocation1 + $0x38] sm:$0xff pattern:$0x73625140]  ;;  %v6678_v14 = vld [vmem:[#allocation62_spill] sm:$0xff] }
 0x21d   :  { %6676 = vst [vmem:[#allocation77_spill] sm:$0xff] %v5245_v18  ;;  %v2182_v18 = vadd.f32 %v2181_v10, %v2180_v29  ;;  %v2185_v41 = vsel %vm765_vm1, %v6678_v14, 0.0 }
 0x21e   :  { %1463 = vst [vmem:[#allocation1] ss:$4 sm:$0xff] %v1128_v33  ;;  %v1130_v33 = vmul.f32 %v6677_v8, %v89_v24  ;;  %v6684_v24 = vld [vmem:[#allocation64_spill] sm:$0xff]  ;;  %v2191_v8 = vsel %vm765_vm1, %v5043_v63, 0.0 }
 0x21f   :  { %1464 = vst [vmem:[#allocation1 + $0x20] ss:$4 sm:$0xff] %v1129_v13  ;;  %v1131_v13 = vmul.f32 %v6679_v51, %v90_v52  ;;  %v2184_v40 = vadd.f32 %v2183_v30, %v2182_v18  ;;  %v2189_v10 = vsel %vm765_vm1, %v6684_v24, 0.0  ;;  %v91_v51 = vld [vmem:[#allocation3 + $0x180] sm:$0xff]  ;;  %v2193_v18 = vsel %vm765_vm1, %v5057_v0, 0.0 }
 0x221   :  { %v2186_v19 = vadd.f32 %v2185_v41, %v2184_v40  ;;  %v2197_v41 = vsel %vm765_vm1, %v5061_v43, 0.0  ;;  %v2199_v43 = vsel %vm765_vm1, %v5063_v56, 0.0 }
 0x223   :  { %v2188_v52 = vadd.f32 %v2187_v1, %v2186_v19 }
 0x225   :  { %v5261_v46 = vld.sshfl [vmem:[#allocation1] sm:$0xff pattern:$0x73625140]  ;;  %v5263_v5 = vld.sshfl [vmem:[#allocation1 + $0x8] sm:$0xff pattern:$0x73625140] }
 0x226   :  { %v5265_v6 = vld.sshfl [vmem:[#allocation1 + $0x10] sm:$0xff pattern:$0x73625140]  ;;  %v5267_v20 = vld.sshfl [vmem:[#allocation1 + $0x18] sm:$0xff pattern:$0x73625140] }
 0x227   :  { %6680 = vst [vmem:[#allocation79_spill] sm:$0xff] %v5267_v20  ;;  %v5269_v48 = vld.sshfl [vmem:[#allocation1 + $0x20] sm:$0xff pattern:$0x73625140]  ;;  %v2190_v20 = vadd.f32 %v2189_v10, %v2188_v52 }
 0x228   :  { %6681 = vst [vmem:[#allocation81_spill] sm:$0xff] %v5269_v48  ;;  %v5271_v29 = vld.sshfl [vmem:[#allocation1 + $0x28] sm:$0xff pattern:$0x73625140]  ;;  %v92_v48 = vld [vmem:[#allocation3 + $0x188] sm:$0xff] }
 0x229   :  { %6682 = vst [vmem:[#allocation80_spill] sm:$0xff] %v5271_v29  ;;  %v5273_v62 = vld.sshfl [vmem:[#allocation1 + $0x30] sm:$0xff pattern:$0x73625140]  ;;  %v2192_v30 = vadd.f32 %v2191_v8, %v2190_v20  ;;  %v2201_v8 = vsel %vm765_vm1, %v5065_v2, 0.0  ;;  %v6692_v2 = vld [vmem:[#allocation36_spill] sm:$0xff] }
 0x22a   :  { %6683 = vst [vmem:[#allocation82_spill] sm:$0xff] %v5273_v62  ;;  %v5275_v14 = vld.sshfl [vmem:[#allocation1 + $0x38] sm:$0xff pattern:$0x73625140]  ;;  %v6685_v62 = vld [vmem:[#allocation33_spill] sm:$0xff] }
 0x22b   :  { %1473 = vst [vmem:[#allocation1] ss:$4 sm:$0xff] %v1130_v33  ;;  %v1132_v29 = vmul.f32 %v6685_v62, %v91_v51  ;;  %v2195_v33 = vsel %vm765_vm1, %v5059_v35, 0.0  ;;  %v2194_v24 = vadd.f32 %v2193_v18, %v2192_v30  ;;  %v93_v18 = vld [vmem:[#allocation3 + $0x190] sm:$0xff]  ;;  %v2203_v30 = vsel %vm765_vm1, %v5067_v4, 0.0 }
 0x22c   :  { %1474 = vst [vmem:[#allocation1 + $0x20] ss:$4 sm:$0xff] %v1131_v13  ;;  %v6686_v13 = vld [vmem:[#allocation32_spill] sm:$0xff] }
 0x22d   :  { %v1133_v1 = vmul.f32 %v6686_v13, %v92_v48  ;;  %v2196_v35 = vadd.f32 %v2195_v33, %v2194_v24  ;;  %v94_v13 = vld [vmem:[#allocation3 + $0x198] sm:$0xff]  ;;  %v2205_v33 = vsel %vm765_vm1, %v5069_v47, 0.0  ;;  %v6690_v24 = vld [vmem:[#allocation34_spill] sm:$0xff] }
 0x22f   :  { %v2198_v48 = vadd.f32 %v2197_v41, %v2196_v35  ;;  %v2209_v41 = vsel %vm765_vm1, %v5087_v23, 0.0 }
 0x231   :  { %v2200_v51 = vadd.f32 %v2199_v43, %v2198_v48 }
 0x232   :  { %v5289_v40 = vld.sshfl [vmem:[#allocation1] sm:$0xff pattern:$0x73625140]  ;;  %v5291_v63 = vld.sshfl [vmem:[#allocation1 + $0x8] sm:$0xff pattern:$0x73625140] }
 0x233   :  { %v5293_v19 = vld.sshfl [vmem:[#allocation1 + $0x10] sm:$0xff pattern:$0x73625140]  ;;  %v5295_v10 = vld.sshfl [vmem:[#allocation1 + $0x18] sm:$0xff pattern:$0x73625140] }
 0x234   :  { %v5297_v0 = vld.sshfl [vmem:[#allocation1 + $0x20] sm:$0xff pattern:$0x73625140]  ;;  %v5299_v20 = vld.sshfl [vmem:[#allocation1 + $0x28] sm:$0xff pattern:$0x73625140] }
 0x235   :  { %6687 = vst [vmem:[#allocation84_spill] sm:$0xff] %v5299_v20  ;;  %v5301_v62 = vld.sshfl [vmem:[#allocation1 + $0x30] sm:$0xff pattern:$0x73625140]  ;;  %v2202_v20 = vadd.f32 %v2201_v8, %v2200_v51 }
 0x236   :  { %6688 = vst [vmem:[#allocation83_spill] sm:$0xff] %v5301_v62  ;;  %v5303_v52 = vld.sshfl [vmem:[#allocation1 + $0x38] sm:$0xff pattern:$0x73625140]  ;;  %v6691_v62 = vld [vmem:[#allocation66_spill] sm:$0xff] }
 0x237   :  { %6689 = vst [vmem:[#allocation85_spill] sm:$0xff] %v5303_v52  ;;  %v2204_v52 = vadd.f32 %v2203_v30, %v2202_v20  ;;  %v2207_v56 = vsel %vm765_vm1, %v6691_v62, 0.0 }
 0x238   :  { %1483 = vst [vmem:[#allocation1] ss:$4 sm:$0xff] %v1132_v29  ;;  %v1134_v29 = vmul.f32 %v6690_v24, %v93_v18  ;;  %v2211_v18 = vsel %vm765_vm1, %v5089_v60, 0.0  ;;  %v95_v24 = vld [vmem:[#allocation3 + $0x1a0] sm:$0xff]  ;;  %v6699_v60 = vld [vmem:[#allocation37_spill] sm:$0xff] }
 0x239   :  { %1484 = vst [vmem:[#allocation1 + $0x20] ss:$4 sm:$0xff] %v1133_v1  ;;  %v1135_v1 = vmul.f32 %v6692_v2, %v94_v13  ;;  %v2206_v8 = vadd.f32 %v2205_v33, %v2204_v52  ;;  %v2213_v13 = vsel %vm765_vm1, %v5091_v57, 0.0  ;;  %v2215_v52 = vsel %vm765_vm1, %v5093_v25, 0.0 }
 0x23b   :  { %v2208_v23 = vadd.f32 %v2207_v56, %v2206_v8  ;;  %v2219_v56 = vsel %vm765_vm1, %v5097_v38, 0.0  ;;  %v6703_v38 = vld [vmem:[#allocation67_spill] sm:$0xff] }
 0x23d   :  { %v2210_v30 = vadd.f32 %v2209_v41, %v2208_v23 }
 0x23f   :  { %v5319_v35 = vld.sshfl [vmem:[#allocation1] sm:$0xff pattern:$0x73625140]  ;;  %v5321_v43 = vld.sshfl [vmem:[#allocation1 + $0x8] sm:$0xff pattern:$0x73625140]  ;;  %v2212_v2 = vadd.f32 %v2211_v18, %v2210_v30 }
 0x240   :  { %v5323_v4 = vld.sshfl [vmem:[#allocation1 + $0x10] sm:$0xff pattern:$0x73625140]  ;;  %v5325_v48 = vld.sshfl [vmem:[#allocation1 + $0x18] sm:$0xff pattern:$0x73625140] }
 0x241   :  { %v5327_v47 = vld.sshfl [vmem:[#allocation1 + $0x20] sm:$0xff pattern:$0x73625140]  ;;  %v5329_v20 = vld.sshfl [vmem:[#allocation1 + $0x28] sm:$0xff pattern:$0x73625140]  ;;  %v2214_v33 = vadd.f32 %v2213_v13, %v2212_v2 }
 0x242   :  { %6693 = vst [vmem:[#allocation87_spill] sm:$0xff] %v5327_v47  ;;  %v5331_v51 = vld.sshfl [vmem:[#allocation1 + $0x30] sm:$0xff pattern:$0x73625140]  ;;  %v2223_v2 = vsel %vm765_vm1, %v5101_v45, 0.0  ;;  %v6705_v45 = vld [vmem:[#allocation38_spill] sm:$0xff] }
 0x243   :  { %6694 = vst [vmem:[#allocation86_spill] sm:$0xff] %v5329_v20  ;;  %v5333_v62 = vld.sshfl [vmem:[#allocation1 + $0x38] sm:$0xff pattern:$0x73625140]  ;;  %v96_v47 = vld [vmem:[#allocation3 + $0x1a8] sm:$0xff]  ;;  %v2216_v23 = vadd.f32 %v2215_v52, %v2214_v33 }
 0x244   :  { %6695 = vst [vmem:[#allocation88_spill] sm:$0xff] %v5331_v51  ;;  %v6697_v51 = vld [vmem:[#allocation35_spill] sm:$0xff]  ;;  %v1137_v41 = vmul.f32 %v6699_v60, %v96_v47  ;;  %v2221_v47 = vsel %vm765_vm1, %v6703_v38, 0.0  ;;  %v97_v33 = vld [vmem:[#allocation3 + $0x1b0] sm:$0xff]  ;;  %v2225_v60 = vsel %vm765_vm1, %v5115_v59, 0.0 }
 0x245   :  { %6696 = vst [vmem:[#allocation90_spill] sm:$0xff] %v5333_v62  ;;  %v1136_v20 = vmul.f32 %v6697_v51, %v95_v24  ;;  %v6698_v62 = vld [vmem:[#allocation65_spill] sm:$0xff] }
 0x246   :  { %1493 = vst [vmem:[#allocation1] ss:$4 sm:$0xff] %v1134_v29  ;;  %v2217_v29 = vsel %vm765_vm1, %v6698_v62, 0.0 }
 0x247   :  { %1494 = vst [vmem:[#allocation1 + $0x20] ss:$4 sm:$0xff] %v1135_v1  ;;  %v2218_v62 = vadd.f32 %v2217_v29, %v2216_v23  ;;  %v2227_v29 = vsel %vm765_vm1, %v5117_v58, 0.0  ;;  %v6704_v23 = vld [vmem:[#allocation39_spill] sm:$0xff] }
 0x249   :  { %v2220_v24 = vadd.f32 %v2219_v56, %v2218_v62  ;;  %v2231_v56 = vsel %vm765_vm1, %v5121_v22, 0.0 }
 0x24b   :  { %v2222_v52 = vadd.f32 %v2221_v47, %v2220_v24 }
 0x24d   :  { %v5347_v1 = vld.sshfl [vmem:[#allocation1] sm:$0xff pattern:$0x73625140]  ;;  %v5349_v57 = vld.sshfl [vmem:[#allocation1 + $0x8] sm:$0xff pattern:$0x73625140] }
 0x24e   :  { %v5351_v8 = vld.sshfl [vmem:[#allocation1 + $0x10] sm:$0xff pattern:$0x73625140]  ;;  %v5353_v18 = vld.sshfl [vmem:[#allocation1 + $0x18] sm:$0xff pattern:$0x73625140] }
 0x24f   :  { %v5355_v25 = vld.sshfl [vmem:[#allocation1 + $0x20] sm:$0xff pattern:$0x73625140]  ;;  %v5357_v51 = vld.sshfl [vmem:[#allocation1 + $0x28] sm:$0xff pattern:$0x73625140] }
 0x250   :  { %6700 = vst [vmem:[#allocation89_spill] sm:$0xff] %v5355_v25  ;;  %v5359_v30 = vld.sshfl [vmem:[#allocation1 + $0x30] sm:$0xff pattern:$0x73625140]  ;;  %v2224_v25 = vadd.f32 %v2223_v2, %v2222_v52 }
 0x251   :  { %6701 = vst [vmem:[#allocation91_spill] sm:$0xff] %v5357_v51  ;;  %v5361_v13 = vld.sshfl [vmem:[#allocation1 + $0x38] sm:$0xff pattern:$0x73625140]  ;;  %v98_v51 = vld [vmem:[#allocation3 + $0x1b8] sm:$0xff] }
 0x252   :  { %6702 = vst [vmem:[#allocation93_spill] sm:$0xff] %v5361_v13  ;;  %v2226_v13 = vadd.f32 %v2225_v60, %v2224_v25  ;;  %v1139_v62 = vmul.f32 %v6705_v45, %v98_v51  ;;  %v2233_v51 = vsel %vm765_vm1, %v5123_v28, 0.0  ;;  %v2235_v60 = vsel %vm765_vm1, %v5125_v27, 0.0  ;;  %v6712_v28 = vld [vmem:[#allocation42_spill] sm:$0xff] }
 0x253   :  { %1503 = vst [vmem:[#allocation1] ss:$4 sm:$0xff] %v1136_v20  ;;  %v1138_v20 = vmul.f32 %v6704_v23, %v97_v33  ;;  %v99_v23 = vld [vmem:[#allocation3 + $0x1c0] sm:$0xff] }
 0x254   :  { %1504 = vst [vmem:[#allocation1 + $0x20] ss:$4 sm:$0xff] %v1137_v41  ;;  %v2229_v41 = vsel %vm765_vm1, %v5119_v26, 0.0  ;;  %v2228_v2 = vadd.f32 %v2227_v29, %v2226_v13  ;;  %v2237_v13 = vsel %vm765_vm1, %v5127_v55, 0.0 }
 0x256   :  { %v2230_v22 = vadd.f32 %v2229_v41, %v2228_v2  ;;  %v2241_v41 = vsel %vm765_vm1, %v5145_v7, 0.0  ;;  %v2243_v7 = vsel %vm765_vm1, %v5147_v3, 0.0  ;;  %v2251_v3 = vsel %vm765_vm1, %v5155_v12, 0.0 }
 0x258   :  { %v2232_v33 = vadd.f32 %v2231_v56, %v2230_v22 }
 0x25a   :  { %v5377_v38 = vld.sshfl [vmem:[#allocation1] sm:$0xff pattern:$0x73625140]  ;;  %v5379_v47 = vld.sshfl [vmem:[#allocation1 + $0x8] sm:$0xff pattern:$0x73625140]  ;;  %v2234_v45 = vadd.f32 %v2233_v51, %v2232_v33 }
 0x25b   :  { %v5381_v59 = vld.sshfl [vmem:[#allocation1 + $0x10] sm:$0xff pattern:$0x73625140]  ;;  %v5383_v24 = vld.sshfl [vmem:[#allocation1 + $0x18] sm:$0xff pattern:$0x73625140] }
 0x25c   :  { %v5385_v58 = vld.sshfl [vmem:[#allocation1 + $0x20] sm:$0xff pattern:$0x73625140]  ;;  %v5387_v25 = vld.sshfl [vmem:[#allocation1 + $0x28] sm:$0xff pattern:$0x73625140]  ;;  %v2236_v29 = vadd.f32 %v2235_v60, %v2234_v45 }
 0x25d   :  { %6706 = vst [vmem:[#allocation92_spill] sm:$0xff] %v5385_v58  ;;  %v5389_v52 = vld.sshfl [vmem:[#allocation1 + $0x30] sm:$0xff pattern:$0x73625140] }
 0x25e   :  { %6707 = vst [vmem:[#allocation94_spill] sm:$0xff] %v5387_v25  ;;  %v5391_v26 = vld.sshfl [vmem:[#allocation1 + $0x38] sm:$0xff pattern:$0x73625140]  ;;  %v100_v58 = vld [vmem:[#allocation3 + $0x1c8] sm:$0xff]  ;;  %v2238_v22 = vadd.f32 %v2237_v13, %v2236_v29  ;;  %v2247_v29 = vsel %vm765_vm1, %v5151_v42, 0.0 }
 0x25f   :  { %6708 = vst [vmem:[#allocation96_spill] sm:$0xff] %v5389_v52  ;;  %v6710_v52 = vld [vmem:[#allocation40_spill] sm:$0xff]  ;;  %v1141_v56 = vmul.f32 %v6712_v28, %v100_v58  ;;  %v102_v28 = vld [vmem:[#allocation3 + $0x1d8] sm:$0xff] }
 0x260   :  { %6709 = vst [vmem:[#allocation95_spill] sm:$0xff] %v5391_v26  ;;  %v1140_v25 = vmul.f32 %v6710_v52, %v99_v23  ;;  %v6711_v26 = vld [vmem:[#allocation69_spill] sm:$0xff]  ;;  %v2245_v23 = vsel %vm765_vm1, %v5149_v49, 0.0  ;;  %v101_v13 = vld [vmem:[#allocation3 + $0x1d0] sm:$0xff]  ;;  %v6719_v49 = vld [vmem:[#allocation43_spill] sm:$0xff] }
 0x261   :  { %1513 = vst [vmem:[#allocation1] ss:$4 sm:$0xff] %v1138_v20  ;;  %v2239_v20 = vsel %vm765_vm1, %v6711_v26, 0.0 }
 0x262   :  { %1514 = vst [vmem:[#allocation1 + $0x20] ss:$4 sm:$0xff] %v1139_v62  ;;  %v2240_v26 = vadd.f32 %v2239_v20, %v2238_v22  ;;  %v6717_v22 = vld [vmem:[#allocation41_spill] sm:$0xff] }
 0x264   :  { %v2242_v58 = vadd.f32 %v2241_v41, %v2240_v26  ;;  %v6718_v41 = vld [vmem:[#allocation70_spill] sm:$0xff]  ;;  %v1143_v26 = vmul.f32 %v6719_v49, %v102_v28  ;;  %v2255_v28 = vsel %vm765_vm1, %v5159_v32, 0.0  ;;  %v6725_v32 = vld [vmem:[#allocation44_spill] sm:$0xff] }
 0x265   :  { %v103_v49 = vld [vmem:[#allocation3 + $0x1e0] sm:$0xff] }
 0x266   :  { %v2244_v45 = vadd.f32 %v2243_v7, %v2242_v58 }
 0x268   :  { %v5405_v62 = vld.sshfl [vmem:[#allocation1] sm:$0xff pattern:$0x73625140]  ;;  %v5407_v27 = vld.sshfl [vmem:[#allocation1 + $0x8] sm:$0xff pattern:$0x73625140] }
 0x269   :  { %v5409_v2 = vld.sshfl [vmem:[#allocation1 + $0x10] sm:$0xff pattern:$0x73625140]  ;;  %v5411_v51 = vld.sshfl [vmem:[#allocation1 + $0x18] sm:$0xff pattern:$0x73625140] }
 0x26a   :  { %v5413_v55 = vld.sshfl [vmem:[#allocation1 + $0x20] sm:$0xff pattern:$0x73625140]  ;;  %v5415_v52 = vld.sshfl [vmem:[#allocation1 + $0x28] sm:$0xff pattern:$0x73625140] }
 0x26b   :  { %6713 = vst [vmem:[#allocation97_spill] sm:$0xff] %v5415_v52  ;;  %v5417_v33 = vld.sshfl [vmem:[#allocation1 + $0x30] sm:$0xff pattern:$0x73625140]  ;;  %v2246_v52 = vadd.f32 %v2245_v23, %v2244_v45 }
 0x26c   :  { %6714 = vst [vmem:[#allocation99_spill] sm:$0xff] %v5417_v33  ;;  %v5419_v60 = vld.sshfl [vmem:[#allocation1 + $0x38] sm:$0xff pattern:$0x73625140] }
 0x26d   :  { %6715 = vst [vmem:[#allocation98_spill] sm:$0xff] %v5419_v60  ;;  %v6716_v33 = vld [vmem:[#allocation68_spill] sm:$0xff]  ;;  %v2248_v60 = vadd.f32 %v2247_v29, %v2246_v52 }
 0x26e   :  { %1523 = vst [vmem:[#allocation1] ss:$4 sm:$0xff] %v1140_v25  ;;  %v2249_v20 = vsel %vm765_vm1, %v6716_v33, 0.0  ;;  %v1142_v25 = vmul.f32 %v6717_v22, %v101_v13 }
 0x26f   :  { %1524 = vst [vmem:[#allocation1 + $0x20] ss:$4 sm:$0xff] %v1141_v56  ;;  %v2253_v56 = vsel %vm765_vm1, %v6718_v41, 0.0  ;;  %v2250_v45 = vadd.f32 %v2249_v20, %v2248_v60  ;;  %v2257_v41 = vsel %vm765_vm1, %v5173_v21, 0.0  ;;  %v2259_v60 = vsel %vm765_vm1, %v5175_v37, 0.0 }
 0x271   :  { %v2252_v29 = vadd.f32 %v2251_v3, %v2250_v45  ;;  %v2263_v3 = vsel %vm765_vm1, %v5179_v61, 0.0  ;;  %v2265_v61 = vsel %vm765_vm1, %v5181_v54, 0.0  ;;  %v2273_v54 = vsel %vm765_vm1, %v5203_v50, 0.0 }
 0x273   :  { %v2254_v22 = vadd.f32 %v2253_v56, %v2252_v29 }
 0x275   :  { %v5435_v7 = vld.sshfl [vmem:[#allocation1] sm:$0xff pattern:$0x73625140]  ;;  %v5437_v58 = vld.sshfl [vmem:[#allocation1 + $0x8] sm:$0xff pattern:$0x73625140] }
 0x276   :  { %v5439_v42 = vld.sshfl [vmem:[#allocation1 + $0x10] sm:$0xff pattern:$0x73625140]  ;;  %v5441_v23 = vld.sshfl [vmem:[#allocation1 + $0x18] sm:$0xff pattern:$0x73625140] }
 0x277   :  { %6720 = vst [vmem:[#allocation100_spill] sm:$0xff] %v5441_v23  ;;  %v5443_v33 = vld.sshfl [vmem:[#allocation1 + $0x20] sm:$0xff pattern:$0x73625140]  ;;  %v2256_v23 = vadd.f32 %v2255_v28, %v2254_v22 }
 0x278   :  { %6721 = vst [vmem:[#allocation102_spill] sm:$0xff] %v5443_v33  ;;  %v5445_v52 = vld.sshfl [vmem:[#allocation1 + $0x28] sm:$0xff pattern:$0x73625140]  ;;  %v104_v33 = vld [vmem:[#allocation3 + $0x1e8] sm:$0xff] }
 0x279   :  { %6722 = vst [vmem:[#allocation101_spill] sm:$0xff] %v5445_v52  ;;  %v5447_v13 = vld.sshfl [vmem:[#allocation1 + $0x30] sm:$0xff pattern:$0x73625140]  ;;  %v2258_v20 = vadd.f32 %v2257_v41, %v2256_v23  ;;  %v1145_v56 = vmul.f32 %v6725_v32, %v104_v33  ;;  %v6730_v41 = vld [vmem:[#allocation72_spill] sm:$0xff]  ;;  %v2269_v32 = vsel %vm765_vm1, %v5185_v16, 0.0 }
 0x27a   :  { %6723 = vst [vmem:[#allocation103_spill] sm:$0xff] %v5447_v13  ;;  %v5449_v12 = vld.sshfl [vmem:[#allocation1 + $0x38] sm:$0xff pattern:$0x73625140]  ;;  %v6724_v13 = vld [vmem:[#allocation45_spill] sm:$0xff] }
 0x27b   :  { %1533 = vst [vmem:[#allocation1] ss:$4 sm:$0xff] %v1142_v25  ;;  %v1144_v52 = vmul.f32 %v6724_v13, %v103_v49  ;;  %v2261_v25 = vsel %vm765_vm1, %v5177_v9, 0.0  ;;  %v2260_v29 = vadd.f32 %v2259_v60, %v2258_v20  ;;  %v2267_v49 = vsel %vm765_vm1, %v6730_v41, 0.0  ;;  %v105_v20 = vld [vmem:[#allocation3 + $0x1f0] sm:$0xff] }
 0x27c   :  { %1534 = vst [vmem:[#allocation1 + $0x20] ss:$4 sm:$0xff] %v1143_v26 }
 0x27d   :  { %v2262_v9 = vadd.f32 %v2261_v25, %v2260_v29  ;;  %v6732_v29 = vld [vmem:[#allocation46_spill] sm:$0xff] }
 0x27f   :  { %v2264_v33 = vadd.f32 %v2263_v3, %v2262_v9  ;;  %v2275_v3 = vsel %vm765_vm1, %v5205_v39, 0.0 }
 0x281   :  { %v2266_v60 = vadd.f32 %v2265_v61, %v2264_v33 }
 0x282   :  { %v5463_v26 = vld.sshfl [vmem:[#allocation1] sm:$0xff pattern:$0x73625140]  ;;  %v5465_v21 = vld.sshfl [vmem:[#allocation1 + $0x8] sm:$0xff pattern:$0x73625140] }
 0x283   :  { %v5467_v45 = vld.sshfl [vmem:[#allocation1 + $0x10] sm:$0xff pattern:$0x73625140]  ;;  %v5469_v28 = vld.sshfl [vmem:[#allocation1 + $0x18] sm:$0xff pattern:$0x73625140] }
 0x284   :  { %v5471_v37 = vld.sshfl [vmem:[#allocation1 + $0x20] sm:$0xff pattern:$0x73625140]  ;;  %v5473_v23 = vld.sshfl [vmem:[#allocation1 + $0x28] sm:$0xff pattern:$0x73625140] }
 0x285   :  { %6726 = vst [vmem:[#allocation105_spill] sm:$0xff] %v5471_v37  ;;  %v5475_v13 = vld.sshfl [vmem:[#allocation1 + $0x30] sm:$0xff pattern:$0x73625140]  ;;  %v2268_v37 = vadd.f32 %v2267_v49, %v2266_v60 }
 0x286   :  { %6727 = vst [vmem:[#allocation104_spill] sm:$0xff] %v5473_v23  ;;  %v5477_v22 = vld.sshfl [vmem:[#allocation1 + $0x38] sm:$0xff pattern:$0x73625140]  ;;  %v106_v23 = vld [vmem:[#allocation3 + $0x1f8] sm:$0xff] }
 0x287   :  { %6728 = vst [vmem:[#allocation106_spill] sm:$0xff] %v5475_v13  ;;  %v6731_v13 = vld [vmem:[#allocation71_spill] sm:$0xff] }
 0x288   :  { %6729 = vst [vmem:[#allocation108_spill] sm:$0xff] %v5477_v22  ;;  %v2271_v25 = vsel %vm765_vm1, %v6731_v13, 0.0  ;;  %v2270_v22 = vadd.f32 %v2269_v32, %v2268_v37  ;;  %v2279_v32 = vsel %vm765_vm1, %v5209_v31, 0.0 }
 0x289   :  { %1543 = vst [vmem:[#allocation1] ss:$4 sm:$0xff] %v1144_v52  ;;  %v1146_v52 = vmul.f32 %v6732_v29, %v105_v20  ;;  %v107_v29 = vld [vmem:[#allocation3 + $0x200] sm:$0xff] }
 0x28a   :  { %1544 = vst [vmem:[#allocation1 + $0x20] ss:$4 sm:$0xff] %v1145_v56  ;;  %v6733_v56 = vld [vmem:[#allocation48_spill] sm:$0xff]  ;;  %v2272_v49 = vadd.f32 %v2271_v25, %v2270_v22  ;;  %v6739_v22 = vld [vmem:[#allocation73_spill] sm:$0xff] }
 0x28b   :  { %v1147_v9 = vmul.f32 %v6733_v56, %v106_v23  ;;  %v2277_v23 = vsel %vm765_vm1, %v5207_v34, 0.0  ;;  %v2281_v25 = vsel %vm765_vm1, %v6739_v22, 0.0  ;;  %v6743_v34 = vld [vmem:[#allocation49_spill] sm:$0xff] }
 0x28c   :  { %v2274_v39 = vadd.f32 %v2273_v54, %v2272_v49  ;;  %v6742_v54 = vld [vmem:[#allocation74_spill] sm:$0xff] }
 0x28e   :  { %v2276_v20 = vadd.f32 %v2275_v3, %v2274_v39 }
 0x290   :  { %v5493_v61 = vld.sshfl [vmem:[#allocation1] sm:$0xff pattern:$0x73625140]  ;;  %v5495_v33 = vld.sshfl [vmem:[#allocation1 + $0x8] sm:$0xff pattern:$0x73625140]  ;;  %v2278_v56 = vadd.f32 %v2277_v23, %v2276_v20 }
 0x291   :  { %v5497_v16 = vld.sshfl [vmem:[#allocation1 + $0x10] sm:$0xff pattern:$0x73625140]  ;;  %v5499_v41 = vld.sshfl [vmem:[#allocation1 + $0x18] sm:$0xff pattern:$0x73625140] }
 0x292   :  { %6734 = vst [vmem:[#allocation107_spill] sm:$0xff] %v5499_v41  ;;  %v5501_v13 = vld.sshfl [vmem:[#allocation1 + $0x20] sm:$0xff pattern:$0x73625140] }
 0x293   :  { %6735 = vst [vmem:[#allocation109_spill] sm:$0xff] %v5501_v13  ;;  %v5503_v37 = vld.sshfl [vmem:[#allocation1 + $0x28] sm:$0xff pattern:$0x73625140]  ;;  %v108_v13 = vld [vmem:[#allocation3 + $0x208] sm:$0xff] }
 0x294   :  { %6736 = vst [vmem:[#allocation111_spill] sm:$0xff] %v5503_v37  ;;  %v5505_v60 = vld.sshfl [vmem:[#allocation1 + $0x30] sm:$0xff pattern:$0x73625140]  ;;  %v2280_v37 = vadd.f32 %v2279_v32, %v2278_v56  ;;  %v1149_v3 = vmul.f32 %v6743_v34, %v108_v13  ;;  %v2287_v13 = vsel %vm765_vm1, %v5217_v36, 0.0  ;;  %v2291_v34 = vsel %vm765_vm1, %v5233_v11, 0.0 }
 0x295   :  { %6737 = vst [vmem:[#allocation110_spill] sm:$0xff] %v5505_v60  ;;  %v5507_v50 = vld.sshfl [vmem:[#allocation1 + $0x38] sm:$0xff pattern:$0x73625140]  ;;  %v6740_v60 = vld [vmem:[#allocation47_spill] sm:$0xff]  ;;  %v2295_v36 = vsel %vm765_vm1, %v5237_v53, 0.0 }
 0x296   :  { %6738 = vst [vmem:[#allocation112_spill] sm:$0xff] %v5507_v50  ;;  %v1148_v41 = vmul.f32 %v6740_v60, %v107_v29  ;;  %v6741_v50 = vld [vmem:[#allocation75_spill] sm:$0xff]  ;;  %v2282_v23 = vadd.f32 %v2281_v25, %v2280_v37  ;;  %v2289_v37 = vsel %vm765_vm1, %v5231_v17, 0.0  ;;  %v6748_v17 = vld [vmem:[#allocation50_spill] sm:$0xff] }
 0x297   :  { %1553 = vst [vmem:[#allocation1] ss:$4 sm:$0xff] %v1146_v52  ;;  %v2283_v52 = vsel %vm765_vm1, %v6741_v50, 0.0 }
 0x298   :  { %1554 = vst [vmem:[#allocation1 + $0x20] ss:$4 sm:$0xff] %v1147_v9  ;;  %v2285_v9 = vsel %vm765_vm1, %v6742_v54, 0.0  ;;  %v2284_v50 = vadd.f32 %v2283_v52, %v2282_v23  ;;  %v109_v54 = vld [vmem:[#allocation3 + $0x210] sm:$0xff]  ;;  %v2293_v52 = vsel %vm765_vm1, %v5235_v44, 0.0  ;;  %v6747_v23 = vld [vmem:[#allocation51_spill] sm:$0xff] }
 0x29a   :  { %v2286_v22 = vadd.f32 %v2285_v9, %v2284_v50  ;;  %v2297_v9 = vsel %vm765_vm1, %v5239_v15, 0.0 }
 0x29c   :  { %v2288_v25 = vadd.f32 %v2287_v13, %v2286_v22 }
 0x29e   :  { %v5521_v49 = vld.sshfl [vmem:[#allocation1] sm:$0xff pattern:$0x73625140]  ;;  %v5523_v31 = vld.sshfl [vmem:[#allocation1 + $0x8] sm:$0xff pattern:$0x73625140] }
 0x29f   :  { %v5525_v39 = vld.sshfl [vmem:[#allocation1 + $0x10] sm:$0xff pattern:$0x73625140]  ;;  %v5527_v20 = vld.sshfl [vmem:[#allocation1 + $0x18] sm:$0xff pattern:$0x73625140] }
 0x2a0   :  { %v5529_v32 = vld.sshfl [vmem:[#allocation1 + $0x20] sm:$0xff pattern:$0x73625140]  ;;  %v5531_v60 = vld.sshfl [vmem:[#allocation1 + $0x28] sm:$0xff pattern:$0x73625140] }
 0x2a1   :  { %6744 = vst [vmem:[#allocation114_spill] sm:$0xff] %v5529_v32  ;;  %v5533_v29 = vld.sshfl [vmem:[#allocation1 + $0x30] sm:$0xff pattern:$0x73625140]  ;;  %v2290_v32 = vadd.f32 %v2289_v37, %v2288_v25 }
 0x2a2   :  { %6745 = vst [vmem:[#allocation113_spill] sm:$0xff] %v5531_v60  ;;  %v5535_v56 = vld.sshfl [vmem:[#allocation1 + $0x38] sm:$0xff pattern:$0x73625140]  ;;  %v110_v60 = vld [vmem:[#allocation3 + $0x218] sm:$0xff] }
 0x2a3   :  { %6746 = vst [vmem:[#allocation115_spill] sm:$0xff] %v5535_v56  ;;  %v2292_v56 = vadd.f32 %v2291_v34, %v2290_v32 }
 0x2a4   :  { %1563 = vst [vmem:[#allocation1] ss:$4 sm:$0xff] %v1148_v41  ;;  %v1150_v41 = vmul.f32 %v6747_v23, %v109_v54  ;;  %v6756_v23 = vld [vmem:[#allocation78_spill] sm:$0xff] }
 0x2a5   :  { %1564 = vst [vmem:[#allocation1 + $0x20] ss:$4 sm:$0xff] %v1149_v3  ;;  %v1151_v3 = vmul.f32 %v6748_v17, %v110_v60  ;;  %v2294_v37 = vadd.f32 %v2293_v52, %v2292_v56  ;;  %v6755_v60 = vld [vmem:[#allocation76_spill] sm:$0xff]  ;;  %v2301_v17 = vsel %vm765_vm1, %v6756_v23, 0.0  ;;  %v6757_v56 = vld [vmem:[#allocation77_spill] sm:$0xff] }
 0x2a6   :  { %v2299_v54 = vsel %vm765_vm1, %v6755_v60, 0.0  ;;  %v2303_v52 = vsel %vm765_vm1, %v6757_v56, 0.0 }
 0x2a7   :  { %v2296_v15 = vadd.f32 %v2295_v36, %v2294_v37  ;;  %v2307_v36 = vsel %vm765_vm1, %v5263_v5, 0.0  ;;  %v2309_v5 = vsel %vm765_vm1, %v5265_v6, 0.0 }
 0x2a9   :  { %v2298_v34 = vadd.f32 %v2297_v9, %v2296_v15 }
 0x2ab   :  { %v5551_v50 = vld.sshfl [vmem:[#allocation1] sm:$0xff pattern:$0x73625140]  ;;  %v5553_v13 = vld.sshfl [vmem:[#allocation1 + $0x8] sm:$0xff pattern:$0x73625140] }
 0x2ac   :  { %6749 = vst [vmem:[#allocation117_spill] sm:$0xff] %v5553_v13  ;;  %v5555_v11 = vld.sshfl [vmem:[#allocation1 + $0x10] sm:$0xff pattern:$0x73625140] }
 0x2ad   :  { %6750 = vst [vmem:[#allocation116_spill] sm:$0xff] %v5555_v11  ;;  %v5557_v22 = vld.sshfl [vmem:[#allocation1 + $0x18] sm:$0xff pattern:$0x73625140]  ;;  %v2300_v11 = vadd.f32 %v2299_v54, %v2298_v34 }
 0x2ae   :  { %6751 = vst [vmem:[#allocation118_spill] sm:$0xff] %v5557_v22  ;;  %v5559_v44 = vld.sshfl [vmem:[#allocation1 + $0x20] sm:$0xff pattern:$0x73625140]  ;;  %v111_v22 = vld [vmem:[#allocation3 + $0x220] sm:$0xff] }
 0x2af   :  { %6752 = vst [vmem:[#allocation120_spill] sm:$0xff] %v5559_v44  ;;  %v5561_v32 = vld.sshfl [vmem:[#allocation1 + $0x28] sm:$0xff pattern:$0x73625140]  ;;  %v112_v44 = vld [vmem:[#allocation3 + $0x228] sm:$0xff] }
 0x2b0   :  { %6753 = vst [vmem:[#allocation119_spill] sm:$0xff] %v5561_v32  ;;  %v5563_v25 = vld.sshfl [vmem:[#allocation1 + $0x30] sm:$0xff pattern:$0x73625140]  ;;  %v2302_v32 = vadd.f32 %v2301_v17, %v2300_v11 }
 0x2b1   :  { %6754 = vst [vmem:[#allocation121_spill] sm:$0xff] %v5563_v25  ;;  %v5565_v53 = vld.sshfl [vmem:[#allocation1 + $0x38] sm:$0xff pattern:$0x73625140]  ;;  %v6766_v17 = vld [vmem:[#allocation79_spill] sm:$0xff] }
 0x2b2   :  { %1573 = vst [vmem:[#allocation1] ss:$4 sm:$0xff] %v1150_v41  ;;  %v6758_v25 = vld [vmem:[#allocation52_spill] sm:$0xff]  ;;  %v2305_v41 = vsel %vm765_vm1, %v5261_v46, 0.0  ;;  %v2304_v54 = vadd.f32 %v2303_v52, %v2302_v32  ;;  %v2311_v32 = vsel %vm765_vm1, %v6766_v17, 0.0 }
 0x2b3   :  { %1574 = vst [vmem:[#allocation1 + $0x20] ss:$4 sm:$0xff] %v1151_v3  ;;  %v1152_v13 = vmul.f32 %v6758_v25, %v111_v22  ;;  %v6759_v3 = vld [vmem:[#allocation54_spill] sm:$0xff]  ;;  %v113_v52 = vld [vmem:[#allocation3 + $0x230] sm:$0xff] }
 0x2b4   :  { %v1153_v9 = vmul.f32 %v6759_v3, %v112_v44  ;;  %v2306_v46 = vadd.f32 %v2305_v41, %v2304_v54  ;;  %v6767_v3 = vld [vmem:[#allocation81_spill] sm:$0xff] }
 0x2b5   :  { %v6769_v54 = vld [vmem:[#allocation53_spill] sm:$0xff] }
 0x2b6   :  { %v2308_v44 = vadd.f32 %v2307_v36, %v2306_v46  ;;  %v2319_v36 = vsel %vm765_vm1, %v5275_v14, 0.0 }
 0x2b8   :  { %v2310_v56 = vadd.f32 %v2309_v5, %v2308_v44 }
 0x2b9   :  { %v5579_v37 = vld.sshfl [vmem:[#allocation1] sm:$0xff pattern:$0x73625140]  ;;  %v5581_v15 = vld.sshfl [vmem:[#allocation1 + $0x8] sm:$0xff pattern:$0x73625140] }
 0x2ba   :  { %v5583_v60 = vld.sshfl [vmem:[#allocation1 + $0x10] sm:$0xff pattern:$0x73625140]  ;;  %v5585_v34 = vld.sshfl [vmem:[#allocation1 + $0x18] sm:$0xff pattern:$0x73625140] }
 0x2bb   :  { %6760 = vst [vmem:[#allocation123_spill] sm:$0xff] %v5583_v60  ;;  %v5587_v11 = vld.sshfl [vmem:[#allocation1 + $0x20] sm:$0xff pattern:$0x73625140]  ;;  %v6770_v60 = vld [vmem:[#allocation82_spill] sm:$0xff] }
 0x2bc   :  { %6761 = vst [vmem:[#allocation122_spill] sm:$0xff] %v5585_v34  ;;  %v5589_v22 = vld.sshfl [vmem:[#allocation1 + $0x28] sm:$0xff pattern:$0x73625140]  ;;  %v2312_v34 = vadd.f32 %v2311_v32, %v2310_v56  ;;  %v2317_v6 = vsel %vm765_vm1, %v6770_v60, 0.0 }
 0x2bd   :  { %6762 = vst [vmem:[#allocation124_spill] sm:$0xff] %v5587_v11  ;;  %v5591_v25 = vld.sshfl [vmem:[#allocation1 + $0x30] sm:$0xff pattern:$0x73625140]  ;;  %v2313_v11 = vsel %vm765_vm1, %v6767_v3, 0.0  ;;  %v2323_v3 = vsel %vm765_vm1, %v5291_v63, 0.0 }
 0x2be   :  { %6763 = vst [vmem:[#allocation126_spill] sm:$0xff] %v5589_v22  ;;  %v5593_v23 = vld.sshfl [vmem:[#allocation1 + $0x38] sm:$0xff pattern:$0x73625140]  ;;  %v114_v22 = vld [vmem:[#allocation3 + $0x238] sm:$0xff] }
 0x2bf   :  { %6764 = vst [vmem:[#allocation125_spill] sm:$0xff] %v5591_v25  ;;  %v6768_v25 = vld [vmem:[#allocation80_spill] sm:$0xff] }
 0x2c0   :  { %6765 = vst [vmem:[#allocation127_spill] sm:$0xff] %v5593_v23  ;;  %v2315_v41 = vsel %vm765_vm1, %v6768_v25, 0.0  ;;  %v2314_v23 = vadd.f32 %v2313_v11, %v2312_v34 }
 0x2c1   :  { %1583 = vst [vmem:[#allocation1] ss:$4 sm:$0xff] %v1152_v13  ;;  %v1154_v13 = vmul.f32 %v6769_v54, %v113_v52  ;;  %v115_v54 = vld [vmem:[#allocation3 + $0x240] sm:$0xff] }
 0x2c2   :  { %1584 = vst [vmem:[#allocation1 + $0x20] ss:$4 sm:$0xff] %v1153_v9  ;;  %v6771_v9 = vld [vmem:[#allocation55_spill] sm:$0xff]  ;;  %v2316_v56 = vadd.f32 %v2315_v41, %v2314_v23  ;;  %v2325_v23 = vsel %vm765_vm1, %v5293_v19, 0.0 }
 0x2c3   :  { %v1155_v46 = vmul.f32 %v6771_v9, %v114_v22  ;;  %v2321_v22 = vsel %vm765_vm1, %v5289_v40, 0.0  ;;  %v6776_v40 = vld [vmem:[#allocation56_spill] sm:$0xff] }
 0x2c4   :  { %v2318_v14 = vadd.f32 %v2317_v6, %v2316_v56  ;;  %v2329_v6 = vsel %vm765_vm1, %v5297_v0, 0.0  ;;  %v6782_v0 = vld [vmem:[#allocation84_spill] sm:$0xff] }
 0x2c6   :  { %v2320_v52 = vadd.f32 %v2319_v36, %v2318_v14 }
 0x2c8   :  { %v5609_v5 = vld.sshfl [vmem:[#allocation1] sm:$0xff pattern:$0x73625140]  ;;  %v5611_v44 = vld.sshfl [vmem:[#allocation1 + $0x8] sm:$0xff pattern:$0x73625140]  ;;  %v2322_v9 = vadd.f32 %v2321_v22, %v2320_v52 }
 0x2c9   :  { %v5613_v17 = vld.sshfl [vmem:[#allocation1 + $0x10] sm:$0xff pattern:$0x73625140]  ;;  %v5615_v32 = vld.sshfl [vmem:[#allocation1 + $0x18] sm:$0xff pattern:$0x73625140] }
 0x2ca   :  { %v5617_v25 = vld.sshfl [vmem:[#allocation1 + $0x20] sm:$0xff pattern:$0x73625140]  ;;  %v5619_v34 = vld.sshfl [vmem:[#allocation1 + $0x28] sm:$0xff pattern:$0x73625140]  ;;  %v2324_v41 = vadd.f32 %v2323_v3, %v2322_v9 }
 0x2cb   :  { %6772 = vst [vmem:[#allocation129_spill] sm:$0xff] %v5617_v25  ;;  %v5621_v11 = vld.sshfl [vmem:[#allocation1 + $0x30] sm:$0xff pattern:$0x73625140] }
 0x2cc   :  { %6773 = vst [vmem:[#allocation128_spill] sm:$0xff] %v5619_v34  ;;  %v5623_v60 = vld.sshfl [vmem:[#allocation1 + $0x38] sm:$0xff pattern:$0x73625140]  ;;  %v116_v25 = vld [vmem:[#allocation3 + $0x248] sm:$0xff]  ;;  %v2326_v14 = vadd.f32 %v2325_v23, %v2324_v41 }
 0x2cd   :  { %6774 = vst [vmem:[#allocation130_spill] sm:$0xff] %v5621_v11  ;;  %v6775_v11 = vld [vmem:[#allocation57_spill] sm:$0xff]  ;;  %v1157_v36 = vmul.f32 %v6776_v40, %v116_v25  ;;  %v2331_v25 = vsel %vm765_vm1, %v6782_v0, 0.0  ;;  %v6783_v9 = vld [vmem:[#allocation83_spill] sm:$0xff]  ;;  %v117_v40 = vld [vmem:[#allocation3 + $0x250] sm:$0xff] }
 0x2ce   :  { %1593 = vst [vmem:[#allocation1] ss:$4 sm:$0xff] %v1154_v13  ;;  %v1156_v34 = vmul.f32 %v6775_v11, %v115_v54  ;;  %v2327_v13 = vsel %vm765_vm1, %v5295_v10, 0.0  ;;  %v2333_v23 = vsel %vm765_vm1, %v6783_v9, 0.0 }
 0x2cf   :  { %1594 = vst [vmem:[#allocation1 + $0x20] ss:$4 sm:$0xff] %v1155_v46  ;;  %v2328_v10 = vadd.f32 %v2327_v13, %v2326_v14  ;;  %v2337_v13 = vsel %vm765_vm1, %v5319_v35, 0.0  ;;  %v6785_v14 = vld [vmem:[#allocation58_spill] sm:$0xff] }
 0x2d1   :  { %v2330_v54 = vadd.f32 %v2329_v6, %v2328_v10  ;;  %v2341_v6 = vsel %vm765_vm1, %v5323_v4, 0.0  ;;  %v6786_v10 = vld [vmem:[#allocation60_spill] sm:$0xff] }
 0x2d3   :  { %v2332_v41 = vadd.f32 %v2331_v25, %v2330_v54 }
 0x2d5   :  { %v5637_v46 = vld.sshfl [vmem:[#allocation1] sm:$0xff pattern:$0x73625140]  ;;  %v5639_v63 = vld.sshfl [vmem:[#allocation1 + $0x8] sm:$0xff pattern:$0x73625140] }
 0x2d6   :  { %v5641_v56 = vld.sshfl [vmem:[#allocation1 + $0x10] sm:$0xff pattern:$0x73625140]  ;;  %v5643_v22 = vld.sshfl [vmem:[#allocation1 + $0x18] sm:$0xff pattern:$0x73625140] }
 0x2d7   :  { %6777 = vst [vmem:[#allocation132_spill] sm:$0xff] %v5641_v56  ;;  %v5645_v19 = vld.sshfl [vmem:[#allocation1 + $0x20] sm:$0xff pattern:$0x73625140]  ;;  %v2334_v56 = vadd.f32 %v2333_v23, %v2332_v41 }
 0x2d8   :  { %6778 = vst [vmem:[#allocation131_spill] sm:$0xff] %v5643_v22  ;;  %v5647_v11 = vld.sshfl [vmem:[#allocation1 + $0x28] sm:$0xff pattern:$0x73625140]  ;;  %v6784_v22 = vld [vmem:[#allocation85_spill] sm:$0xff] }
 0x2d9   :  { %6779 = vst [vmem:[#allocation133_spill] sm:$0xff] %v5645_v19  ;;  %v5649_v52 = vld.sshfl [vmem:[#allocation1 + $0x30] sm:$0xff pattern:$0x73625140]  ;;  %v2335_v19 = vsel %vm765_vm1, %v6784_v22, 0.0 }
 0x2da   :  { %6780 = vst [vmem:[#allocation135_spill] sm:$0xff] %v5647_v11  ;;  %v5651_v3 = vld.sshfl [vmem:[#allocation1 + $0x38] sm:$0xff pattern:$0x73625140]  ;;  %v118_v11 = vld [vmem:[#allocation3 + $0x258] sm:$0xff] }
 0x2db   :  { %6781 = vst [vmem:[#allocation134_spill] sm:$0xff] %v5651_v3  ;;  %v2336_v3 = vadd.f32 %v2335_v19, %v2334_v56  ;;  %v1159_v0 = vmul.f32 %v6786_v10, %v118_v11  ;;  %v2343_v11 = vsel %vm765_vm1, %v5325_v48, 0.0  ;;  %v119_v10 = vld [vmem:[#allocation3 + $0x260] sm:$0xff]  ;;  %v6798_v48 = vld [vmem:[#allocation61_spill] sm:$0xff] }
 0x2dc   :  { %1603 = vst [vmem:[#allocation1] ss:$4 sm:$0xff] %v1156_v34  ;;  %v1158_v34 = vmul.f32 %v6785_v14, %v117_v40  ;;  %v6793_v40 = vld [vmem:[#allocation87_spill] sm:$0xff] }
 0x2dd   :  { %1604 = vst [vmem:[#allocation1 + $0x20] ss:$4 sm:$0xff] %v1157_v36  ;;  %v2339_v36 = vsel %vm765_vm1, %v5321_v43, 0.0  ;;  %v2338_v23 = vadd.f32 %v2337_v13, %v2336_v3  ;;  %v2345_v14 = vsel %vm765_vm1, %v6793_v40, 0.0  ;;  %v6794_v3 = vld [vmem:[#allocation86_spill] sm:$0xff] }
 0x2de   :  { %v2347_v13 = vsel %vm765_vm1, %v6794_v3, 0.0 }
 0x2df   :  { %v2340_v4 = vadd.f32 %v2339_v36, %v2338_v23  ;;  %v6797_v36 = vld [vmem:[#allocation90_spill] sm:$0xff] }
 0x2e1   :  { %v2342_v41 = vadd.f32 %v2341_v6, %v2340_v4 }
 0x2e3   :  { %v5667_v25 = vld.sshfl [vmem:[#allocation1] sm:$0xff pattern:$0x73625140]  ;;  %v5669_v54 = vld.sshfl [vmem:[#allocation1 + $0x8] sm:$0xff pattern:$0x73625140] }
 0x2e4   :  { %v5671_v22 = vld.sshfl [vmem:[#allocation1 + $0x10] sm:$0xff pattern:$0x73625140]  ;;  %v5673_v9 = vld.sshfl [vmem:[#allocation1 + $0x18] sm:$0xff pattern:$0x73625140] }
 0x2e5   :  { %6787 = vst [vmem:[#allocation136_spill] sm:$0xff] %v5671_v22  ;;  %v5675_v35 = vld.sshfl [vmem:[#allocation1 + $0x20] sm:$0xff pattern:$0x73625140] }
 0x2e6   :  { %6788 = vst [vmem:[#allocation138_spill] sm:$0xff] %v5673_v9  ;;  %v5677_v56 = vld.sshfl [vmem:[#allocation1 + $0x28] sm:$0xff pattern:$0x73625140]  ;;  %v2344_v9 = vadd.f32 %v2343_v11, %v2342_v41 }
 0x2e7   :  { %6789 = vst [vmem:[#allocation137_spill] sm:$0xff] %v5675_v35  ;;  %v5679_v19 = vld.sshfl [vmem:[#allocation1 + $0x30] sm:$0xff pattern:$0x73625140] }
 0x2e8   :  { %6790 = vst [vmem:[#allocation139_spill] sm:$0xff] %v5677_v56  ;;  %v5681_v43 = vld.sshfl [vmem:[#allocation1 + $0x38] sm:$0xff pattern:$0x73625140]  ;;  %v120_v35 = vld [vmem:[#allocation3 + $0x268] sm:$0xff]  ;;  %v2346_v56 = vadd.f32 %v2345_v14, %v2344_v9 }
 0x2e9   :  { %6791 = vst [vmem:[#allocation141_spill] sm:$0xff] %v5679_v19  ;;  %v6795_v19 = vld [vmem:[#allocation59_spill] sm:$0xff]  ;;  %v1161_v6 = vmul.f32 %v6798_v48, %v120_v35  ;;  %v2353_v35 = vsel %vm765_vm1, %v5347_v1, 0.0  ;;  %v2357_v48 = vsel %vm765_vm1, %v5351_v8, 0.0 }
 0x2ea   :  { %6792 = vst [vmem:[#allocation140_spill] sm:$0xff] %v5681_v43  ;;  %v1160_v22 = vmul.f32 %v6795_v19, %v119_v10  ;;  %v6796_v43 = vld [vmem:[#allocation88_spill] sm:$0xff]  ;;  %v2348_v41 = vadd.f32 %v2347_v13, %v2346_v56  ;;  %v2355_v56 = vsel %vm765_vm1, %v5349_v57, 0.0 }
 0x2eb   :  { %1613 = vst [vmem:[#allocation1] ss:$4 sm:$0xff] %v1158_v34  ;;  %v2349_v34 = vsel %vm765_vm1, %v6796_v43, 0.0 }
 0x2ec   :  { %1614 = vst [vmem:[#allocation1 + $0x20] ss:$4 sm:$0xff] %v1159_v0  ;;  %v2351_v0 = vsel %vm765_vm1, %v6797_v36, 0.0  ;;  %v2350_v43 = vadd.f32 %v2349_v34, %v2348_v41  ;;  %v121_v36 = vld [vmem:[#allocation3 + $0x270] sm:$0xff]  ;;  %v2359_v34 = vsel %vm765_vm1, %v5353_v18, 0.0  ;;  %v6802_v41 = vld [vmem:[#allocation63_spill] sm:$0xff] }
 0x2ee   :  { %v2352_v3 = vadd.f32 %v2351_v0, %v2350_v43 }
 0x2f0   :  { %v2354_v13 = vadd.f32 %v2353_v35, %v2352_v3 }
 0x2f2   :  { %v5695_v23 = vld.sshfl [vmem:[#allocation1] sm:$0xff pattern:$0x73625140]  ;;  %v5697_v4 = vld.sshfl [vmem:[#allocation1 + $0x8] sm:$0xff pattern:$0x73625140] }
 0x2f3   :  { %v5699_v11 = vld.sshfl [vmem:[#allocation1 + $0x10] sm:$0xff pattern:$0x73625140]  ;;  %v5701_v40 = vld.sshfl [vmem:[#allocation1 + $0x18] sm:$0xff pattern:$0x73625140] }
 0x2f4   :  { %v5703_v9 = vld.sshfl [vmem:[#allocation1 + $0x20] sm:$0xff pattern:$0x73625140]  ;;  %v5705_v19 = vld.sshfl [vmem:[#allocation1 + $0x28] sm:$0xff pattern:$0x73625140] }
 0x2f5   :  { %6799 = vst [vmem:[#allocation142_spill] sm:$0xff] %v5705_v19  ;;  %v5707_v14 = vld.sshfl [vmem:[#allocation1 + $0x30] sm:$0xff pattern:$0x73625140]  ;;  %v2356_v19 = vadd.f32 %v2355_v56, %v2354_v13  ;;  %v6805_v13 = vld [vmem:[#allocation93_spill] sm:$0xff] }
 0x2f6   :  { %6800 = vst [vmem:[#allocation144_spill] sm:$0xff] %v5707_v14  ;;  %v5709_v10 = vld.sshfl [vmem:[#allocation1 + $0x38] sm:$0xff pattern:$0x73625140]  ;;  %v6803_v14 = vld [vmem:[#allocation89_spill] sm:$0xff] }
 0x2f7   :  { %6801 = vst [vmem:[#allocation143_spill] sm:$0xff] %v5709_v10  ;;  %v1162_v10 = vmul.f32 %v6802_v41, %v121_v36  ;;  %v2361_v1 = vsel %vm765_vm1, %v6803_v14, 0.0  ;;  %v2367_v14 = vsel %vm765_vm1, %v6805_v13, 0.0  ;;  %v6808_v13 = vld [vmem:[#allocation96_spill] sm:$0xff] }
 0x2f8   :  { %1623 = vst [vmem:[#allocation1] ss:$4 sm:$0xff] %v1160_v22  ;;  %v2358_v22 = vadd.f32 %v2357_v48, %v2356_v19  ;;  %v2365_v19 = vsel %vm765_vm1, %v5359_v30, 0.0  ;;  %v2369_v48 = vsel %vm765_vm1, %v5377_v38, 0.0  ;;  %v2375_v30 = vsel %vm765_vm1, %v5383_v24, 0.0 }
 0x2f9   :  { %1624 = vst [vmem:[#allocation1 + $0x20] ss:$4 sm:$0xff] %v1161_v6  ;;  %v6804_v6 = vld [vmem:[#allocation91_spill] sm:$0xff]  ;;  %v2385_v24 = vsel %vm765_vm1, %v5405_v62, 0.0 }
 0x2fa   :  { %v2363_v0 = vsel %vm765_vm1, %v6804_v6, 0.0  ;;  %v2360_v35 = vadd.f32 %v2359_v34, %v2358_v22  ;;  %v2371_v34 = vsel %vm765_vm1, %v5379_v47, 0.0  ;;  %v2381_v47 = vsel %vm765_vm1, %v6808_v13, 0.0  ;;  %v6812_v13 = vld [vmem:[#allocation98_spill] sm:$0xff] }
 0x2fc   :  { %v2362_v18 = vadd.f32 %v2361_v1, %v2360_v35 }
 0x2fe   :  { %v2364_v56 = vadd.f32 %v2363_v0, %v2362_v18  ;;  %v6806_v0 = vld [vmem:[#allocation92_spill] sm:$0xff] }
 0x2ff   :  { %v5724_v43 = vld.sshfl [vmem:[#allocation1] sm:$0xff pattern:$0x73625140]  ;;  %v5726_v57 = vld.sshfl [vmem:[#allocation1 + $0x8] sm:$0xff pattern:$0x73625140] }
 0x300   :  { %v5728_v3 = vld.sshfl [vmem:[#allocation1 + $0x10] sm:$0xff pattern:$0x73625140]  ;;  %v5730_v8 = vld.sshfl [vmem:[#allocation1 + $0x18] sm:$0xff pattern:$0x73625140]  ;;  %v2366_v36 = vadd.f32 %v2365_v19, %v2364_v56 }
 0x301   :  { %1633 = vst [vmem:[#allocation1] ss:$4 sm:$0xff] %v1162_v10  ;;  %v2373_v10 = vsel %vm765_vm1, %v5381_v59, 0.0  ;;  %v2377_v35 = vsel %vm765_vm1, %v6806_v0, 0.0  ;;  %v6807_v19 = vld [vmem:[#allocation94_spill] sm:$0xff]  ;;  %v2393_v0 = vsel %vm765_vm1, %v5413_v55, 0.0 }
 0x302   :  { %v2368_v41 = vadd.f32 %v2367_v14, %v2366_v36  ;;  %v2379_v38 = vsel %vm765_vm1, %v6807_v19, 0.0  ;;  %v6809_v36 = vld [vmem:[#allocation95_spill] sm:$0xff]  ;;  %v2403_v55 = vsel %vm765_vm1, %v5437_v58, 0.0 }
 0x303   :  { %v2383_v59 = vsel %vm765_vm1, %v6809_v36, 0.0 }
 0x304   :  { %v2370_v22 = vadd.f32 %v2369_v48, %v2368_v41 }
 0x306   :  { %v2372_v1 = vadd.f32 %v2371_v34, %v2370_v22  ;;  %v2387_v34 = vsel %vm765_vm1, %v5407_v27, 0.0 }
 0x308   :  { %v2374_v6 = vadd.f32 %v2373_v10, %v2372_v1  ;;  %v2389_v10 = vsel %vm765_vm1, %v5409_v2, 0.0  ;;  %v2399_v2 = vsel %vm765_vm1, %v6812_v13, 0.0 }
 0x30a   :  { %v2376_v18 = vadd.f32 %v2375_v30, %v2374_v6  ;;  %v2391_v30 = vsel %vm765_vm1, %v5411_v51, 0.0  ;;  %v2401_v51 = vsel %vm765_vm1, %v5435_v7, 0.0 }
 0x30c   :  { %v2378_v56 = vadd.f32 %v2377_v35, %v2376_v18  ;;  %v6810_v18 = vld [vmem:[#allocation97_spill] sm:$0xff] }
 0x30d   :  { %v2395_v62 = vsel %vm765_vm1, %v6810_v18, 0.0 }
 0x30e   :  { %v2380_v14 = vadd.f32 %v2379_v38, %v2378_v56  ;;  %v6811_v38 = vld [vmem:[#allocation99_spill] sm:$0xff] }
 0x30f   :  { %v2397_v27 = vsel %vm765_vm1, %v6811_v38, 0.0  ;;  %v2419_v38 = vsel %vm765_vm1, %v5465_v21, 0.0 }
 0x310   :  { %v2382_v48 = vadd.f32 %v2381_v47, %v2380_v14 }
 0x312   :  { %v2384_v41 = vadd.f32 %v2383_v59, %v2382_v48  ;;  %v2405_v59 = vsel %vm765_vm1, %v5439_v42, 0.0  ;;  %v2415_v42 = vsel %vm765_vm1, %v5449_v12, 0.0 }
 0x314   :  { %v2386_v22 = vadd.f32 %v2385_v24, %v2384_v41  ;;  %v6813_v24 = vld [vmem:[#allocation100_spill] sm:$0xff] }
 0x315   :  { %v2407_v41 = vsel %vm765_vm1, %v6813_v24, 0.0  ;;  %v6820_v24 = vld [vmem:[#allocation108_spill] sm:$0xff] }
 0x316   :  { %v2388_v1 = vadd.f32 %v2387_v34, %v2386_v22  ;;  %v6814_v22 = vld [vmem:[#allocation102_spill] sm:$0xff] }
 0x318   :  { %v2390_v6 = vadd.f32 %v2389_v10, %v2388_v1  ;;  %v2409_v10 = vsel %vm765_vm1, %v6814_v22, 0.0  ;;  %v2435_v22 = vsel %vm765_vm1, %v5495_v33, 0.0 }
 0x31a   :  { %v2392_v35 = vadd.f32 %v2391_v30, %v2390_v6  ;;  %v6815_v30 = vld [vmem:[#allocation101_spill] sm:$0xff] }
 0x31b   :  { %v2411_v7 = vsel %vm765_vm1, %v6815_v30, 0.0 }
 0x31c   :  { %v2394_v19 = vadd.f32 %v2393_v0, %v2392_v35  ;;  %v6816_v0 = vld [vmem:[#allocation103_spill] sm:$0xff] }
 0x31d   :  { %v2413_v58 = vsel %vm765_vm1, %v6816_v0, 0.0 }
 0x31e   :  { %v2396_v56 = vadd.f32 %v2395_v62, %v2394_v19  ;;  %v2417_v62 = vsel %vm765_vm1, %v5463_v26, 0.0 }
 0x320   :  { %v2398_v47 = vadd.f32 %v2397_v27, %v2396_v56  ;;  %v2421_v56 = vsel %vm765_vm1, %v5467_v45, 0.0  ;;  %v2431_v45 = vsel %vm765_vm1, %v6820_v24, 0.0 }
 0x322   :  { %v2400_v14 = vadd.f32 %v2399_v2, %v2398_v47  ;;  %v2423_v2 = vsel %vm765_vm1, %v5469_v28, 0.0  ;;  %v2433_v28 = vsel %vm765_vm1, %v5493_v61, 0.0 }
 0x324   :  { %v2402_v36 = vadd.f32 %v2401_v51, %v2400_v14  ;;  %v6817_v51 = vld [vmem:[#allocation105_spill] sm:$0xff] }
 0x325   :  { %v2425_v12 = vsel %vm765_vm1, %v6817_v51, 0.0 }
 0x326   :  { %v2404_v48 = vadd.f32 %v2403_v55, %v2402_v36  ;;  %v6818_v55 = vld [vmem:[#allocation104_spill] sm:$0xff] }
 0x327   :  { %v2427_v26 = vsel %vm765_vm1, %v6818_v55, 0.0  ;;  %v2455_v55 = vsel %vm765_vm1, %v5527_v20, 0.0  ;;  %v2465_v20 = vsel %vm765_vm1, %v5551_v50, 0.0 }
 0x328   :  { %v2406_v34 = vadd.f32 %v2405_v59, %v2404_v48  ;;  %v6819_v59 = vld [vmem:[#allocation106_spill] sm:$0xff] }
 0x329   :  { %v2429_v21 = vsel %vm765_vm1, %v6819_v59, 0.0 }
 0x32a   :  { %v2408_v1 = vadd.f32 %v2407_v41, %v2406_v34 }
 0x32c   :  { %v2410_v6 = vadd.f32 %v2409_v10, %v2408_v1  ;;  %v2437_v1 = vsel %vm765_vm1, %v5497_v16, 0.0 }
 0x32e   :  { %v2412_v35 = vadd.f32 %v2411_v7, %v2410_v6  ;;  %v6821_v7 = vld [vmem:[#allocation107_spill] sm:$0xff] }
 0x32f   :  { %v2439_v6 = vsel %vm765_vm1, %v6821_v7, 0.0 }
 0x330   :  { %v2414_v18 = vadd.f32 %v2413_v58, %v2412_v35  ;;  %v6822_v58 = vld [vmem:[#allocation109_spill] sm:$0xff] }
 0x331   :  { %v2441_v35 = vsel %vm765_vm1, %v6822_v58, 0.0 }
 0x332   :  { %v2416_v19 = vadd.f32 %v2415_v42, %v2414_v18  ;;  %v6823_v18 = vld [vmem:[#allocation111_spill] sm:$0xff] }
 0x333   :  { %v2443_v61 = vsel %vm765_vm1, %v6823_v18, 0.0 }
 0x334   :  { %v2418_v27 = vadd.f32 %v2417_v62, %v2416_v19  ;;  %v6824_v19 = vld [vmem:[#allocation110_spill] sm:$0xff] }
 0x335   :  { %v2445_v33 = vsel %vm765_vm1, %v6824_v19, 0.0  ;;  %v6834_v19 = vld [vmem:[#allocation121_spill] sm:$0xff] }
 0x336   :  { %v2420_v13 = vadd.f32 %v2419_v38, %v2418_v27  ;;  %v6825_v27 = vld [vmem:[#allocation112_spill] sm:$0xff] }
 0x337   :  { %v2447_v16 = vsel %vm765_vm1, %v6825_v27, 0.0  ;;  %v2479_v27 = vsel %vm765_vm1, %v5565_v53, 0.0 }
 0x338   :  { %v2422_v47 = vadd.f32 %v2421_v56, %v2420_v13  ;;  %v2449_v13 = vsel %vm765_vm1, %v5521_v49, 0.0 }
 0x33a   :  { %v2424_v14 = vadd.f32 %v2423_v2, %v2422_v47  ;;  %v2451_v47 = vsel %vm765_vm1, %v5523_v31, 0.0  ;;  %v2461_v31 = vsel %vm765_vm1, %v5533_v29, 0.0 }
 0x33c   :  { %v2426_v36 = vadd.f32 %v2425_v12, %v2424_v14  ;;  %v2453_v12 = vsel %vm765_vm1, %v5525_v39, 0.0 }
 0x33e   :  { %v2428_v48 = vadd.f32 %v2427_v26, %v2426_v36  ;;  %v6826_v36 = vld [vmem:[#allocation114_spill] sm:$0xff] }
 0x33f   :  { %v2457_v59 = vsel %vm765_vm1, %v6826_v36, 0.0 }
 0x340   :  { %v2430_v41 = vadd.f32 %v2429_v21, %v2428_v48  ;;  %v6827_v48 = vld [vmem:[#allocation113_spill] sm:$0xff] }
 0x341   :  { %v2459_v49 = vsel %vm765_vm1, %v6827_v48, 0.0  ;;  %v6838_v48 = vld [vmem:[#allocation126_spill] sm:$0xff] }
 0x342   :  { %v2432_v34 = vadd.f32 %v2431_v45, %v2430_v41  ;;  %v6828_v41 = vld [vmem:[#allocation115_spill] sm:$0xff] }
 0x343   :  { %v2463_v39 = vsel %vm765_vm1, %v6828_v41, 0.0 }
 0x344   :  { %v2434_v10 = vadd.f32 %v2433_v28, %v2432_v34 }
 0x346   :  { %v2436_v30 = vadd.f32 %v2435_v22, %v2434_v10  ;;  %v6829_v22 = vld [vmem:[#allocation117_spill] sm:$0xff] }
 0x347   :  { %v2467_v10 = vsel %vm765_vm1, %v6829_v22, 0.0 }
 0x348   :  { %v2438_v0 = vadd.f32 %v2437_v1, %v2436_v30  ;;  %v6830_v30 = vld [vmem:[#allocation116_spill] sm:$0xff] }
 0x349   :  { %v2469_v7 = vsel %vm765_vm1, %v6830_v30, 0.0  ;;  %v2503_v30 = vsel %vm765_vm1, %v5615_v32, 0.0  ;;  %v2513_v32 = vsel %vm765_vm1, %v5637_v46, 0.0 }
 0x34a   :  { %v2440_v42 = vadd.f32 %v2439_v6, %v2438_v0  ;;  %v6831_v0 = vld [vmem:[#allocation118_spill] sm:$0xff] }
 0x34b   :  { %v2471_v29 = vsel %vm765_vm1, %v6831_v0, 0.0 }
 0x34c   :  { %v2442_v62 = vadd.f32 %v2441_v35, %v2440_v42  ;;  %v6832_v35 = vld [vmem:[#allocation120_spill] sm:$0xff] }
 0x34d   :  { %v2473_v42 = vsel %vm765_vm1, %v6832_v35, 0.0 }
 0x34e   :  { %v2444_v38 = vadd.f32 %v2443_v61, %v2442_v62  ;;  %v6833_v61 = vld [vmem:[#allocation119_spill] sm:$0xff] }
 0x34f   :  { %v2475_v50 = vsel %vm765_vm1, %v6833_v61, 0.0 }
 0x350   :  { %v2446_v56 = vadd.f32 %v2445_v33, %v2444_v38  ;;  %v2477_v33 = vsel %vm765_vm1, %v6834_v19, 0.0 }
 0x352   :  { %v2448_v2 = vadd.f32 %v2447_v16, %v2446_v56  ;;  %v2481_v56 = vsel %vm765_vm1, %v5579_v37, 0.0  ;;  %v2491_v37 = vsel %vm765_vm1, %v6838_v48, 0.0 }
 0x354   :  { %v2450_v51 = vadd.f32 %v2449_v13, %v2448_v2  ;;  %v2483_v2 = vsel %vm765_vm1, %v5581_v15, 0.0 }
 0x356   :  { %v2452_v14 = vadd.f32 %v2451_v47, %v2450_v51  ;;  %v6835_v51 = vld [vmem:[#allocation123_spill] sm:$0xff] }
 0x358   :  { %v2454_v26 = vadd.f32 %v2453_v12, %v2452_v14  ;;  %v2485_v12 = vsel %vm765_vm1, %v6835_v51, 0.0  ;;  %v6847_v51 = vld [vmem:[#allocation135_spill] sm:$0xff] }
 0x359   :  { %v2523_v46 = vsel %vm765_vm1, %v6847_v51, 0.0  ;;  %v1631_v51 = vld.sshfl [vmem:[#allocation1 + $0x30] sm:$0xff pattern:$0x73625140] }
 0x35a   :  { %v2456_v21 = vadd.f32 %v2455_v55, %v2454_v26  ;;  %v6836_v55 = vld [vmem:[#allocation122_spill] sm:$0xff] }
 0x35b   :  { %v2487_v26 = vsel %vm765_vm1, %v6836_v55, 0.0  ;;  %v6848_v55 = vld [vmem:[#allocation134_spill] sm:$0xff] }
 0x35c   :  { %v2458_v24 = vadd.f32 %v2457_v59, %v2456_v21  ;;  %v6837_v59 = vld [vmem:[#allocation124_spill] sm:$0xff] }
 0x35d   :  { %v2489_v53 = vsel %vm765_vm1, %v6837_v59, 0.0  ;;  %v2529_v59 = vsel %vm765_vm1, %v5667_v25, 0.0 }
 0x35e   :  { %v2460_v45 = vadd.f32 %v2459_v49, %v2458_v24  ;;  %v6839_v24 = vld [vmem:[#allocation125_spill] sm:$0xff] }
 0x35f   :  { %v2493_v15 = vsel %vm765_vm1, %v6839_v24, 0.0 }
 0x360   :  { %v2462_v28 = vadd.f32 %v2461_v31, %v2460_v45  ;;  %v6840_v45 = vld [vmem:[#allocation127_spill] sm:$0xff] }
 0x361   :  { %v2495_v41 = vsel %vm765_vm1, %v6840_v45, 0.0  ;;  %v6851_v45 = vld [vmem:[#allocation137_spill] sm:$0xff] }
 0x362   :  { %v2464_v34 = vadd.f32 %v2463_v39, %v2462_v28  ;;  %v2497_v28 = vsel %vm765_vm1, %v5609_v5, 0.0 }
 0x364   :  { %v2466_v1 = vadd.f32 %v2465_v20, %v2464_v34  ;;  %v2499_v34 = vsel %vm765_vm1, %v5611_v44, 0.0 }
 0x366   :  { %v2468_v6 = vadd.f32 %v2467_v10, %v2466_v1  ;;  %v2501_v10 = vsel %vm765_vm1, %v5613_v17, 0.0  ;;  %v2511_v17 = vsel %vm765_vm1, %v5623_v60, 0.0 }
 0x368   :  { %v2470_v58 = vadd.f32 %v2469_v7, %v2468_v6  ;;  %v6841_v6 = vld [vmem:[#allocation129_spill] sm:$0xff] }
 0x369   :  { %v2505_v0 = vsel %vm765_vm1, %v6841_v6, 0.0 }
 0x36a   :  { %v2472_v18 = vadd.f32 %v2471_v29, %v2470_v58  ;;  %v6842_v58 = vld [vmem:[#allocation128_spill] sm:$0xff] }
 0x36b   :  { %v2507_v5 = vsel %vm765_vm1, %v6842_v58, 0.0  ;;  %v2549_v58 = vsel %vm765_vm1, %v5699_v11, 0.0 }
 0x36c   :  { %v2474_v62 = vadd.f32 %v2473_v42, %v2472_v18  ;;  %v6843_v42 = vld [vmem:[#allocation130_spill] sm:$0xff] }
 0x36d   :  { %v2509_v44 = vsel %vm765_vm1, %v6843_v42, 0.0 }
 0x36e   :  { %v2476_v38 = vadd.f32 %v2475_v50, %v2474_v62  ;;  %v2515_v62 = vsel %vm765_vm1, %v5639_v63, 0.0  ;;  %v2525_v63 = vsel %vm765_vm1, %v5649_v52, 0.0 }
 0x370   :  { %v2478_v16 = vadd.f32 %v2477_v33, %v2476_v38  ;;  %v6844_v33 = vld [vmem:[#allocation132_spill] sm:$0xff] }
 0x371   :  { %v2517_v38 = vsel %vm765_vm1, %v6844_v33, 0.0 }
 0x372   :  { %v2480_v13 = vadd.f32 %v2479_v27, %v2478_v16  ;;  %v6845_v16 = vld [vmem:[#allocation131_spill] sm:$0xff] }
 0x374   :  { %v2482_v47 = vadd.f32 %v2481_v56, %v2480_v13  ;;  %v2519_v56 = vsel %vm765_vm1, %v6845_v16, 0.0  ;;  %v1629_v16 = vld.sshfl [vmem:[#allocation1 + $0x20] sm:$0xff pattern:$0x73625140] }
 0x376   :  { %v2484_v14 = vadd.f32 %v2483_v2, %v2482_v47  ;;  %v6846_v2 = vld [vmem:[#allocation133_spill] sm:$0xff] }
 0x377   :  { %v2521_v60 = vsel %vm765_vm1, %v6846_v2, 0.0  ;;  %v1630_v2 = vld.sshfl [vmem:[#allocation1 + $0x28] sm:$0xff pattern:$0x73625140] }
 0x378   :  { %v2486_v36 = vadd.f32 %v2485_v12, %v2484_v14 }
 0x37a   :  { %v2488_v21 = vadd.f32 %v2487_v26, %v2486_v36  ;;  %v2527_v26 = vsel %vm765_vm1, %v6848_v55, 0.0 }
 0x37c   :  { %v2490_v49 = vadd.f32 %v2489_v53, %v2488_v21  ;;  %v2531_v21 = vsel %vm765_vm1, %v5669_v54, 0.0 }
 0x37e   :  { %v2492_v31 = vadd.f32 %v2491_v37, %v2490_v49  ;;  %v6849_v37 = vld [vmem:[#allocation136_spill] sm:$0xff] }
 0x37f   :  { %v2533_v49 = vsel %vm765_vm1, %v6849_v37, 0.0 }
 0x380   :  { %v2494_v39 = vadd.f32 %v2493_v15, %v2492_v31  ;;  %v6850_v15 = vld [vmem:[#allocation138_spill] sm:$0xff] }
 0x381   :  { %v2535_v52 = vsel %vm765_vm1, %v6850_v15, 0.0 }
 0x382   :  { %v2496_v20 = vadd.f32 %v2495_v41, %v2494_v39  ;;  %v2537_v41 = vsel %vm765_vm1, %v6851_v45, 0.0  ;;  %v171_v45 = vpop.xlane.xlu0 %170 }
 0x384   :  { %v2498_v22 = vadd.f32 %v2497_v28, %v2496_v20  ;;  %v6852_v28 = vld [vmem:[#allocation139_spill] sm:$0xff] }
 0x385   :  { %v2539_v25 = vsel %vm765_vm1, %v6852_v28, 0.0 }
 0x386   :  { %v2500_v1 = vadd.f32 %v2499_v34, %v2498_v22  ;;  %v6853_v34 = vld [vmem:[#allocation141_spill] sm:$0xff] }
 0x387   :  { %v2541_v54 = vsel %vm765_vm1, %v6853_v34, 0.0 }
 0x388   :  { %v2502_v7 = vadd.f32 %v2501_v10, %v2500_v1  ;;  %v6854_v10 = vld [vmem:[#allocation140_spill] sm:$0xff] }
 0x389   :  { %v2543_v1 = vsel %vm765_vm1, %v6854_v10, 0.0 }
 0x38a   :  { %v2504_v29 = vadd.f32 %v2503_v30, %v2502_v7  ;;  %v2545_v7 = vsel %vm765_vm1, %v5695_v23, 0.0 }
 0x38c   :  { %v2506_v35 = vadd.f32 %v2505_v0, %v2504_v29  ;;  %v2547_v0 = vsel %vm765_vm1, %v5697_v4, 0.0 }
 0x38e   :  { %v2508_v18 = vadd.f32 %v2507_v5, %v2506_v35  ;;  %v2551_v35 = vsel %vm765_vm1, %v5701_v40, 0.0  ;;  %v2561_v40 = vsel %vm765_vm1, %v5724_v43, 0.0  ;;  %v2571_v43 = vsel %vm765_vm1, %v1630_v2, 0.0 }
 0x390   :  { %v2510_v61 = vadd.f32 %v2509_v44, %v2508_v18  ;;  %v2553_v44 = vsel %vm765_vm1, %v5703_v9, 0.0  ;;  %v2563_v9 = vsel %vm765_vm1, %v5726_v57, 0.0  ;;  %v2573_v57 = vsel %vm765_vm1, %v1631_v51, 0.0 }
 0x392   :  { %v2512_v50 = vadd.f32 %v2511_v17, %v2510_v61  ;;  %v6855_v17 = vld [vmem:[#allocation142_spill] sm:$0xff] }
 0x393   :  { %v2555_v23 = vsel %vm765_vm1, %v6855_v17, 0.0 }
 0x394   :  { %v2514_v19 = vadd.f32 %v2513_v32, %v2512_v50  ;;  %v6856_v32 = vld [vmem:[#allocation144_spill] sm:$0xff] }
 0x395   :  { %v2557_v4 = vsel %vm765_vm1, %v6856_v32, 0.0 }
 0x396   :  { %v2516_v27 = vadd.f32 %v2515_v62, %v2514_v19  ;;  %v6857_v62 = vld [vmem:[#allocation143_spill] sm:$0xff] }
 0x397   :  { %v2559_v11 = vsel %vm765_vm1, %v6857_v62, 0.0 }
 0x398   :  { %v2518_v13 = vadd.f32 %v2517_v38, %v2516_v27  ;;  %v2565_v27 = vsel %vm765_vm1, %v5728_v3, 0.0 }
 0x39a   :  { %v2520_v47 = vadd.f32 %v2519_v56, %v2518_v13  ;;  %v2567_v13 = vsel %vm765_vm1, %v5730_v8, 0.0 }
 0x39c   :  { %v2522_v12 = vadd.f32 %v2521_v60, %v2520_v47  ;;  %v2569_v47 = vsel %vm765_vm1, %v1629_v16, 0.0 }
 0x39e   :  { %v2524_v14 = vadd.f32 %v2523_v46, %v2522_v12  ;;  %v1632_v12 = vld.sshfl [vmem:[#allocation1 + $0x38] sm:$0xff pattern:$0x73625140] }
 0x39f   :  { %v2575_v3 = vsel %vm765_vm1, %v1632_v12, 0.0 }
 0x3a0   :  { %v2526_v36 = vadd.f32 %v2525_v63, %v2524_v14  ;;  %v1634_v14 = vld.sshfl [vmem:[#allocation1] sm:$0xff pattern:$0x73625140] }
 0x3a1   :  { %v2577_v8 = vsel %vm765_vm1, %v1634_v14, 0.0 }
 0x3a2   :  { %v2528_v53 = vadd.f32 %v2527_v26, %v2526_v36  ;;  %v1635_v26 = vld.sshfl [vmem:[#allocation1 + $0x8] sm:$0xff pattern:$0x73625140] }
 0x3a4   :  { %v2530_v48 = vadd.f32 %v2529_v59, %v2528_v53  ;;  %v1636_v59 = vld.sshfl [vmem:[#allocation1 + $0x10] sm:$0xff pattern:$0x73625140] }
 0x3a6   :  { %v2532_v24 = vadd.f32 %v2531_v21, %v2530_v48  ;;  %v2579_v21 = vsel %vm765_vm1, %v1635_v26, 0.0  ;;  %v1637_v48 = vld.sshfl [vmem:[#allocation1 + $0x18] sm:$0xff pattern:$0x73625140] }
 0x3a7   :  { %v2583_v15 = vsel %vm765_vm1, %v1637_v48, 0.0 }
 0x3a8   :  { %v2534_v31 = vadd.f32 %v2533_v49, %v2532_v24  ;;  %v2581_v49 = vsel %vm765_vm1, %v1636_v59, 0.0 }
 0x3aa   :  { %v2536_v39 = vadd.f32 %v2535_v52, %v2534_v31 }
 0x3ac   :  { %v2538_v20 = vadd.f32 %v2537_v41, %v2536_v39  ;;  %v2589_v39 = vstv %s5952_s2 }
 0x3ae   :  { %v2540_v22 = vadd.f32 %v2539_v25, %v2538_v20 }
 0x3b0   :  { %v2542_v30 = vadd.f32 %v2541_v54, %v2540_v22 }
 0x3b2   :  { %v2544_v6 = vadd.f32 %v2543_v1, %v2542_v30 }
 0x3b4   :  { %v2546_v29 = vadd.f32 %v2545_v7, %v2544_v6 }
 0x3b6   :  { %v2548_v5 = vadd.f32 %v2547_v0, %v2546_v29 }
 0x3b8   :  { %v2550_v42 = vadd.f32 %v2549_v58, %v2548_v5 }
 0x3ba   :  { %v2552_v18 = vadd.f32 %v2551_v35, %v2550_v42 }
 0x3bc   :  { %v2554_v61 = vadd.f32 %v2553_v44, %v2552_v18 }
 0x3be   :  { %v2556_v50 = vadd.f32 %v2555_v23, %v2554_v61 }
 0x3c0   :  { %v2558_v19 = vadd.f32 %v2557_v4, %v2556_v50 }
 0x3c2   :  { %v2560_v33 = vadd.f32 %v2559_v11, %v2558_v19 }
 0x3c4   :  { %v2562_v38 = vadd.f32 %v2561_v40, %v2560_v33 }
 0x3c6   :  { %v2564_v56 = vadd.f32 %v2563_v9, %v2562_v38 }
 0x3c8   :  { %v2566_v60 = vadd.f32 %v2565_v27, %v2564_v56 }
 0x3ca   :  { %v2568_v46 = vadd.f32 %v2567_v13, %v2566_v60 }
 0x3cc   :  { %v2570_v63 = vadd.f32 %v2569_v47, %v2568_v46 }
 0x3ce   :  { %v2572_v55 = vadd.f32 %v2571_v43, %v2570_v63 }
 0x3d0   :  { %v2574_v36 = vadd.f32 %v2573_v57, %v2572_v55 }
 0x3d2   :  { %v2576_v53 = vadd.f32 %v2575_v3, %v2574_v36 }
 0x3d4   :  { %v2578_v37 = vadd.f32 %v2577_v8, %v2576_v53 }
 0x3d6   :  { %v2580_v24 = vadd.f32 %v2579_v21, %v2578_v37 }
 0x3d8   :  { %v2582_v52 = vadd.f32 %v2581_v49, %v2580_v24 }
 0x3da   :  { %v2584_v31 = vadd.f32 %v2583_v15, %v2582_v52 }
 0x3dc   :  { %2585 = vadd.xlane.f32.xlu0 %v2584_v31 }
 0x44f   :  { %v2586_v41 = vpop.xlane.xlu0 %2585 }
 0x450   :  { %v2587_v28 = vadd.f32 %v2586_v41, %v171_v45 }
 0x452   :  { %v2590_v25 = vadd.f32 %v2589_v39, %v2587_v28 }
 0x454   :  { %2592 = vst.msk [vmem:[%s5953_s3] sm:$0x3] %vm2591_vm4, %v2590_v25 }
 0x455   :  { %2597 = vsyncpa [#allocation4], 1 }
 0x456   :  { %2598 = vsyncpa [#allocation6], 1 }

</bundles_post_ra>
